<compile_context>
chip_gen: v7x
topology: tpu7x:2x2x1
jax: 0.10.0
libtpu: 0.0.40
codegen_flags: <defaults>
</compile_context>

<pallas_src>
import jax
import jax.numpy as jnp
from jax import lax
from jax.experimental import pallas as pl
from jax.experimental.pallas import tpu as pltpu

D_MODEL = 768  # BERT hidden size


def _time_chunk(S, max_chunk=64):
    """Largest divisor of S that is <= max_chunk (so the grid tiles exactly)."""
    c = min(S, max_chunk)
    while S % c:
        c -= 1
    return c


# ----------------------------------------------------------------------------
# Pallas kernel 1: fused (fwd+bwd) input projection, gridded over time chunks.
#   gates_pre[d, t, b, :] = x[t, b, :] @ W_ih_d^T + (b_ih_d + b_hh_d)
# ----------------------------------------------------------------------------
def _input_proj_kernel(x_ref, w_ref, b_ref, out_ref):
    # x_ref:   [Tc, Bp, Din]  (bf16)
    # w_ref:   [1, Din, 4H]   (bf16, W_ih^T of the current direction)
    # b_ref:   [1, 1, 4H]     (f32, b_ih + b_hh)
    # out_ref: [1, Tc, Bp, 4H] (f32)
    tc, bp, din = x_ref.shape
    g = jnp.dot(x_ref[...].reshape(tc * bp, din), w_ref[0],
                preferred_element_type=jnp.float32)
    g = g + b_ref[0]
    out_ref[0] = g.reshape(tc, bp, -1)


def fused_input_proj(x_bf16, w_ih_t, bias, *, time_chunk):
    """x_bf16: [S, Bp, Din] bf16; w_ih_t: [2, Din, 4H] bf16; bias: [2, 1, 4H] f32
    -> gates_pre [2, S, Bp, 4H] f32."""
    S, Bp, Din = x_bf16.shape
    G = w_ih_t.shape[-1]
    C = S // time_chunk
    return pl.pallas_call(
        _input_proj_kernel,
        grid=(2, C),
        in_specs=[
            pl.BlockSpec((time_chunk, Bp, Din), lambda d, i: (i, 0, 0)),
            pl.BlockSpec((1, Din, G), lambda d, i: (d, 0, 0)),
            pl.BlockSpec((1, 1, G), lambda d, i: (d, 0, 0)),
        ],
        out_specs=pl.BlockSpec((1, time_chunk, Bp, G),
                               lambda d, i: (d, i, 0, 0)),
        out_shape=jax.ShapeDtypeStruct((2, S, Bp, G), jnp.float32),
        compiler_params=pltpu.CompilerParams(
            dimension_semantics=("parallel", "parallel")),
    )(x_bf16, w_ih_t, bias)


# ----------------------------------------------------------------------------
# Pallas kernel 2: bidirectional LSTM recurrence over precomputed gates.
#   grid = (direction, time_chunk); backward direction walks reversed chunks
#   and reversed steps inside each chunk (no data flips).
# ----------------------------------------------------------------------------
def _lstm_recurrence_kernel(gates_ref, whh_ref, out_ref, hfin_ref, h_sc, c_sc):
    # gates_ref: [1, Tc, Bp, 4H] f32 (already includes bias)
    # whh_ref:   [1, H, 4H] bf16 (W_hh^T of current direction)
    # out_ref:   [1, Tc, Bp, H] f32
    # hfin_ref:  [1, Bp, H] f32
    # h_sc/c_sc: [Bp, H] f32 scratch (persist across time chunks)
    d = pl.program_id(0)
    i = pl.program_id(1)
    tc = gates_ref.shape[1]
    H = h_sc.shape[-1]

    @pl.when(i == 0)
    def _():
        h_sc[...] = jnp.zeros_like(h_sc)
        c_sc[...] = jnp.zeros_like(c_sc)

    w = whh_ref[0]                                      # [H, 4H] bf16

    def step(t, carry):
        tt = t + d * (tc - 1 - 2 * t)                   # fwd: t, bwd: tc-1-t
        gates = gates_ref[0, tt] + jnp.dot(
            h_sc[...].astype(jnp.bfloat16), w,
            preferred_element_type=jnp.float32)         # [Bp, 4H] f32
        # Full-tile EUP passes, then combine (PyTorch gate order i, f, g, o).
        sig = jax.nn.sigmoid(gates)
        tnh = jnp.tanh(gates)
        i_g = sig[:, 0 * H:1 * H]
        f_g = sig[:, 1 * H:2 * H]
        g_g = tnh[:, 2 * H:3 * H]
        o_g = sig[:, 3 * H:4 * H]
        c_new = f_g * c_sc[...] + i_g * g_g
        h_new = o_g * jnp.tanh(c_new)
        c_sc[...] = c_new
        h_sc[...] = h_new
        out_ref[0, tt] = h_new.astype(out_ref.dtype)
        return carry

    lax.fori_loop(0, tc, step, 0, unroll=min(tc, 8))

    @pl.when(i == pl.num_programs(1) - 1)
    def _():
        hfin_ref[0] = h_sc[...].astype(hfin_ref.dtype)


def lstm_recurrence(gates_pre, w_hh_t, *, time_chunk):
    """gates_pre: [2, S, Bp, 4H] f32; w_hh_t: [2, H, 4H] bf16
    -> (out [2, S, Bp, H] f32, h_final [2, Bp, H] f32)."""
    _, S, Bp, G = gates_pre.shape
    H = w_hh_t.shape[1]
    C = S // time_chunk
    chunk_map = lambda d, i: (d, i + d * (C - 1 - 2 * i), 0, 0)
    return pl.pallas_call(
        _lstm_recurrence_kernel,
        grid=(2, C),
        in_specs=[
            pl.BlockSpec((1, time_chunk, Bp, G), chunk_map),
            pl.BlockSpec((1, H, G), lambda d, i: (d, 0, 0)),
        ],
        out_specs=(
            pl.BlockSpec((1, time_chunk, Bp, H), chunk_map),
            pl.BlockSpec((1, Bp, H), lambda d, i: (d, 0, 0)),
        ),
        out_shape=(
            jax.ShapeDtypeStruct((2, S, Bp, H), jnp.float32),
            jax.ShapeDtypeStruct((2, Bp, H), jnp.float32),
        ),
        scratch_shapes=[pltpu.VMEM((Bp, H), jnp.float32),
                        pltpu.VMEM((Bp, H), jnp.float32)],
        compiler_params=pltpu.CompilerParams(
            dimension_semantics=("parallel", "arbitrary")),
    )(gates_pre, w_hh_t)


# ----------------------------------------------------------------------------
# Pallas kernel 3: classifier (Linear), bf16 matmul + f32 bias.
# ----------------------------------------------------------------------------
def _linear_kernel(x_ref, w_ref, b_ref, o_ref):
    o_ref[...] = (jnp.dot(x_ref[...], w_ref[...],
                          preferred_element_type=jnp.float32)
                  + b_ref[...]).astype(o_ref.dtype)


def linear(x, w_t, b):
    """x: [B, F]; w_t: [F, V] bf16 (pre-transposed); b: [1, V] -> [B, V] f32."""
    B = x.shape[0]
    V = w_t.shape[1]
    vmem = pl.BlockSpec(memory_space=pltpu.MemorySpace.VMEM)
    return pl.pallas_call(
        _linear_kernel,
        out_shape=jax.ShapeDtypeStruct((B, V), jnp.float32),
        in_specs=[vmem, vmem, vmem],
        out_specs=vmem,
    )(x.astype(jnp.bfloat16), w_t, b)


# ----------------------------------------------------------------------------
# Model: stand-in BERT embedding -> 2-layer bidirectional LSTM -> classifier.
# ----------------------------------------------------------------------------
def _bert_stand_in(ids, mask, params):
    # TODO(synk): the frozen pretrained 12-layer BERT encoder has no clean
    # in-script equivalent; replaced by deterministic embedding + LayerNorm.
    emb = params["word_emb"][ids] + params["pos_emb"][None, : ids.shape[1]]
    mu = emb.mean(axis=-1, keepdims=True)
    var = ((emb - mu) ** 2).mean(axis=-1, keepdims=True)
    x = (emb - mu) / jnp.sqrt(var + 1e-12)
    return x * mask[..., None].astype(x.dtype)          # [B, S, 768]


def bilstm_2layer(x, packed):
    """x: [S, Bp, 768] f32 -> (out [S, Bp, 2H], h_n list of 4 [Bp, H])."""
    S = x.shape[0]
    tc = _time_chunk(S)
    h_n = []
    inp = x
    for layer in range(2):
        w_ih_t, w_hh_t, bias = packed[f"l{layer}"]
        gates = fused_input_proj(inp.astype(jnp.bfloat16), w_ih_t, bias,
                                 time_chunk=tc)          # [2, S, Bp, 4H]
        out, h_fin = lstm_recurrence(gates, w_hh_t, time_chunk=tc)
        inp = jnp.concatenate([out[0], out[1]], axis=-1)  # [S, Bp, 2H]
        h_n += [h_fin[0], h_fin[1]]
    return inp, h_n


def torch_lstm_intent_forward(ids, mask, packed):
    x = _bert_stand_in(ids, mask, packed)                # [B, S, 768]
    x = jnp.transpose(x, (1, 0, 2))                      # torch.transpose(x,0,1)
    S, B, _ = x.shape
    Bp = max(8, -(-B // 8) * 8)                          # pad batch to sublanes
    if Bp != B:
        x = jnp.pad(x, ((0, 0), (0, Bp - B), (0, 0)))
    _, h_n = bilstm_2layer(x, packed)
    # classifier over concatenated final fwd/bwd hidden of the top layer.
    h_top = jnp.concatenate([h_n[2][:B], h_n[3][:B]], axis=-1)   # [B, 2H]
    return linear(h_top, packed["cls_w_t"], packed["cls_b"])


# ----------------------------------------------------------------------------
# Pure-JAX reference (same bf16-matmul / f32-accumulate recipe).
# ----------------------------------------------------------------------------
def _recur_ref(gates_pre, w_hh_t_d):
    H = w_hh_t_d.shape[0]
    B = gates_pre.shape[1]

    def step(carry, g_t):
        h, c = carry
        gates = g_t + jnp.dot(h.astype(jnp.bfloat16), w_hh_t_d,
                              preferred_element_type=jnp.float32)
        i = jax.nn.sigmoid(gates[:, 0 * H:1 * H])
        f = jax.nn.sigmoid(gates[:, 1 * H:2 * H])
        g = jnp.tanh(gates[:, 2 * H:3 * H])
        o = jax.nn.sigmoid(gates[:, 3 * H:4 * H])
        c = f * c + i * g
        h = o * jnp.tanh(c)
        return (h, c), h

    init = (jnp.zeros((B, H), jnp.float32), jnp.zeros((B, H), jnp.float32))
    (h, _), out = lax.scan(step, init, gates_pre)
    return out, h


def forward_ref(ids, mask, packed):
    x = _bert_stand_in(ids, mask, packed)
    x = jnp.transpose(x, (1, 0, 2))                      # [S, B, 768]
    inp = x
    h_n = []
    for layer in range(2):
        w_ih_t, w_hh_t, bias = packed[f"l{layer}"]
        x_b = inp.astype(jnp.bfloat16)
        outs = []
        for d in range(2):
            gp = jnp.einsum("sbd,dg->sbg", x_b, w_ih_t[d],
                            preferred_element_type=jnp.float32) + bias[d]
            if d == 1:
                gp = jnp.flip(gp, axis=0)
            out, h = _recur_ref(gp, w_hh_t[d])
            if d == 1:
                out = jnp.flip(out, axis=0)
            outs.append(out)
            h_n.append(h)
        inp = jnp.concatenate(outs, axis=-1)
    h_top = jnp.concatenate([h_n[2], h_n[3]], axis=-1)
    return (jnp.dot(h_top.astype(jnp.bfloat16), packed["cls_w_t"],
                    preferred_element_type=jnp.float32) + packed["cls_b"])


# ----------------------------------------------------------------------------
# Parameter init (shapes implied by TorchLSTMIntent.__init__) + one-time pack.
# ----------------------------------------------------------------------------
def init_params(key, hidden_size, vocab_size, bert_vocab=100, max_seq=64):
    keys = iter(jax.random.split(key, 32))
    params = {}
    params["word_emb"] = 0.02 * jax.random.normal(
        next(keys), (bert_vocab, D_MODEL), jnp.float32)
    params["pos_emb"] = 0.02 * jax.random.normal(
        next(keys), (max_seq, D_MODEL), jnp.float32)

    s = 1.0 / jnp.sqrt(jnp.float32(hidden_size))
    for layer in range(2):
        din = D_MODEL if layer == 0 else 2 * hidden_size
        for d in ("fwd", "bwd"):
            w_ih = jax.random.uniform(next(keys), (4 * hidden_size, din),
                                      jnp.float32, -s, s)
            w_hh = jax.random.uniform(next(keys), (4 * hidden_size, hidden_size),
                                      jnp.float32, -s, s)
            b_ih = jax.random.uniform(next(keys), (4 * hidden_size,),
                                      jnp.float32, -s, s)
            b_hh = jax.random.uniform(next(keys), (4 * hidden_size,),
                                      jnp.float32, -s, s)
            params[f"l{layer}_{d}"] = (w_ih, w_hh, b_ih, b_hh)

    sc = 1.0 / jnp.sqrt(jnp.float32(2 * hidden_size))
    params["cls_w"] = jax.random.uniform(next(keys),
                                         (vocab_size, 2 * hidden_size),
                                         jnp.float32, -sc, sc)
    params["cls_b"] = jax.random.uniform(next(keys), (vocab_size,),
                                         jnp.float32, -sc, sc)
    return params


def pack_params(params):
    """One-time weight packing: transpose, stack directions, fold biases, bf16."""
    packed = {"word_emb": params["word_emb"], "pos_emb": params["pos_emb"]}
    for layer in range(2):
        w_ih_t, w_hh_t, bias = [], [], []
        for d in ("fwd", "bwd"):
            w_ih, w_hh, b_ih, b_hh = params[f"l{layer}_{d}"]
            w_ih_t.append(jnp.transpose(w_ih).astype(jnp.bfloat16))   # [Din,4H]
            w_hh_t.append(jnp.transpose(w_hh).astype(jnp.bfloat16))   # [H,4H]
            bias.append((b_ih + b_hh).reshape(1, -1))                 # [1,4H] f32
        packed[f"l{layer}"] = (jnp.stack(w_ih_t), jnp.stack(w_hh_t),
                               jnp.stack(bias))
    packed["cls_w_t"] = jnp.transpose(params["cls_w"]).astype(jnp.bfloat16)
    packed["cls_b"] = params["cls_b"].reshape(1, -1)
    return packed


if __name__ == "__main__":
    B, S = 2, 8
    hidden_size, vocab_size = 32, 16

    key = jax.random.PRNGKey(0)
    k_param, k_ids = jax.random.split(key)
    params = init_params(k_param, hidden_size, vocab_size)
    packed = pack_params(params)   # pre-packed once, outside the jitted forward

    ids = jax.random.randint(k_ids, (B, S), 0, 100, dtype=jnp.int32)
    mask = jnp.ones((B, S), dtype=jnp.int32).at[1, S - 2:].set(0)

    fwd = jax.jit(lambda i, m: torch_lstm_intent_forward(i, m, packed))
    logits = jax.block_until_ready(fwd(ids, mask))
    assert logits.shape == (B, vocab_size)

    ref = jax.block_until_ready(
        jax.jit(lambda i, m: forward_ref(i, m, packed))(ids, mask))
    assert jnp.all(jnp.isfinite(logits))
    assert jnp.allclose(logits, ref, atol=1e-2, rtol=1e-2), (
        f"max abs diff {jnp.max(jnp.abs(logits - ref))}")

    print("KERNEL_OK")
</pallas_src>

<mosaic_0001>
module attributes {stable_mosaic.version = 11 : i64} {
  func.func @_input_proj_kernel(%arg0: i32, %arg1: i32, %arg2: memref<8x8x768xbf16, #tpu.memory_space<vmem>>, %arg3: memref<1x768x128xbf16, #tpu.memory_space<vmem>>, %arg4: memref<1x1x128xf32, #tpu.memory_space<vmem>>, %arg5: memref<1x8x8x128xf32, #tpu.memory_space<vmem>>) attributes {dimension_semantics = [#tpu.dimension_semantics<parallel>, #tpu.dimension_semantics<parallel>], iteration_bounds = array<i64: 2, 1>, scalar_prefetch = 0 : i64, scratch_operands = 0 : i64, tpu.core_type = #tpu.core_type<tc>, window_params = [{transform_indices = @transform_0, window_bounds = array<i64: 8, 8, 768>}, {transform_indices = @transform_1, window_bounds = array<i64: 1, 768, 128>}, {transform_indices = @transform_2, window_bounds = array<i64: 1, 1, 128>}, {transform_indices = @transform_3, window_bounds = array<i64: 1, 8, 8, 128>}]} {
    %c0 = arith.constant 0 : index
    %c0_0 = arith.constant 0 : index
    %c0_1 = arith.constant 0 : index
    %0 = vector.load %arg2[%c0, %c0_0, %c0_1] : memref<8x8x768xbf16, #tpu.memory_space<vmem>>, vector<8x8x768xbf16>
    %1 = vector.shape_cast %0 : vector<8x8x768xbf16> to vector<64x768xbf16>
    %c0_2 = arith.constant 0 : index
    %c0_3 = arith.constant 0 : index
    %c0_4 = arith.constant 0 : index
    %2 = vector.load %arg3[%c0_2, %c0_3, %c0_4] : memref<1x768x128xbf16, #tpu.memory_space<vmem>>, vector<1x768x128xbf16>
    %3 = vector.shape_cast %2 : vector<1x768x128xbf16> to vector<768x128xbf16>
    %cst = arith.constant dense<0.000000e+00> : vector<64x128xf32>
    %4 = tpu.matmul %1, %3, %cst {dimension_numbers = #tpu.dot_dimension_numbers<[1], [0], [0], [1], [0, 0, 1, 1], [], []>} : vector<64x768xbf16>, vector<768x128xbf16>, vector<64x128xf32> -> vector<64x128xf32>
    %c0_5 = arith.constant 0 : index
    %c0_6 = arith.constant 0 : index
    %c0_7 = arith.constant 0 : index
    %5 = vector.load %arg4[%c0_5, %c0_6, %c0_7] : memref<1x1x128xf32, #tpu.memory_space<vmem>>, vector<1x1x128xf32>
    %6 = vector.shape_cast %5 : vector<1x1x128xf32> to vector<1x128xf32>
    %7 = vector.broadcast %6 : vector<1x128xf32> to vector<64x128xf32>
    %8 = arith.addf %4, %7 : vector<64x128xf32>
    %9 = vector.shape_cast %8 : vector<64x128xf32> to vector<8x8x128xf32>
    %c0_8 = arith.constant 0 : index
    %c0_9 = arith.constant 0 : index
    %c0_10 = arith.constant 0 : index
    %c0_11 = arith.constant 0 : index
    %10 = vector.load %arg5[%c0_8, %c0_9, %c0_10, %c0_11] : memref<1x8x8x128xf32, #tpu.memory_space<vmem>>, vector<1x8x8x128xf32>
    %11 = vector.shape_cast %10 : vector<1x8x8x128xf32> to vector<8x8x128xf32>
    %12 = vector.shape_cast %9 : vector<8x8x128xf32> to vector<1x8x8x128xf32>
    tpu.vector_store %arg5[%c0_8, %c0_9, %c0_10, %c0_11], %12 {strides = array<i32>} : memref<1x8x8x128xf32, #tpu.memory_space<vmem>>, vector<1x8x8x128xf32>,
    return
  }
  func.func @transform_0(%arg0: i32, %arg1: i32) -> (i32, i32, i32) {
    %c0_i32 = arith.constant 0 : i32
    %c0_i32_0 = arith.constant 0 : i32
    %c0_i32_1 = arith.constant 0 : i32
    return %arg1, %c0_i32, %c0_i32_0 : i32, i32, i32
  }
  func.func @transform_1(%arg0: i32, %arg1: i32) -> (i32, i32, i32) {
    %c0_i32 = arith.constant 0 : i32
    %c0_i32_0 = arith.constant 0 : i32
    %c0_i32_1 = arith.constant 0 : i32
    return %arg0, %c0_i32, %c0_i32_0 : i32, i32, i32
  }
  func.func @transform_2(%arg0: i32, %arg1: i32) -> (i32, i32, i32) {
    %c0_i32 = arith.constant 0 : i32
    %c0_i32_0 = arith.constant 0 : i32
    %c0_i32_1 = arith.constant 0 : i32
    return %arg0, %c0_i32, %c0_i32_0 : i32, i32, i32
  }
  func.func @transform_3(%arg0: i32, %arg1: i32) -> (i32, i32, i32, i32) {
    %c0_i32 = arith.constant 0 : i32
    %c0_i32_0 = arith.constant 0 : i32
    %c0_i32_1 = arith.constant 0 : i32
    return %arg0, %arg1, %c0_i32, %c0_i32_0 : i32, i32, i32, i32
  }
}

module attributes {stable_mosaic.version = 11 : i64} {
  func.func @_lstm_recurrence_kernel(%arg0: i32, %arg1: i32, %arg2: memref<1x8x8x128xf32, #tpu.memory_space<vmem>>, %arg3: memref<1x32x128xbf16, #tpu.memory_space<vmem>>, %arg4: memref<1x8x8x32xf32, #tpu.memory_space<vmem>>, %arg5: memref<1x8x32xf32, #tpu.memory_space<vmem>>, %arg6: memref<8x32xf32, #tpu.memory_space<vmem>>, %arg7: memref<8x32xf32, #tpu.memory_space<vmem>>) attributes {dimension_semantics = [#tpu.dimension_semantics<parallel>, #tpu.dimension_semantics<arbitrary>], iteration_bounds = array<i64: 2, 1>, scalar_prefetch = 0 : i64, scratch_operands = 2 : i64, tpu.core_type = #tpu.core_type<tc>, window_params = [{transform_indices = @transform_0, window_bounds = array<i64: 1, 8, 8, 128>}, {transform_indices = @transform_1, window_bounds = array<i64: 1, 32, 128>}, {transform_indices = @transform_2, window_bounds = array<i64: 1, 8, 8, 32>}, {transform_indices = @transform_3, window_bounds = array<i64: 1, 8, 32>}]} {
    %c0_i32 = arith.constant 0 : i32
    %0 = arith.cmpi eq, %arg1, %c0_i32 : i32
    %1 = arith.extui %0 : i1 to i32
    %c0_i32_0 = arith.constant 0 : i32
    %2 = arith.cmpi ne, %1, %c0_i32_0 : i32
    scf.if %2 {
      %cst_149 = arith.constant 0.000000e+00 : f32
      %272 = vector.broadcast %cst_149 : f32 to vector<8x32xf32>
      %c0_150 = arith.constant 0 : index
      %c0_151 = arith.constant 0 : index
      %273 = vector.load %arg6[%c0_150, %c0_151] : memref<8x32xf32, #tpu.memory_space<vmem>>, vector<8x32xf32>
      tpu.vector_store %arg6[%c0_150, %c0_151], %272 {strides = array<i32>} : memref<8x32xf32, #tpu.memory_space<vmem>>, vector<8x32xf32>,
      %cst_152 = arith.constant 0.000000e+00 : f32
      %274 = vector.broadcast %cst_152 : f32 to vector<8x32xf32>
      %c0_153 = arith.constant 0 : index
      %c0_154 = arith.constant 0 : index
      %275 = vector.load %arg7[%c0_153, %c0_154] : memref<8x32xf32, #tpu.memory_space<vmem>>, vector<8x32xf32>
      tpu.vector_store %arg7[%c0_153, %c0_154], %274 {strides = array<i32>} : memref<8x32xf32, #tpu.memory_space<vmem>>, vector<8x32xf32>,
    } else {
    }
    %c0 = arith.constant 0 : index
    %c0_1 = arith.constant 0 : index
    %c0_2 = arith.constant 0 : index
    %3 = vector.load %arg3[%c0, %c0_1, %c0_2] : memref<1x32x128xbf16, #tpu.memory_space<vmem>>, vector<1x32x128xbf16>
    %4 = vector.shape_cast %3 : vector<1x32x128xbf16> to vector<32x128xbf16>
    %c0_i32_3 = arith.constant 0 : i32
    %c2_i32 = arith.constant 2 : i32
    %5 = arith.muli %c2_i32, %c0_i32_3 : i32
    %c7_i32 = arith.constant 7 : i32
    %6 = arith.subi %c7_i32, %5 : i32
    %7 = arith.muli %arg0, %6 : i32
    %8 = arith.addi %c0_i32_3, %7 : i32
    %c0_4 = arith.constant 0 : index
    %9 = arith.index_cast %8 : i32 to index
    %c0_5 = arith.constant 0 : index
    %c0_6 = arith.constant 0 : index
    %10 = vector.load %arg2[%c0_4, %9, %c0_5, %c0_6] : memref<1x8x8x128xf32, #tpu.memory_space<vmem>>, vector<1x1x8x128xf32>
    %11 = vector.shape_cast %10 : vector<1x1x8x128xf32> to vector<8x128xf32>
    %c0_7 = arith.constant 0 : index
    %c0_8 = arith.constant 0 : index
    %12 = vector.load %arg6[%c0_7, %c0_8] : memref<8x32xf32, #tpu.memory_space<vmem>>, vector<8x32xf32>
    %13 = arith.truncf %12 : vector<8x32xf32> to vector<8x32xbf16>
    %cst = arith.constant dense<0.000000e+00> : vector<8x128xf32>
    %14 = tpu.matmul %13, %4, %cst {dimension_numbers = #tpu.dot_dimension_numbers<[1], [0], [0], [1], [0, 0, 1, 1], [], []>} : vector<8x32xbf16>, vector<32x128xbf16>, vector<8x128xf32> -> vector<8x128xf32>
    %15 = arith.addf %11, %14 : vector<8x128xf32>
    %16 = arith.negf %15 : vector<8x128xf32>
    %17 = math.exp %16 : vector<8x128xf32>
    %cst_9 = arith.constant 1.000000e+00 : f32
    %18 = vector.broadcast %cst_9 : f32 to vector<8x128xf32>
    %19 = arith.addf %18, %17 : vector<8x128xf32>
    %20 = arith.divf %18, %19 : vector<8x128xf32>
    %21 = math.tanh %15 : vector<8x128xf32>
    %22 = vector.extract_strided_slice %20 {offsets = [0, 0], sizes = [8, 32], strides = [1, 1]} : vector<8x128xf32> to vector<8x32xf32>
    %23 = vector.extract_strided_slice %20 {offsets = [0, 32], sizes = [8, 32], strides = [1, 1]} : vector<8x128xf32> to vector<8x32xf32>
    %24 = vector.extract_strided_slice %21 {offsets = [0, 64], sizes = [8, 32], strides = [1, 1]} : vector<8x128xf32> to vector<8x32xf32>
    %25 = vector.extract_strided_slice %20 {offsets = [0, 96], sizes = [8, 32], strides = [1, 1]} : vector<8x128xf32> to vector<8x32xf32>
    %c0_10 = arith.constant 0 : index
    %c0_11 = arith.constant 0 : index
    %26 = vector.load %arg7[%c0_10, %c0_11] : memref<8x32xf32, #tpu.memory_space<vmem>>, vector<8x32xf32>
    %27 = arith.mulf %23, %26 : vector<8x32xf32>
    %28 = arith.mulf %22, %24 : vector<8x32xf32>
    %29 = arith.addf %27, %28 : vector<8x32xf32>
    %30 = math.tanh %29 : vector<8x32xf32>
    %31 = arith.mulf %25, %30 : vector<8x32xf32>
    %c0_12 = arith.constant 0 : index
    %c0_13 = arith.constant 0 : index
    %32 = vector.load %arg7[%c0_12, %c0_13] : memref<8x32xf32, #tpu.memory_space<vmem>>, vector<8x32xf32>
    tpu.vector_store %arg7[%c0_12, %c0_13], %29 {strides = array<i32>} : memref<8x32xf32, #tpu.memory_space<vmem>>, vector<8x32xf32>,
    %c0_14 = arith.constant 0 : index
    %c0_15 = arith.constant 0 : index
    %33 = vector.load %arg6[%c0_14, %c0_15] : memref<8x32xf32, #tpu.memory_space<vmem>>, vector<8x32xf32>
    tpu.vector_store %arg6[%c0_14, %c0_15], %31 {strides = array<i32>} : memref<8x32xf32, #tpu.memory_space<vmem>>, vector<8x32xf32>,
    %c0_16 = arith.constant 0 : index
    %34 = arith.index_cast %8 : i32 to index
    %c0_17 = arith.constant 0 : index
    %c0_18 = arith.constant 0 : index
    %35 = vector.load %arg4[%c0_16, %34, %c0_17, %c0_18] : memref<1x8x8x32xf32, #tpu.memory_space<vmem>>, vector<1x1x8x32xf32>
    %36 = vector.shape_cast %35 : vector<1x1x8x32xf32> to vector<8x32xf32>
    %37 = vector.shape_cast %31 : vector<8x32xf32> to vector<1x1x8x32xf32>
    tpu.vector_store %arg4[%c0_16, %34, %c0_17, %c0_18], %37 {strides = array<i32>} : memref<1x8x8x32xf32, #tpu.memory_space<vmem>>, vector<1x1x8x32xf32>,
    %c1_i32 = arith.constant 1 : i32
    %c2_i32_19 = arith.constant 2 : i32
    %38 = arith.muli %c2_i32_19, %c1_i32 : i32
    %c7_i32_20 = arith.constant 7 : i32
    %39 = arith.subi %c7_i32_20, %38 : i32
    %40 = arith.muli %arg0, %39 : i32
    %41 = arith.addi %c1_i32, %40 : i32
    %c0_21 = arith.constant 0 : index
    %42 = arith.index_cast %41 : i32 to index
    %c0_22 = arith.constant 0 : index
    %c0_23 = arith.constant 0 : index
    %43 = vector.load %arg2[%c0_21, %42, %c0_22, %c0_23] : memref<1x8x8x128xf32, #tpu.memory_space<vmem>>, vector<1x1x8x128xf32>
    %44 = vector.shape_cast %43 : vector<1x1x8x128xf32> to vector<8x128xf32>
    %c0_24 = arith.constant 0 : index
    %c0_25 = arith.constant 0 : index
    %45 = vector.load %arg6[%c0_24, %c0_25] : memref<8x32xf32, #tpu.memory_space<vmem>>, vector<8x32xf32>
    %46 = arith.truncf %45 : vector<8x32xf32> to vector<8x32xbf16>
    %cst_26 = arith.constant dense<0.000000e+00> : vector<8x128xf32>
    %47 = tpu.matmul %46, %4, %cst_26 {dimension_numbers = #tpu.dot_dimension_numbers<[1], [0], [0], [1], [0, 0, 1, 1], [], []>} : vector<8x32xbf16>, vector<32x128xbf16>, vector<8x128xf32> -> vector<8x128xf32>
    %48 = arith.addf %44, %47 : vector<8x128xf32>
    %49 = arith.negf %48 : vector<8x128xf32>
    %50 = math.exp %49 : vector<8x128xf32>
    %cst_27 = arith.constant 1.000000e+00 : f32
    %51 = vector.broadcast %cst_27 : f32 to vector<8x128xf32>
    %52 = arith.addf %51, %50 : vector<8x128xf32>
    %53 = arith.divf %51, %52 : vector<8x128xf32>
    %54 = math.tanh %48 : vector<8x128xf32>
    %55 = vector.extract_strided_slice %53 {offsets = [0, 0], sizes = [8, 32], strides = [1, 1]} : vector<8x128xf32> to vector<8x32xf32>
    %56 = vector.extract_strided_slice %53 {offsets = [0, 32], sizes = [8, 32], strides = [1, 1]} : vector<8x128xf32> to vector<8x32xf32>
    %57 = vector.extract_strided_slice %54 {offsets = [0, 64], sizes = [8, 32], strides = [1, 1]} : vector<8x128xf32> to vector<8x32xf32>
    %58 = vector.extract_strided_slice %53 {offsets = [0, 96], sizes = [8, 32], strides = [1, 1]} : vector<8x128xf32> to vector<8x32xf32>
    %c0_28 = arith.constant 0 : index
    %c0_29 = arith.constant 0 : index
    %59 = vector.load %arg7[%c0_28, %c0_29] : memref<8x32xf32, #tpu.memory_space<vmem>>, vector<8x32xf32>
    %60 = arith.mulf %56, %59 : vector<8x32xf32>
    %61 = arith.mulf %55, %57 : vector<8x32xf32>
    %62 = arith.addf %60, %61 : vector<8x32xf32>
    %63 = math.tanh %62 : vector<8x32xf32>
    %64 = arith.mulf %58, %63 : vector<8x32xf32>
    %c0_30 = arith.constant 0 : index
    %c0_31 = arith.constant 0 : index
    %65 = vector.load %arg7[%c0_30, %c0_31] : memref<8x32xf32, #tpu.memory_space<vmem>>, vector<8x32xf32>
    tpu.vector_store %arg7[%c0_30, %c0_31], %62 {strides = array<i32>} : memref<8x32xf32, #tpu.memory_space<vmem>>, vector<8x32xf32>,
    %c0_32 = arith.constant 0 : index
    %c0_33 = arith.constant 0 : index
    %66 = vector.load %arg6[%c0_32, %c0_33] : memref<8x32xf32, #tpu.memory_space<vmem>>, vector<8x32xf32>
    tpu.vector_store %arg6[%c0_32, %c0_33], %64 {strides = array<i32>} : memref<8x32xf32, #tpu.memory_space<vmem>>, vector<8x32xf32>,
    %c0_34 = arith.constant 0 : index
    %67 = arith.index_cast %41 : i32 to index
    %c0_35 = arith.constant 0 : index
    %c0_36 = arith.constant 0 : index
    %68 = vector.load %arg4[%c0_34, %67, %c0_35, %c0_36] : memref<1x8x8x32xf32, #tpu.memory_space<vmem>>, vector<1x1x8x32xf32>
    %69 = vector.shape_cast %68 : vector<1x1x8x32xf32> to vector<8x32xf32>
    %70 = vector.shape_cast %64 : vector<8x32xf32> to vector<1x1x8x32xf32>
    tpu.vector_store %arg4[%c0_34, %67, %c0_35, %c0_36], %70 {strides = array<i32>} : memref<1x8x8x32xf32, #tpu.memory_space<vmem>>, vector<1x1x8x32xf32>,
    %c2_i32_37 = arith.constant 2 : i32
    %c2_i32_38 = arith.constant 2 : i32
    %71 = arith.muli %c2_i32_38, %c2_i32_37 : i32
    %c7_i32_39 = arith.constant 7 : i32
    %72 = arith.subi %c7_i32_39, %71 : i32
    %73 = arith.muli %arg0, %72 : i32
    %74 = arith.addi %c2_i32_37, %73 : i32
    %c0_40 = arith.constant 0 : index
    %75 = arith.index_cast %74 : i32 to index
    %c0_41 = arith.constant 0 : index
    %c0_42 = arith.constant 0 : index
    %76 = vector.load %arg2[%c0_40, %75, %c0_41, %c0_42] : memref<1x8x8x128xf32, #tpu.memory_space<vmem>>, vector<1x1x8x128xf32>
    %77 = vector.shape_cast %76 : vector<1x1x8x128xf32> to vector<8x128xf32>
    %c0_43 = arith.constant 0 : index
    %c0_44 = arith.constant 0 : index
    %78 = vector.load %arg6[%c0_43, %c0_44] : memref<8x32xf32, #tpu.memory_space<vmem>>, vector<8x32xf32>
    %79 = arith.truncf %78 : vector<8x32xf32> to vector<8x32xbf16>
    %cst_45 = arith.constant dense<0.000000e+00> : vector<8x128xf32>
    %80 = tpu.matmul %79, %4, %cst_45 {dimension_numbers = #tpu.dot_dimension_numbers<[1], [0], [0], [1], [0, 0, 1, 1], [], []>} : vector<8x32xbf16>, vector<32x128xbf16>, vector<8x128xf32> -> vector<8x128xf32>
    %81 = arith.addf %77, %80 : vector<8x128xf32>
    %82 = arith.negf %81 : vector<8x128xf32>
    %83 = math.exp %82 : vector<8x128xf32>
    %cst_46 = arith.constant 1.000000e+00 : f32
    %84 = vector.broadcast %cst_46 : f32 to vector<8x128xf32>
    %85 = arith.addf %84, %83 : vector<8x128xf32>
    %86 = arith.divf %84, %85 : vector<8x128xf32>
    %87 = math.tanh %81 : vector<8x128xf32>
    %88 = vector.extract_strided_slice %86 {offsets = [0, 0], sizes = [8, 32], strides = [1, 1]} : vector<8x128xf32> to vector<8x32xf32>
    %89 = vector.extract_strided_slice %86 {offsets = [0, 32], sizes = [8, 32], strides = [1, 1]} : vector<8x128xf32> to vector<8x32xf32>
    %90 = vector.extract_strided_slice %87 {offsets = [0, 64], sizes = [8, 32], strides = [1, 1]} : vector<8x128xf32> to vector<8x32xf32>
    %91 = vector.extract_strided_slice %86 {offsets = [0, 96], sizes = [8, 32], strides = [1, 1]} : vector<8x128xf32> to vector<8x32xf32>
    %c0_47 = arith.constant 0 : index
    %c0_48 = arith.constant 0 : index
    %92 = vector.load %arg7[%c0_47, %c0_48] : memref<8x32xf32, #tpu.memory_space<vmem>>, vector<8x32xf32>
    %93 = arith.mulf %89, %92 : vector<8x32xf32>
    %94 = arith.mulf %88, %90 : vector<8x32xf32>
    %95 = arith.addf %93, %94 : vector<8x32xf32>
    %96 = math.tanh %95 : vector<8x32xf32>
    %97 = arith.mulf %91, %96 : vector<8x32xf32>
    %c0_49 = arith.constant 0 : index
    %c0_50 = arith.constant 0 : index
    %98 = vector.load %arg7[%c0_49, %c0_50] : memref<8x32xf32, #tpu.memory_space<vmem>>, vector<8x32xf32>
    tpu.vector_store %arg7[%c0_49, %c0_50], %95 {strides = array<i32>} : memref<8x32xf32, #tpu.memory_space<vmem>>, vector<8x32xf32>,
    %c0_51 = arith.constant 0 : index
    %c0_52 = arith.constant 0 : index
    %99 = vector.load %arg6[%c0_51, %c0_52] : memref<8x32xf32, #tpu.memory_space<vmem>>, vector<8x32xf32>
    tpu.vector_store %arg6[%c0_51, %c0_52], %97 {strides = array<i32>} : memref<8x32xf32, #tpu.memory_space<vmem>>, vector<8x32xf32>,
    %c0_53 = arith.constant 0 : index
    %100 = arith.index_cast %74 : i32 to index
    %c0_54 = arith.constant 0 : index
    %c0_55 = arith.constant 0 : index
    %101 = vector.load %arg4[%c0_53, %100, %c0_54, %c0_55] : memref<1x8x8x32xf32, #tpu.memory_space<vmem>>, vector<1x1x8x32xf32>
    %102 = vector.shape_cast %101 : vector<1x1x8x32xf32> to vector<8x32xf32>
    %103 = vector.shape_cast %97 : vector<8x32xf32> to vector<1x1x8x32xf32>
    tpu.vector_store %arg4[%c0_53, %100, %c0_54, %c0_55], %103 {strides = array<i32>} : memref<1x8x8x32xf32, #tpu.memory_space<vmem>>, vector<1x1x8x32xf32>,
    %c3_i32 = arith.constant 3 : i32
    %c2_i32_56 = arith.constant 2 : i32
    %104 = arith.muli %c2_i32_56, %c3_i32 : i32
    %c7_i32_57 = arith.constant 7 : i32
    %105 = arith.subi %c7_i32_57, %104 : i32
    %106 = arith.muli %arg0, %105 : i32
    %107 = arith.addi %c3_i32, %106 : i32
    %c0_58 = arith.constant 0 : index
    %108 = arith.index_cast %107 : i32 to index
    %c0_59 = arith.constant 0 : index
    %c0_60 = arith.constant 0 : index
    %109 = vector.load %arg2[%c0_58, %108, %c0_59, %c0_60] : memref<1x8x8x128xf32, #tpu.memory_space<vmem>>, vector<1x1x8x128xf32>
    %110 = vector.shape_cast %109 : vector<1x1x8x128xf32> to vector<8x128xf32>
    %c0_61 = arith.constant 0 : index
    %c0_62 = arith.constant 0 : index
    %111 = vector.load %arg6[%c0_61, %c0_62] : memref<8x32xf32, #tpu.memory_space<vmem>>, vector<8x32xf32>
    %112 = arith.truncf %111 : vector<8x32xf32> to vector<8x32xbf16>
    %cst_63 = arith.constant dense<0.000000e+00> : vector<8x128xf32>
    %113 = tpu.matmul %112, %4, %cst_63 {dimension_numbers = #tpu.dot_dimension_numbers<[1], [0], [0], [1], [0, 0, 1, 1], [], []>} : vector<8x32xbf16>, vector<32x128xbf16>, vector<8x128xf32> -> vector<8x128xf32>
    %114 = arith.addf %110, %113 : vector<8x128xf32>
    %115 = arith.negf %114 : vector<8x128xf32>
    %116 = math.exp %115 : vector<8x128xf32>
    %cst_64 = arith.constant 1.000000e+00 : f32
    %117 = vector.broadcast %cst_64 : f32 to vector<8x128xf32>
    %118 = arith.addf %117, %116 : vector<8x128xf32>
    %119 = arith.divf %117, %118 : vector<8x128xf32>
    %120 = math.tanh %114 : vector<8x128xf32>
    %121 = vector.extract_strided_slice %119 {offsets = [0, 0], sizes = [8, 32], strides = [1, 1]} : vector<8x128xf32> to vector<8x32xf32>
    %122 = vector.extract_strided_slice %119 {offsets = [0, 32], sizes = [8, 32], strides = [1, 1]} : vector<8x128xf32> to vector<8x32xf32>
    %123 = vector.extract_strided_slice %120 {offsets = [0, 64], sizes = [8, 32], strides = [1, 1]} : vector<8x128xf32> to vector<8x32xf32>
    %124 = vector.extract_strided_slice %119 {offsets = [0, 96], sizes = [8, 32], strides = [1, 1]} : vector<8x128xf32> to vector<8x32xf32>
    %c0_65 = arith.constant 0 : index
    %c0_66 = arith.constant 0 : index
    %125 = vector.load %arg7[%c0_65, %c0_66] : memref<8x32xf32, #tpu.memory_space<vmem>>, vector<8x32xf32>
    %126 = arith.mulf %122, %125 : vector<8x32xf32>
    %127 = arith.mulf %121, %123 : vector<8x32xf32>
    %128 = arith.addf %126, %127 : vector<8x32xf32>
    %129 = math.tanh %128 : vector<8x32xf32>
    %130 = arith.mulf %124, %129 : vector<8x32xf32>
    %c0_67 = arith.constant 0 : index
    %c0_68 = arith.constant 0 : index
    %131 = vector.load %arg7[%c0_67, %c0_68] : memref<8x32xf32, #tpu.memory_space<vmem>>, vector<8x32xf32>
    tpu.vector_store %arg7[%c0_67, %c0_68], %128 {strides = array<i32>} : memref<8x32xf32, #tpu.memory_space<vmem>>, vector<8x32xf32>,
    %c0_69 = arith.constant 0 : index
    %c0_70 = arith.constant 0 : index
    %132 = vector.load %arg6[%c0_69, %c0_70] : memref<8x32xf32, #tpu.memory_space<vmem>>, vector<8x32xf32>
    tpu.vector_store %arg6[%c0_69, %c0_70], %130 {strides = array<i32>} : memref<8x32xf32, #tpu.memory_space<vmem>>, vector<8x32xf32>,
    %c0_71 = arith.constant 0 : index
    %133 = arith.index_cast %107 : i32 to index
    %c0_72 = arith.constant 0 : index
    %c0_73 = arith.constant 0 : index
    %134 = vector.load %arg4[%c0_71, %133, %c0_72, %c0_73] : memref<1x8x8x32xf32, #tpu.memory_space<vmem>>, vector<1x1x8x32xf32>
    %135 = vector.shape_cast %134 : vector<1x1x8x32xf32> to vector<8x32xf32>
    %136 = vector.shape_cast %130 : vector<8x32xf32> to vector<1x1x8x32xf32>
    tpu.vector_store %arg4[%c0_71, %133, %c0_72, %c0_73], %136 {strides = array<i32>} : memref<1x8x8x32xf32, #tpu.memory_space<vmem>>, vector<1x1x8x32xf32>,
    %c4_i32 = arith.constant 4 : i32
    %c2_i32_74 = arith.constant 2 : i32
    %137 = arith.muli %c2_i32_74, %c4_i32 : i32
    %c7_i32_75 = arith.constant 7 : i32
    %138 = arith.subi %c7_i32_75, %137 : i32
    %139 = arith.muli %arg0, %138 : i32
    %140 = arith.addi %c4_i32, %139 : i32
    %c0_76 = arith.constant 0 : index
    %141 = arith.index_cast %140 : i32 to index
    %c0_77 = arith.constant 0 : index
    %c0_78 = arith.constant 0 : index
    %142 = vector.load %arg2[%c0_76, %141, %c0_77, %c0_78] : memref<1x8x8x128xf32, #tpu.memory_space<vmem>>, vector<1x1x8x128xf32>
    %143 = vector.shape_cast %142 : vector<1x1x8x128xf32> to vector<8x128xf32>
    %c0_79 = arith.constant 0 : index
    %c0_80 = arith.constant 0 : index
    %144 = vector.load %arg6[%c0_79, %c0_80] : memref<8x32xf32, #tpu.memory_space<vmem>>, vector<8x32xf32>
    %145 = arith.truncf %144 : vector<8x32xf32> to vector<8x32xbf16>
    %cst_81 = arith.constant dense<0.000000e+00> : vector<8x128xf32>
    %146 = tpu.matmul %145, %4, %cst_81 {dimension_numbers = #tpu.dot_dimension_numbers<[1], [0], [0], [1], [0, 0, 1, 1], [], []>} : vector<8x32xbf16>, vector<32x128xbf16>, vector<8x128xf32> -> vector<8x128xf32>
    %147 = arith.addf %143, %146 : vector<8x128xf32>
    %148 = arith.negf %147 : vector<8x128xf32>
    %149 = math.exp %148 : vector<8x128xf32>
    %cst_82 = arith.constant 1.000000e+00 : f32
    %150 = vector.broadcast %cst_82 : f32 to vector<8x128xf32>
    %151 = arith.addf %150, %149 : vector<8x128xf32>
    %152 = arith.divf %150, %151 : vector<8x128xf32>
    %153 = math.tanh %147 : vector<8x128xf32>
    %154 = vector.extract_strided_slice %152 {offsets = [0, 0], sizes = [8, 32], strides = [1, 1]} : vector<8x128xf32> to vector<8x32xf32>
    %155 = vector.extract_strided_slice %152 {offsets = [0, 32], sizes = [8, 32], strides = [1, 1]} : vector<8x128xf32> to vector<8x32xf32>
    %156 = vector.extract_strided_slice %153 {offsets = [0, 64], sizes = [8, 32], strides = [1, 1]} : vector<8x128xf32> to vector<8x32xf32>
    %157 = vector.extract_strided_slice %152 {offsets = [0, 96], sizes = [8, 32], strides = [1, 1]} : vector<8x128xf32> to vector<8x32xf32>
    %c0_83 = arith.constant 0 : index
    %c0_84 = arith.constant 0 : index
    %158 = vector.load %arg7[%c0_83, %c0_84] : memref<8x32xf32, #tpu.memory_space<vmem>>, vector<8x32xf32>
    %159 = arith.mulf %155, %158 : vector<8x32xf32>
    %160 = arith.mulf %154, %156 : vector<8x32xf32>
    %161 = arith.addf %159, %160 : vector<8x32xf32>
    %162 = math.tanh %161 : vector<8x32xf32>
    %163 = arith.mulf %157, %162 : vector<8x32xf32>
    %c0_85 = arith.constant 0 : index
    %c0_86 = arith.constant 0 : index
    %164 = vector.load %arg7[%c0_85, %c0_86] : memref<8x32xf32, #tpu.memory_space<vmem>>, vector<8x32xf32>
    tpu.vector_store %arg7[%c0_85, %c0_86], %161 {strides = array<i32>} : memref<8x32xf32, #tpu.memory_space<vmem>>, vector<8x32xf32>,
    %c0_87 = arith.constant 0 : index
    %c0_88 = arith.constant 0 : index
    %165 = vector.load %arg6[%c0_87, %c0_88] : memref<8x32xf32, #tpu.memory_space<vmem>>, vector<8x32xf32>
    tpu.vector_store %arg6[%c0_87, %c0_88], %163 {strides = array<i32>} : memref<8x32xf32, #tpu.memory_space<vmem>>, vector<8x32xf32>,
    %c0_89 = arith.constant 0 : index
    %166 = arith.index_cast %140 : i32 to index
    %c0_90 = arith.constant 0 : index
    %c0_91 = arith.constant 0 : index
    %167 = vector.load %arg4[%c0_89, %166, %c0_90, %c0_91] : memref<1x8x8x32xf32, #tpu.memory_space<vmem>>, vector<1x1x8x32xf32>
    %168 = vector.shape_cast %167 : vector<1x1x8x32xf32> to vector<8x32xf32>
    %169 = vector.shape_cast %163 : vector<8x32xf32> to vector<1x1x8x32xf32>
    tpu.vector_store %arg4[%c0_89, %166, %c0_90, %c0_91], %169 {strides = array<i32>} : memref<1x8x8x32xf32, #tpu.memory_space<vmem>>, vector<1x1x8x32xf32>,
    %c5_i32 = arith.constant 5 : i32
    %c2_i32_92 = arith.constant 2 : i32
    %170 = arith.muli %c2_i32_92, %c5_i32 : i32
    %c7_i32_93 = arith.constant 7 : i32
    %171 = arith.subi %c7_i32_93, %170 : i32
    %172 = arith.muli %arg0, %171 : i32
    %173 = arith.addi %c5_i32, %172 : i32
    %c0_94 = arith.constant 0 : index
    %174 = arith.index_cast %173 : i32 to index
    %c0_95 = arith.constant 0 : index
    %c0_96 = arith.constant 0 : index
    %175 = vector.load %arg2[%c0_94, %174, %c0_95, %c0_96] : memref<1x8x8x128xf32, #tpu.memory_space<vmem>>, vector<1x1x8x128xf32>
    %176 = vector.shape_cast %175 : vector<1x1x8x128xf32> to vector<8x128xf32>
    %c0_97 = arith.constant 0 : index
    %c0_98 = arith.constant 0 : index
    %177 = vector.load %arg6[%c0_97, %c0_98] : memref<8x32xf32, #tpu.memory_space<vmem>>, vector<8x32xf32>
    %178 = arith.truncf %177 : vector<8x32xf32> to vector<8x32xbf16>
    %cst_99 = arith.constant dense<0.000000e+00> : vector<8x128xf32>
    %179 = tpu.matmul %178, %4, %cst_99 {dimension_numbers = #tpu.dot_dimension_numbers<[1], [0], [0], [1], [0, 0, 1, 1], [], []>} : vector<8x32xbf16>, vector<32x128xbf16>, vector<8x128xf32> -> vector<8x128xf32>
    %180 = arith.addf %176, %179 : vector<8x128xf32>
    %181 = arith.negf %180 : vector<8x128xf32>
    %182 = math.exp %181 : vector<8x128xf32>
    %cst_100 = arith.constant 1.000000e+00 : f32
    %183 = vector.broadcast %cst_100 : f32 to vector<8x128xf32>
    %184 = arith.addf %183, %182 : vector<8x128xf32>
    %185 = arith.divf %183, %184 : vector<8x128xf32>
    %186 = math.tanh %180 : vector<8x128xf32>
    %187 = vector.extract_strided_slice %185 {offsets = [0, 0], sizes = [8, 32], strides = [1, 1]} : vector<8x128xf32> to vector<8x32xf32>
    %188 = vector.extract_strided_slice %185 {offsets = [0, 32], sizes = [8, 32], strides = [1, 1]} : vector<8x128xf32> to vector<8x32xf32>
    %189 = vector.extract_strided_slice %186 {offsets = [0, 64], sizes = [8, 32], strides = [1, 1]} : vector<8x128xf32> to vector<8x32xf32>
    %190 = vector.extract_strided_slice %185 {offsets = [0, 96], sizes = [8, 32], strides = [1, 1]} : vector<8x128xf32> to vector<8x32xf32>
    %c0_101 = arith.constant 0 : index
    %c0_102 = arith.constant 0 : index
    %191 = vector.load %arg7[%c0_101, %c0_102] : memref<8x32xf32, #tpu.memory_space<vmem>>, vector<8x32xf32>
    %192 = arith.mulf %188, %191 : vector<8x32xf32>
    %193 = arith.mulf %187, %189 : vector<8x32xf32>
    %194 = arith.addf %192, %193 : vector<8x32xf32>
    %195 = math.tanh %194 : vector<8x32xf32>
    %196 = arith.mulf %190, %195 : vector<8x32xf32>
    %c0_103 = arith.constant 0 : index
    %c0_104 = arith.constant 0 : index
    %197 = vector.load %arg7[%c0_103, %c0_104] : memref<8x32xf32, #tpu.memory_space<vmem>>, vector<8x32xf32>
    tpu.vector_store %arg7[%c0_103, %c0_104], %194 {strides = array<i32>} : memref<8x32xf32, #tpu.memory_space<vmem>>, vector<8x32xf32>,
    %c0_105 = arith.constant 0 : index
    %c0_106 = arith.constant 0 : index
    %198 = vector.load %arg6[%c0_105, %c0_106] : memref<8x32xf32, #tpu.memory_space<vmem>>, vector<8x32xf32>
    tpu.vector_store %arg6[%c0_105, %c0_106], %196 {strides = array<i32>} : memref<8x32xf32, #tpu.memory_space<vmem>>, vector<8x32xf32>,
    %c0_107 = arith.constant 0 : index
    %199 = arith.index_cast %173 : i32 to index
    %c0_108 = arith.constant 0 : index
    %c0_109 = arith.constant 0 : index
    %200 = vector.load %arg4[%c0_107, %199, %c0_108, %c0_109] : memref<1x8x8x32xf32, #tpu.memory_space<vmem>>, vector<1x1x8x32xf32>
    %201 = vector.shape_cast %200 : vector<1x1x8x32xf32> to vector<8x32xf32>
    %202 = vector.shape_cast %196 : vector<8x32xf32> to vector<1x1x8x32xf32>
    tpu.vector_store %arg4[%c0_107, %199, %c0_108, %c0_109], %202 {strides = array<i32>} : memref<1x8x8x32xf32, #tpu.memory_space<vmem>>, vector<1x1x8x32xf32>,
    %c6_i32 = arith.constant 6 : i32
    %c2_i32_110 = arith.constant 2 : i32
    %203 = arith.muli %c2_i32_110, %c6_i32 : i32
    %c7_i32_111 = arith.constant 7 : i32
    %204 = arith.subi %c7_i32_111, %203 : i32
    %205 = arith.muli %arg0, %204 : i32
    %206 = arith.addi %c6_i32, %205 : i32
    %c0_112 = arith.constant 0 : index
    %207 = arith.index_cast %206 : i32 to index
    %c0_113 = arith.constant 0 : index
    %c0_114 = arith.constant 0 : index
    %208 = vector.load %arg2[%c0_112, %207, %c0_113, %c0_114] : memref<1x8x8x128xf32, #tpu.memory_space<vmem>>, vector<1x1x8x128xf32>
    %209 = vector.shape_cast %208 : vector<1x1x8x128xf32> to vector<8x128xf32>
    %c0_115 = arith.constant 0 : index
    %c0_116 = arith.constant 0 : index
    %210 = vector.load %arg6[%c0_115, %c0_116] : memref<8x32xf32, #tpu.memory_space<vmem>>, vector<8x32xf32>
    %211 = arith.truncf %210 : vector<8x32xf32> to vector<8x32xbf16>
    %cst_117 = arith.constant dense<0.000000e+00> : vector<8x128xf32>
    %212 = tpu.matmul %211, %4, %cst_117 {dimension_numbers = #tpu.dot_dimension_numbers<[1], [0], [0], [1], [0, 0, 1, 1], [], []>} : vector<8x32xbf16>, vector<32x128xbf16>, vector<8x128xf32> -> vector<8x128xf32>
    %213 = arith.addf %209, %212 : vector<8x128xf32>
    %214 = arith.negf %213 : vector<8x128xf32>
    %215 = math.exp %214 : vector<8x128xf32>
    %cst_118 = arith.constant 1.000000e+00 : f32
    %216 = vector.broadcast %cst_118 : f32 to vector<8x128xf32>
    %217 = arith.addf %216, %215 : vector<8x128xf32>
    %218 = arith.divf %216, %217 : vector<8x128xf32>
    %219 = math.tanh %213 : vector<8x128xf32>
    %220 = vector.extract_strided_slice %218 {offsets = [0, 0], sizes = [8, 32], strides = [1, 1]} : vector<8x128xf32> to vector<8x32xf32>
    %221 = vector.extract_strided_slice %218 {offsets = [0, 32], sizes = [8, 32], strides = [1, 1]} : vector<8x128xf32> to vector<8x32xf32>
    %222 = vector.extract_strided_slice %219 {offsets = [0, 64], sizes = [8, 32], strides = [1, 1]} : vector<8x128xf32> to vector<8x32xf32>
    %223 = vector.extract_strided_slice %218 {offsets = [0, 96], sizes = [8, 32], strides = [1, 1]} : vector<8x128xf32> to vector<8x32xf32>
    %c0_119 = arith.constant 0 : index
    %c0_120 = arith.constant 0 : index
    %224 = vector.load %arg7[%c0_119, %c0_120] : memref<8x32xf32, #tpu.memory_space<vmem>>, vector<8x32xf32>
    %225 = arith.mulf %221, %224 : vector<8x32xf32>
    %226 = arith.mulf %220, %222 : vector<8x32xf32>
    %227 = arith.addf %225, %226 : vector<8x32xf32>
    %228 = math.tanh %227 : vector<8x32xf32>
    %229 = arith.mulf %223, %228 : vector<8x32xf32>
    %c0_121 = arith.constant 0 : index
    %c0_122 = arith.constant 0 : index
    %230 = vector.load %arg7[%c0_121, %c0_122] : memref<8x32xf32, #tpu.memory_space<vmem>>, vector<8x32xf32>
    tpu.vector_store %arg7[%c0_121, %c0_122], %227 {strides = array<i32>} : memref<8x32xf32, #tpu.memory_space<vmem>>, vector<8x32xf32>,
    %c0_123 = arith.constant 0 : index
    %c0_124 = arith.constant 0 : index
    %231 = vector.load %arg6[%c0_123, %c0_124] : memref<8x32xf32, #tpu.memory_space<vmem>>, vector<8x32xf32>
    tpu.vector_store %arg6[%c0_123, %c0_124], %229 {strides = array<i32>} : memref<8x32xf32, #tpu.memory_space<vmem>>, vector<8x32xf32>,
    %c0_125 = arith.constant 0 : index
    %232 = arith.index_cast %206 : i32 to index
    %c0_126 = arith.constant 0 : index
    %c0_127 = arith.constant 0 : index
    %233 = vector.load %arg4[%c0_125, %232, %c0_126, %c0_127] : memref<1x8x8x32xf32, #tpu.memory_space<vmem>>, vector<1x1x8x32xf32>
    %234 = vector.shape_cast %233 : vector<1x1x8x32xf32> to vector<8x32xf32>
    %235 = vector.shape_cast %229 : vector<8x32xf32> to vector<1x1x8x32xf32>
    tpu.vector_store %arg4[%c0_125, %232, %c0_126, %c0_127], %235 {strides = array<i32>} : memref<1x8x8x32xf32, #tpu.memory_space<vmem>>, vector<1x1x8x32xf32>,
    %c7_i32_128 = arith.constant 7 : i32
    %c2_i32_129 = arith.constant 2 : i32
    %236 = arith.muli %c2_i32_129, %c7_i32_128 : i32
    %c7_i32_130 = arith.constant 7 : i32
    %237 = arith.subi %c7_i32_130, %236 : i32
    %238 = arith.muli %arg0, %237 : i32
    %239 = arith.addi %c7_i32_128, %238 : i32
    %c0_131 = arith.constant 0 : index
    %240 = arith.index_cast %239 : i32 to index
    %c0_132 = arith.constant 0 : index
    %c0_133 = arith.constant 0 : index
    %241 = vector.load %arg2[%c0_131, %240, %c0_132, %c0_133] : memref<1x8x8x128xf32, #tpu.memory_space<vmem>>, vector<1x1x8x128xf32>
    %242 = vector.shape_cast %241 : vector<1x1x8x128xf32> to vector<8x128xf32>
    %c0_134 = arith.constant 0 : index
    %c0_135 = arith.constant 0 : index
    %243 = vector.load %arg6[%c0_134, %c0_135] : memref<8x32xf32, #tpu.memory_space<vmem>>, vector<8x32xf32>
    %244 = arith.truncf %243 : vector<8x32xf32> to vector<8x32xbf16>
    %cst_136 = arith.constant dense<0.000000e+00> : vector<8x128xf32>
    %245 = tpu.matmul %244, %4, %cst_136 {dimension_numbers = #tpu.dot_dimension_numbers<[1], [0], [0], [1], [0, 0, 1, 1], [], []>} : vector<8x32xbf16>, vector<32x128xbf16>, vector<8x128xf32> -> vector<8x128xf32>
    %246 = arith.addf %242, %245 : vector<8x128xf32>
    %247 = arith.negf %246 : vector<8x128xf32>
    %248 = math.exp %247 : vector<8x128xf32>
    %cst_137 = arith.constant 1.000000e+00 : f32
    %249 = vector.broadcast %cst_137 : f32 to vector<8x128xf32>
    %250 = arith.addf %249, %248 : vector<8x128xf32>
    %251 = arith.divf %249, %250 : vector<8x128xf32>
    %252 = math.tanh %246 : vector<8x128xf32>
    %253 = vector.extract_strided_slice %251 {offsets = [0, 0], sizes = [8, 32], strides = [1, 1]} : vector<8x128xf32> to vector<8x32xf32>
    %254 = vector.extract_strided_slice %251 {offsets = [0, 32], sizes = [8, 32], strides = [1, 1]} : vector<8x128xf32> to vector<8x32xf32>
    %255 = vector.extract_strided_slice %252 {offsets = [0, 64], sizes = [8, 32], strides = [1, 1]} : vector<8x128xf32> to vector<8x32xf32>
    %256 = vector.extract_strided_slice %251 {offsets = [0, 96], sizes = [8, 32], strides = [1, 1]} : vector<8x128xf32> to vector<8x32xf32>
    %c0_138 = arith.constant 0 : index
    %c0_139 = arith.constant 0 : index
    %257 = vector.load %arg7[%c0_138, %c0_139] : memref<8x32xf32, #tpu.memory_space<vmem>>, vector<8x32xf32>
    %258 = arith.mulf %254, %257 : vector<8x32xf32>
    %259 = arith.mulf %253, %255 : vector<8x32xf32>
    %260 = arith.addf %258, %259 : vector<8x32xf32>
    %261 = math.tanh %260 : vector<8x32xf32>
    %262 = arith.mulf %256, %261 : vector<8x32xf32>
    %c0_140 = arith.constant 0 : index
    %c0_141 = arith.constant 0 : index
    %263 = vector.load %arg7[%c0_140, %c0_141] : memref<8x32xf32, #tpu.memory_space<vmem>>, vector<8x32xf32>
    tpu.vector_store %arg7[%c0_140, %c0_141], %260 {strides = array<i32>} : memref<8x32xf32, #tpu.memory_space<vmem>>, vector<8x32xf32>,
    %c0_142 = arith.constant 0 : index
    %c0_143 = arith.constant 0 : index
    %264 = vector.load %arg6[%c0_142, %c0_143] : memref<8x32xf32, #tpu.memory_space<vmem>>, vector<8x32xf32>
    tpu.vector_store %arg6[%c0_142, %c0_143], %262 {strides = array<i32>} : memref<8x32xf32, #tpu.memory_space<vmem>>, vector<8x32xf32>,
    %c0_144 = arith.constant 0 : index
    %265 = arith.index_cast %239 : i32 to index
    %c0_145 = arith.constant 0 : index
    %c0_146 = arith.constant 0 : index
    %266 = vector.load %arg4[%c0_144, %265, %c0_145, %c0_146] : memref<1x8x8x32xf32, #tpu.memory_space<vmem>>, vector<1x1x8x32xf32>
    %267 = vector.shape_cast %266 : vector<1x1x8x32xf32> to vector<8x32xf32>
    %268 = vector.shape_cast %262 : vector<8x32xf32> to vector<1x1x8x32xf32>
    tpu.vector_store %arg4[%c0_144, %265, %c0_145, %c0_146], %268 {strides = array<i32>} : memref<1x8x8x32xf32, #tpu.memory_space<vmem>>, vector<1x1x8x32xf32>,
    %c8_i32 = arith.constant 8 : i32
    %c0_i32_147 = arith.constant 0 : i32
    %269 = arith.cmpi eq, %arg1, %c0_i32_147 : i32
    %270 = arith.extui %269 : i1 to i32
    %c0_i32_148 = arith.constant 0 : i32
    %271 = arith.cmpi ne, %270, %c0_i32_148 : i32
    scf.if %271 {
      %c0_149 = arith.constant 0 : index
      %c0_150 = arith.constant 0 : index
      %272 = vector.load %arg6[%c0_149, %c0_150] : memref<8x32xf32, #tpu.memory_space<vmem>>, vector<8x32xf32>
      %c0_151 = arith.constant 0 : index
      %c0_152 = arith.constant 0 : index
      %c0_153 = arith.constant 0 : index
      %273 = vector.load %arg5[%c0_151, %c0_152, %c0_153] : memref<1x8x32xf32, #tpu.memory_space<vmem>>, vector<1x8x32xf32>
      %274 = vector.shape_cast %273 : vector<1x8x32xf32> to vector<8x32xf32>
      %275 = vector.shape_cast %272 : vector<8x32xf32> to vector<1x8x32xf32>
      tpu.vector_store %arg5[%c0_151, %c0_152, %c0_153], %275 {strides = array<i32>} : memref<1x8x32xf32, #tpu.memory_space<vmem>>, vector<1x8x32xf32>,
    } else {
    }
    return
  }
  func.func @transform_0(%arg0: i32, %arg1: i32) -> (i32, i32, i32, i32) {
    %c2_i32 = arith.constant 2 : i32
    %0 = arith.muli %c2_i32, %arg1 : i32
    %c0_i32 = arith.constant 0 : i32
    %1 = arith.subi %c0_i32, %0 : i32
    %2 = arith.muli %arg0, %1 : i32
    %3 = arith.addi %arg1, %2 : i32
    %c0_i32_0 = arith.constant 0 : i32
    %c0_i32_1 = arith.constant 0 : i32
    %c0_i32_2 = arith.constant 0 : i32
    return %arg0, %3, %c0_i32_0, %c0_i32_1 : i32, i32, i32, i32
  }
  func.func @transform_1(%arg0: i32, %arg1: i32) -> (i32, i32, i32) {
    %c0_i32 = arith.constant 0 : i32
    %c0_i32_0 = arith.constant 0 : i32
    %c0_i32_1 = arith.constant 0 : i32
    return %arg0, %c0_i32, %c0_i32_0 : i32, i32, i32
  }
  func.func @transform_2(%arg0: i32, %arg1: i32) -> (i32, i32, i32, i32) {
    %c2_i32 = arith.constant 2 : i32
    %0 = arith.muli %c2_i32, %arg1 : i32
    %c0_i32 = arith.constant 0 : i32
    %1 = arith.subi %c0_i32, %0 : i32
    %2 = arith.muli %arg0, %1 : i32
    %3 = arith.addi %arg1, %2 : i32
    %c0_i32_0 = arith.constant 0 : i32
    %c0_i32_1 = arith.constant 0 : i32
    %c0_i32_2 = arith.constant 0 : i32
    return %arg0, %3, %c0_i32_0, %c0_i32_1 : i32, i32, i32, i32
  }
  func.func @transform_3(%arg0: i32, %arg1: i32) -> (i32, i32, i32) {
    %c0_i32 = arith.constant 0 : i32
    %c0_i32_0 = arith.constant 0 : i32
    %c0_i32_1 = arith.constant 0 : i32
    return %arg0, %c0_i32, %c0_i32_0 : i32, i32, i32
  }
}

module attributes {stable_mosaic.version = 11 : i64} {
  func.func @_input_proj_kernel(%arg0: i32, %arg1: i32, %arg2: memref<8x8x64xbf16, #tpu.memory_space<vmem>>, %arg3: memref<1x64x128xbf16, #tpu.memory_space<vmem>>, %arg4: memref<1x1x128xf32, #tpu.memory_space<vmem>>, %arg5: memref<1x8x8x128xf32, #tpu.memory_space<vmem>>) attributes {dimension_semantics = [#tpu.dimension_semantics<parallel>, #tpu.dimension_semantics<parallel>], iteration_bounds = array<i64: 2, 1>, scalar_prefetch = 0 : i64, scratch_operands = 0 : i64, tpu.core_type = #tpu.core_type<tc>, window_params = [{transform_indices = @transform_0, window_bounds = array<i64: 8, 8, 64>}, {transform_indices = @transform_1, window_bounds = array<i64: 1, 64, 128>}, {transform_indices = @transform_2, window_bounds = array<i64: 1, 1, 128>}, {transform_indices = @transform_3, window_bounds = array<i64: 1, 8, 8, 128>}]} {
    %c0 = arith.constant 0 : index
    %c0_0 = arith.constant 0 : index
    %c0_1 = arith.constant 0 : index
    %0 = vector.load %arg2[%c0, %c0_0, %c0_1] : memref<8x8x64xbf16, #tpu.memory_space<vmem>>, vector<8x8x64xbf16>
    %1 = vector.shape_cast %0 : vector<8x8x64xbf16> to vector<64x64xbf16>
    %c0_2 = arith.constant 0 : index
    %c0_3 = arith.constant 0 : index
    %c0_4 = arith.constant 0 : index
    %2 = vector.load %arg3[%c0_2, %c0_3, %c0_4] : memref<1x64x128xbf16, #tpu.memory_space<vmem>>, vector<1x64x128xbf16>
    %3 = vector.shape_cast %2 : vector<1x64x128xbf16> to vector<64x128xbf16>
    %cst = arith.constant dense<0.000000e+00> : vector<64x128xf32>
    %4 = tpu.matmul %1, %3, %cst {dimension_numbers = #tpu.dot_dimension_numbers<[1], [0], [0], [1], [0, 0, 1, 1], [], []>} : vector<64x64xbf16>, vector<64x128xbf16>, vector<64x128xf32> -> vector<64x128xf32>
    %c0_5 = arith.constant 0 : index
    %c0_6 = arith.constant 0 : index
    %c0_7 = arith.constant 0 : index
    %5 = vector.load %arg4[%c0_5, %c0_6, %c0_7] : memref<1x1x128xf32, #tpu.memory_space<vmem>>, vector<1x1x128xf32>
    %6 = vector.shape_cast %5 : vector<1x1x128xf32> to vector<1x128xf32>
    %7 = vector.broadcast %6 : vector<1x128xf32> to vector<64x128xf32>
    %8 = arith.addf %4, %7 : vector<64x128xf32>
    %9 = vector.shape_cast %8 : vector<64x128xf32> to vector<8x8x128xf32>
    %c0_8 = arith.constant 0 : index
    %c0_9 = arith.constant 0 : index
    %c0_10 = arith.constant 0 : index
    %c0_11 = arith.constant 0 : index
    %10 = vector.load %arg5[%c0_8, %c0_9, %c0_10, %c0_11] : memref<1x8x8x128xf32, #tpu.memory_space<vmem>>, vector<1x8x8x128xf32>
    %11 = vector.shape_cast %10 : vector<1x8x8x128xf32> to vector<8x8x128xf32>
    %12 = vector.shape_cast %9 : vector<8x8x128xf32> to vector<1x8x8x128xf32>
    tpu.vector_store %arg5[%c0_8, %c0_9, %c0_10, %c0_11], %12 {strides = array<i32>} : memref<1x8x8x128xf32, #tpu.memory_space<vmem>>, vector<1x8x8x128xf32>,
    return
  }
  func.func @transform_0(%arg0: i32, %arg1: i32) -> (i32, i32, i32) {
    %c0_i32 = arith.constant 0 : i32
    %c0_i32_0 = arith.constant 0 : i32
    %c0_i32_1 = arith.constant 0 : i32
    return %arg1, %c0_i32, %c0_i32_0 : i32, i32, i32
  }
  func.func @transform_1(%arg0: i32, %arg1: i32) -> (i32, i32, i32) {
    %c0_i32 = arith.constant 0 : i32
    %c0_i32_0 = arith.constant 0 : i32
    %c0_i32_1 = arith.constant 0 : i32
    return %arg0, %c0_i32, %c0_i32_0 : i32, i32, i32
  }
  func.func @transform_2(%arg0: i32, %arg1: i32) -> (i32, i32, i32) {
    %c0_i32 = arith.constant 0 : i32
    %c0_i32_0 = arith.constant 0 : i32
    %c0_i32_1 = arith.constant 0 : i32
    return %arg0, %c0_i32, %c0_i32_0 : i32, i32, i32
  }
  func.func @transform_3(%arg0: i32, %arg1: i32) -> (i32, i32, i32, i32) {
    %c0_i32 = arith.constant 0 : i32
    %c0_i32_0 = arith.constant 0 : i32
    %c0_i32_1 = arith.constant 0 : i32
    return %arg0, %arg1, %c0_i32, %c0_i32_0 : i32, i32, i32, i32
  }
}

module attributes {stable_mosaic.version = 11 : i64} {
  func.func @_lstm_recurrence_kernel(%arg0: i32, %arg1: i32, %arg2: memref<1x8x8x128xf32, #tpu.memory_space<vmem>>, %arg3: memref<1x32x128xbf16, #tpu.memory_space<vmem>>, %arg4: memref<1x8x8x32xf32, #tpu.memory_space<vmem>>, %arg5: memref<1x8x32xf32, #tpu.memory_space<vmem>>, %arg6: memref<8x32xf32, #tpu.memory_space<vmem>>, %arg7: memref<8x32xf32, #tpu.memory_space<vmem>>) attributes {dimension_semantics = [#tpu.dimension_semantics<parallel>, #tpu.dimension_semantics<arbitrary>], iteration_bounds = array<i64: 2, 1>, scalar_prefetch = 0 : i64, scratch_operands = 2 : i64, tpu.core_type = #tpu.core_type<tc>, window_params = [{transform_indices = @transform_0, window_bounds = array<i64: 1, 8, 8, 128>}, {transform_indices = @transform_1, window_bounds = array<i64: 1, 32, 128>}, {transform_indices = @transform_2, window_bounds = array<i64: 1, 8, 8, 32>}, {transform_indices = @transform_3, window_bounds = array<i64: 1, 8, 32>}]} {
    %c0_i32 = arith.constant 0 : i32
    %0 = arith.cmpi eq, %arg1, %c0_i32 : i32
    %1 = arith.extui %0 : i1 to i32
    %c0_i32_0 = arith.constant 0 : i32
    %2 = arith.cmpi ne, %1, %c0_i32_0 : i32
    scf.if %2 {
      %cst_149 = arith.constant 0.000000e+00 : f32
      %272 = vector.broadcast %cst_149 : f32 to vector<8x32xf32>
      %c0_150 = arith.constant 0 : index
      %c0_151 = arith.constant 0 : index
      %273 = vector.load %arg6[%c0_150, %c0_151] : memref<8x32xf32, #tpu.memory_space<vmem>>, vector<8x32xf32>
      tpu.vector_store %arg6[%c0_150, %c0_151], %272 {strides = array<i32>} : memref<8x32xf32, #tpu.memory_space<vmem>>, vector<8x32xf32>,
      %cst_152 = arith.constant 0.000000e+00 : f32
      %274 = vector.broadcast %cst_152 : f32 to vector<8x32xf32>
      %c0_153 = arith.constant 0 : index
      %c0_154 = arith.constant 0 : index
      %275 = vector.load %arg7[%c0_153, %c0_154] : memref<8x32xf32, #tpu.memory_space<vmem>>, vector<8x32xf32>
      tpu.vector_store %arg7[%c0_153, %c0_154], %274 {strides = array<i32>} : memref<8x32xf32, #tpu.memory_space<vmem>>, vector<8x32xf32>,
    } else {
    }
    %c0 = arith.constant 0 : index
    %c0_1 = arith.constant 0 : index
    %c0_2 = arith.constant 0 : index
    %3 = vector.load %arg3[%c0, %c0_1, %c0_2] : memref<1x32x128xbf16, #tpu.memory_space<vmem>>, vector<1x32x128xbf16>
    %4 = vector.shape_cast %3 : vector<1x32x128xbf16> to vector<32x128xbf16>
    %c0_i32_3 = arith.constant 0 : i32
    %c2_i32 = arith.constant 2 : i32
    %5 = arith.muli %c2_i32, %c0_i32_3 : i32
    %c7_i32 = arith.constant 7 : i32
    %6 = arith.subi %c7_i32, %5 : i32
    %7 = arith.muli %arg0, %6 : i32
    %8 = arith.addi %c0_i32_3, %7 : i32
    %c0_4 = arith.constant 0 : index
    %9 = arith.index_cast %8 : i32 to index
    %c0_5 = arith.constant 0 : index
    %c0_6 = arith.constant 0 : index
    %10 = vector.load %arg2[%c0_4, %9, %c0_5, %c0_6] : memref<1x8x8x128xf32, #tpu.memory_space<vmem>>, vector<1x1x8x128xf32>
    %11 = vector.shape_cast %10 : vector<1x1x8x128xf32> to vector<8x128xf32>
    %c0_7 = arith.constant 0 : index
    %c0_8 = arith.constant 0 : index
    %12 = vector.load %arg6[%c0_7, %c0_8] : memref<8x32xf32, #tpu.memory_space<vmem>>, vector<8x32xf32>
    %13 = arith.truncf %12 : vector<8x32xf32> to vector<8x32xbf16>
    %cst = arith.constant dense<0.000000e+00> : vector<8x128xf32>
    %14 = tpu.matmul %13, %4, %cst {dimension_numbers = #tpu.dot_dimension_numbers<[1], [0], [0], [1], [0, 0, 1, 1], [], []>} : vector<8x32xbf16>, vector<32x128xbf16>, vector<8x128xf32> -> vector<8x128xf32>
    %15 = arith.addf %11, %14 : vector<8x128xf32>
    %16 = arith.negf %15 : vector<8x128xf32>
    %17 = math.exp %16 : vector<8x128xf32>
    %cst_9 = arith.constant 1.000000e+00 : f32
    %18 = vector.broadcast %cst_9 : f32 to vector<8x128xf32>
    %19 = arith.addf %18, %17 : vector<8x128xf32>
    %20 = arith.divf %18, %19 : vector<8x128xf32>
    %21 = math.tanh %15 : vector<8x128xf32>
    %22 = vector.extract_strided_slice %20 {offsets = [0, 0], sizes = [8, 32], strides = [1, 1]} : vector<8x128xf32> to vector<8x32xf32>
    %23 = vector.extract_strided_slice %20 {offsets = [0, 32], sizes = [8, 32], strides = [1, 1]} : vector<8x128xf32> to vector<8x32xf32>
    %24 = vector.extract_strided_slice %21 {offsets = [0, 64], sizes = [8, 32], strides = [1, 1]} : vector<8x128xf32> to vector<8x32xf32>
    %25 = vector.extract_strided_slice %20 {offsets = [0, 96], sizes = [8, 32], strides = [1, 1]} : vector<8x128xf32> to vector<8x32xf32>
    %c0_10 = arith.constant 0 : index
    %c0_11 = arith.constant 0 : index
    %26 = vector.load %arg7[%c0_10, %c0_11] : memref<8x32xf32, #tpu.memory_space<vmem>>, vector<8x32xf32>
    %27 = arith.mulf %23, %26 : vector<8x32xf32>
    %28 = arith.mulf %22, %24 : vector<8x32xf32>
    %29 = arith.addf %27, %28 : vector<8x32xf32>
    %30 = math.tanh %29 : vector<8x32xf32>
    %31 = arith.mulf %25, %30 : vector<8x32xf32>
    %c0_12 = arith.constant 0 : index
    %c0_13 = arith.constant 0 : index
    %32 = vector.load %arg7[%c0_12, %c0_13] : memref<8x32xf32, #tpu.memory_space<vmem>>, vector<8x32xf32>
    tpu.vector_store %arg7[%c0_12, %c0_13], %29 {strides = array<i32>} : memref<8x32xf32, #tpu.memory_space<vmem>>, vector<8x32xf32>,
    %c0_14 = arith.constant 0 : index
    %c0_15 = arith.constant 0 : index
    %33 = vector.load %arg6[%c0_14, %c0_15] : memref<8x32xf32, #tpu.memory_space<vmem>>, vector<8x32xf32>
    tpu.vector_store %arg6[%c0_14, %c0_15], %31 {strides = array<i32>} : memref<8x32xf32, #tpu.memory_space<vmem>>, vector<8x32xf32>,
    %c0_16 = arith.constant 0 : index
    %34 = arith.index_cast %8 : i32 to index
    %c0_17 = arith.constant 0 : index
    %c0_18 = arith.constant 0 : index
    %35 = vector.load %arg4[%c0_16, %34, %c0_17, %c0_18] : memref<1x8x8x32xf32, #tpu.memory_space<vmem>>, vector<1x1x8x32xf32>
    %36 = vector.shape_cast %35 : vector<1x1x8x32xf32> to vector<8x32xf32>
    %37 = vector.shape_cast %31 : vector<8x32xf32> to vector<1x1x8x32xf32>
    tpu.vector_store %arg4[%c0_16, %34, %c0_17, %c0_18], %37 {strides = array<i32>} : memref<1x8x8x32xf32, #tpu.memory_space<vmem>>, vector<1x1x8x32xf32>,
    %c1_i32 = arith.constant 1 : i32
    %c2_i32_19 = arith.constant 2 : i32
    %38 = arith.muli %c2_i32_19, %c1_i32 : i32
    %c7_i32_20 = arith.constant 7 : i32
    %39 = arith.subi %c7_i32_20, %38 : i32
    %40 = arith.muli %arg0, %39 : i32
    %41 = arith.addi %c1_i32, %40 : i32
    %c0_21 = arith.constant 0 : index
    %42 = arith.index_cast %41 : i32 to index
    %c0_22 = arith.constant 0 : index
    %c0_23 = arith.constant 0 : index
    %43 = vector.load %arg2[%c0_21, %42, %c0_22, %c0_23] : memref<1x8x8x128xf32, #tpu.memory_space<vmem>>, vector<1x1x8x128xf32>
    %44 = vector.shape_cast %43 : vector<1x1x8x128xf32> to vector<8x128xf32>
    %c0_24 = arith.constant 0 : index
    %c0_25 = arith.constant 0 : index
    %45 = vector.load %arg6[%c0_24, %c0_25] : memref<8x32xf32, #tpu.memory_space<vmem>>, vector<8x32xf32>
    %46 = arith.truncf %45 : vector<8x32xf32> to vector<8x32xbf16>
    %cst_26 = arith.constant dense<0.000000e+00> : vector<8x128xf32>
    %47 = tpu.matmul %46, %4, %cst_26 {dimension_numbers = #tpu.dot_dimension_numbers<[1], [0], [0], [1], [0, 0, 1, 1], [], []>} : vector<8x32xbf16>, vector<32x128xbf16>, vector<8x128xf32> -> vector<8x128xf32>
    %48 = arith.addf %44, %47 : vector<8x128xf32>
    %49 = arith.negf %48 : vector<8x128xf32>
    %50 = math.exp %49 : vector<8x128xf32>
    %cst_27 = arith.constant 1.000000e+00 : f32
    %51 = vector.broadcast %cst_27 : f32 to vector<8x128xf32>
    %52 = arith.addf %51, %50 : vector<8x128xf32>
    %53 = arith.divf %51, %52 : vector<8x128xf32>
    %54 = math.tanh %48 : vector<8x128xf32>
    %55 = vector.extract_strided_slice %53 {offsets = [0, 0], sizes = [8, 32], strides = [1, 1]} : vector<8x128xf32> to vector<8x32xf32>
    %56 = vector.extract_strided_slice %53 {offsets = [0, 32], sizes = [8, 32], strides = [1, 1]} : vector<8x128xf32> to vector<8x32xf32>
    %57 = vector.extract_strided_slice %54 {offsets = [0, 64], sizes = [8, 32], strides = [1, 1]} : vector<8x128xf32> to vector<8x32xf32>
    %58 = vector.extract_strided_slice %53 {offsets = [0, 96], sizes = [8, 32], strides = [1, 1]} : vector<8x128xf32> to vector<8x32xf32>
    %c0_28 = arith.constant 0 : index
    %c0_29 = arith.constant 0 : index
    %59 = vector.load %arg7[%c0_28, %c0_29] : memref<8x32xf32, #tpu.memory_space<vmem>>, vector<8x32xf32>
    %60 = arith.mulf %56, %59 : vector<8x32xf32>
    %61 = arith.mulf %55, %57 : vector<8x32xf32>
    %62 = arith.addf %60, %61 : vector<8x32xf32>
    %63 = math.tanh %62 : vector<8x32xf32>
    %64 = arith.mulf %58, %63 : vector<8x32xf32>
    %c0_30 = arith.constant 0 : index
    %c0_31 = arith.constant 0 : index
    %65 = vector.load %arg7[%c0_30, %c0_31] : memref<8x32xf32, #tpu.memory_space<vmem>>, vector<8x32xf32>
    tpu.vector_store %arg7[%c0_30, %c0_31], %62 {strides = array<i32>} : memref<8x32xf32, #tpu.memory_space<vmem>>, vector<8x32xf32>,
    %c0_32 = arith.constant 0 : index
    %c0_33 = arith.constant 0 : index
    %66 = vector.load %arg6[%c0_32, %c0_33] : memref<8x32xf32, #tpu.memory_space<vmem>>, vector<8x32xf32>
    tpu.vector_store %arg6[%c0_32, %c0_33], %64 {strides = array<i32>} : memref<8x32xf32, #tpu.memory_space<vmem>>, vector<8x32xf32>,
    %c0_34 = arith.constant 0 : index
    %67 = arith.index_cast %41 : i32 to index
    %c0_35 = arith.constant 0 : index
    %c0_36 = arith.constant 0 : index
    %68 = vector.load %arg4[%c0_34, %67, %c0_35, %c0_36] : memref<1x8x8x32xf32, #tpu.memory_space<vmem>>, vector<1x1x8x32xf32>
    %69 = vector.shape_cast %68 : vector<1x1x8x32xf32> to vector<8x32xf32>
    %70 = vector.shape_cast %64 : vector<8x32xf32> to vector<1x1x8x32xf32>
    tpu.vector_store %arg4[%c0_34, %67, %c0_35, %c0_36], %70 {strides = array<i32>} : memref<1x8x8x32xf32, #tpu.memory_space<vmem>>, vector<1x1x8x32xf32>,
    %c2_i32_37 = arith.constant 2 : i32
    %c2_i32_38 = arith.constant 2 : i32
    %71 = arith.muli %c2_i32_38, %c2_i32_37 : i32
    %c7_i32_39 = arith.constant 7 : i32
    %72 = arith.subi %c7_i32_39, %71 : i32
    %73 = arith.muli %arg0, %72 : i32
    %74 = arith.addi %c2_i32_37, %73 : i32
    %c0_40 = arith.constant 0 : index
    %75 = arith.index_cast %74 : i32 to index
    %c0_41 = arith.constant 0 : index
    %c0_42 = arith.constant 0 : index
    %76 = vector.load %arg2[%c0_40, %75, %c0_41, %c0_42] : memref<1x8x8x128xf32, #tpu.memory_space<vmem>>, vector<1x1x8x128xf32>
    %77 = vector.shape_cast %76 : vector<1x1x8x128xf32> to vector<8x128xf32>
    %c0_43 = arith.constant 0 : index
    %c0_44 = arith.constant 0 : index
    %78 = vector.load %arg6[%c0_43, %c0_44] : memref<8x32xf32, #tpu.memory_space<vmem>>, vector<8x32xf32>
    %79 = arith.truncf %78 : vector<8x32xf32> to vector<8x32xbf16>
    %cst_45 = arith.constant dense<0.000000e+00> : vector<8x128xf32>
    %80 = tpu.matmul %79, %4, %cst_45 {dimension_numbers = #tpu.dot_dimension_numbers<[1], [0], [0], [1], [0, 0, 1, 1], [], []>} : vector<8x32xbf16>, vector<32x128xbf16>, vector<8x128xf32> -> vector<8x128xf32>
    %81 = arith.addf %77, %80 : vector<8x128xf32>
    %82 = arith.negf %81 : vector<8x128xf32>
    %83 = math.exp %82 : vector<8x128xf32>
    %cst_46 = arith.constant 1.000000e+00 : f32
    %84 = vector.broadcast %cst_46 : f32 to vector<8x128xf32>
    %85 = arith.addf %84, %83 : vector<8x128xf32>
    %86 = arith.divf %84, %85 : vector<8x128xf32>
    %87 = math.tanh %81 : vector<8x128xf32>
    %88 = vector.extract_strided_slice %86 {offsets = [0, 0], sizes = [8, 32], strides = [1, 1]} : vector<8x128xf32> to vector<8x32xf32>
    %89 = vector.extract_strided_slice %86 {offsets = [0, 32], sizes = [8, 32], strides = [1, 1]} : vector<8x128xf32> to vector<8x32xf32>
    %90 = vector.extract_strided_slice %87 {offsets = [0, 64], sizes = [8, 32], strides = [1, 1]} : vector<8x128xf32> to vector<8x32xf32>
    %91 = vector.extract_strided_slice %86 {offsets = [0, 96], sizes = [8, 32], strides = [1, 1]} : vector<8x128xf32> to vector<8x32xf32>
    %c0_47 = arith.constant 0 : index
    %c0_48 = arith.constant 0 : index
    %92 = vector.load %arg7[%c0_47, %c0_48] : memref<8x32xf32, #tpu.memory_space<vmem>>, vector<8x32xf32>
    %93 = arith.mulf %89, %92 : vector<8x32xf32>
    %94 = arith.mulf %88, %90 : vector<8x32xf32>
    %95 = arith.addf %93, %94 : vector<8x32xf32>
    %96 = math.tanh %95 : vector<8x32xf32>
    %97 = arith.mulf %91, %96 : vector<8x32xf32>
    %c0_49 = arith.constant 0 : index
    %c0_50 = arith.constant 0 : index
    %98 = vector.load %arg7[%c0_49, %c0_50] : memref<8x32xf32, #tpu.memory_space<vmem>>, vector<8x32xf32>
    tpu.vector_store %arg7[%c0_49, %c0_50], %95 {strides = array<i32>} : memref<8x32xf32, #tpu.memory_space<vmem>>, vector<8x32xf32>,
    %c0_51 = arith.constant 0 : index
    %c0_52 = arith.constant 0 : index
    %99 = vector.load %arg6[%c0_51, %c0_52] : memref<8x32xf32, #tpu.memory_space<vmem>>, vector<8x32xf32>
    tpu.vector_store %arg6[%c0_51, %c0_52], %97 {strides = array<i32>} : memref<8x32xf32, #tpu.memory_space<vmem>>, vector<8x32xf32>,
    %c0_53 = arith.constant 0 : index
    %100 = arith.index_cast %74 : i32 to index
    %c0_54 = arith.constant 0 : index
    %c0_55 = arith.constant 0 : index
    %101 = vector.load %arg4[%c0_53, %100, %c0_54, %c0_55] : memref<1x8x8x32xf32, #tpu.memory_space<vmem>>, vector<1x1x8x32xf32>
    %102 = vector.shape_cast %101 : vector<1x1x8x32xf32> to vector<8x32xf32>
    %103 = vector.shape_cast %97 : vector<8x32xf32> to vector<1x1x8x32xf32>
    tpu.vector_store %arg4[%c0_53, %100, %c0_54, %c0_55], %103 {strides = array<i32>} : memref<1x8x8x32xf32, #tpu.memory_space<vmem>>, vector<1x1x8x32xf32>,
    %c3_i32 = arith.constant 3 : i32
    %c2_i32_56 = arith.constant 2 : i32
    %104 = arith.muli %c2_i32_56, %c3_i32 : i32
    %c7_i32_57 = arith.constant 7 : i32
    %105 = arith.subi %c7_i32_57, %104 : i32
    %106 = arith.muli %arg0, %105 : i32
    %107 = arith.addi %c3_i32, %106 : i32
    %c0_58 = arith.constant 0 : index
    %108 = arith.index_cast %107 : i32 to index
    %c0_59 = arith.constant 0 : index
    %c0_60 = arith.constant 0 : index
    %109 = vector.load %arg2[%c0_58, %108, %c0_59, %c0_60] : memref<1x8x8x128xf32, #tpu.memory_space<vmem>>, vector<1x1x8x128xf32>
    %110 = vector.shape_cast %109 : vector<1x1x8x128xf32> to vector<8x128xf32>
    %c0_61 = arith.constant 0 : index
    %c0_62 = arith.constant 0 : index
    %111 = vector.load %arg6[%c0_61, %c0_62] : memref<8x32xf32, #tpu.memory_space<vmem>>, vector<8x32xf32>
    %112 = arith.truncf %111 : vector<8x32xf32> to vector<8x32xbf16>
    %cst_63 = arith.constant dense<0.000000e+00> : vector<8x128xf32>
    %113 = tpu.matmul %112, %4, %cst_63 {dimension_numbers = #tpu.dot_dimension_numbers<[1], [0], [0], [1], [0, 0, 1, 1], [], []>} : vector<8x32xbf16>, vector<32x128xbf16>, vector<8x128xf32> -> vector<8x128xf32>
    %114 = arith.addf %110, %113 : vector<8x128xf32>
    %115 = arith.negf %114 : vector<8x128xf32>
    %116 = math.exp %115 : vector<8x128xf32>
    %cst_64 = arith.constant 1.000000e+00 : f32
    %117 = vector.broadcast %cst_64 : f32 to vector<8x128xf32>
    %118 = arith.addf %117, %116 : vector<8x128xf32>
    %119 = arith.divf %117, %118 : vector<8x128xf32>
    %120 = math.tanh %114 : vector<8x128xf32>
    %121 = vector.extract_strided_slice %119 {offsets = [0, 0], sizes = [8, 32], strides = [1, 1]} : vector<8x128xf32> to vector<8x32xf32>
    %122 = vector.extract_strided_slice %119 {offsets = [0, 32], sizes = [8, 32], strides = [1, 1]} : vector<8x128xf32> to vector<8x32xf32>
    %123 = vector.extract_strided_slice %120 {offsets = [0, 64], sizes = [8, 32], strides = [1, 1]} : vector<8x128xf32> to vector<8x32xf32>
    %124 = vector.extract_strided_slice %119 {offsets = [0, 96], sizes = [8, 32], strides = [1, 1]} : vector<8x128xf32> to vector<8x32xf32>
    %c0_65 = arith.constant 0 : index
    %c0_66 = arith.constant 0 : index
    %125 = vector.load %arg7[%c0_65, %c0_66] : memref<8x32xf32, #tpu.memory_space<vmem>>, vector<8x32xf32>
    %126 = arith.mulf %122, %125 : vector<8x32xf32>
    %127 = arith.mulf %121, %123 : vector<8x32xf32>
    %128 = arith.addf %126, %127 : vector<8x32xf32>
    %129 = math.tanh %128 : vector<8x32xf32>
    %130 = arith.mulf %124, %129 : vector<8x32xf32>
    %c0_67 = arith.constant 0 : index
    %c0_68 = arith.constant 0 : index
    %131 = vector.load %arg7[%c0_67, %c0_68] : memref<8x32xf32, #tpu.memory_space<vmem>>, vector<8x32xf32>
    tpu.vector_store %arg7[%c0_67, %c0_68], %128 {strides = array<i32>} : memref<8x32xf32, #tpu.memory_space<vmem>>, vector<8x32xf32>,
    %c0_69 = arith.constant 0 : index
    %c0_70 = arith.constant 0 : index
    %132 = vector.load %arg6[%c0_69, %c0_70] : memref<8x32xf32, #tpu.memory_space<vmem>>, vector<8x32xf32>
    tpu.vector_store %arg6[%c0_69, %c0_70], %130 {strides = array<i32>} : memref<8x32xf32, #tpu.memory_space<vmem>>, vector<8x32xf32>,
    %c0_71 = arith.constant 0 : index
    %133 = arith.index_cast %107 : i32 to index
    %c0_72 = arith.constant 0 : index
    %c0_73 = arith.constant 0 : index
    %134 = vector.load %arg4[%c0_71, %133, %c0_72, %c0_73] : memref<1x8x8x32xf32, #tpu.memory_space<vmem>>, vector<1x1x8x32xf32>
    %135 = vector.shape_cast %134 : vector<1x1x8x32xf32> to vector<8x32xf32>
    %136 = vector.shape_cast %130 : vector<8x32xf32> to vector<1x1x8x32xf32>
    tpu.vector_store %arg4[%c0_71, %133, %c0_72, %c0_73], %136 {strides = array<i32>} : memref<1x8x8x32xf32, #tpu.memory_space<vmem>>, vector<1x1x8x32xf32>,
    %c4_i32 = arith.constant 4 : i32
    %c2_i32_74 = arith.constant 2 : i32
    %137 = arith.muli %c2_i32_74, %c4_i32 : i32
    %c7_i32_75 = arith.constant 7 : i32
    %138 = arith.subi %c7_i32_75, %137 : i32
    %139 = arith.muli %arg0, %138 : i32
    %140 = arith.addi %c4_i32, %139 : i32
    %c0_76 = arith.constant 0 : index
    %141 = arith.index_cast %140 : i32 to index
    %c0_77 = arith.constant 0 : index
    %c0_78 = arith.constant 0 : index
    %142 = vector.load %arg2[%c0_76, %141, %c0_77, %c0_78] : memref<1x8x8x128xf32, #tpu.memory_space<vmem>>, vector<1x1x8x128xf32>
    %143 = vector.shape_cast %142 : vector<1x1x8x128xf32> to vector<8x128xf32>
    %c0_79 = arith.constant 0 : index
    %c0_80 = arith.constant 0 : index
    %144 = vector.load %arg6[%c0_79, %c0_80] : memref<8x32xf32, #tpu.memory_space<vmem>>, vector<8x32xf32>
    %145 = arith.truncf %144 : vector<8x32xf32> to vector<8x32xbf16>
    %cst_81 = arith.constant dense<0.000000e+00> : vector<8x128xf32>
    %146 = tpu.matmul %145, %4, %cst_81 {dimension_numbers = #tpu.dot_dimension_numbers<[1], [0], [0], [1], [0, 0, 1, 1], [], []>} : vector<8x32xbf16>, vector<32x128xbf16>, vector<8x128xf32> -> vector<8x128xf32>
    %147 = arith.addf %143, %146 : vector<8x128xf32>
    %148 = arith.negf %147 : vector<8x128xf32>
    %149 = math.exp %148 : vector<8x128xf32>
    %cst_82 = arith.constant 1.000000e+00 : f32
    %150 = vector.broadcast %cst_82 : f32 to vector<8x128xf32>
    %151 = arith.addf %150, %149 : vector<8x128xf32>
    %152 = arith.divf %150, %151 : vector<8x128xf32>
    %153 = math.tanh %147 : vector<8x128xf32>
    %154 = vector.extract_strided_slice %152 {offsets = [0, 0], sizes = [8, 32], strides = [1, 1]} : vector<8x128xf32> to vector<8x32xf32>
    %155 = vector.extract_strided_slice %152 {offsets = [0, 32], sizes = [8, 32], strides = [1, 1]} : vector<8x128xf32> to vector<8x32xf32>
    %156 = vector.extract_strided_slice %153 {offsets = [0, 64], sizes = [8, 32], strides = [1, 1]} : vector<8x128xf32> to vector<8x32xf32>
    %157 = vector.extract_strided_slice %152 {offsets = [0, 96], sizes = [8, 32], strides = [1, 1]} : vector<8x128xf32> to vector<8x32xf32>
    %c0_83 = arith.constant 0 : index
    %c0_84 = arith.constant 0 : index
    %158 = vector.load %arg7[%c0_83, %c0_84] : memref<8x32xf32, #tpu.memory_space<vmem>>, vector<8x32xf32>
    %159 = arith.mulf %155, %158 : vector<8x32xf32>
    %160 = arith.mulf %154, %156 : vector<8x32xf32>
    %161 = arith.addf %159, %160 : vector<8x32xf32>
    %162 = math.tanh %161 : vector<8x32xf32>
    %163 = arith.mulf %157, %162 : vector<8x32xf32>
    %c0_85 = arith.constant 0 : index
    %c0_86 = arith.constant 0 : index
    %164 = vector.load %arg7[%c0_85, %c0_86] : memref<8x32xf32, #tpu.memory_space<vmem>>, vector<8x32xf32>
    tpu.vector_store %arg7[%c0_85, %c0_86], %161 {strides = array<i32>} : memref<8x32xf32, #tpu.memory_space<vmem>>, vector<8x32xf32>,
    %c0_87 = arith.constant 0 : index
    %c0_88 = arith.constant 0 : index
    %165 = vector.load %arg6[%c0_87, %c0_88] : memref<8x32xf32, #tpu.memory_space<vmem>>, vector<8x32xf32>
    tpu.vector_store %arg6[%c0_87, %c0_88], %163 {strides = array<i32>} : memref<8x32xf32, #tpu.memory_space<vmem>>, vector<8x32xf32>,
    %c0_89 = arith.constant 0 : index
    %166 = arith.index_cast %140 : i32 to index
    %c0_90 = arith.constant 0 : index
    %c0_91 = arith.constant 0 : index
    %167 = vector.load %arg4[%c0_89, %166, %c0_90, %c0_91] : memref<1x8x8x32xf32, #tpu.memory_space<vmem>>, vector<1x1x8x32xf32>
    %168 = vector.shape_cast %167 : vector<1x1x8x32xf32> to vector<8x32xf32>
    %169 = vector.shape_cast %163 : vector<8x32xf32> to vector<1x1x8x32xf32>
    tpu.vector_store %arg4[%c0_89, %166, %c0_90, %c0_91], %169 {strides = array<i32>} : memref<1x8x8x32xf32, #tpu.memory_space<vmem>>, vector<1x1x8x32xf32>,
    %c5_i32 = arith.constant 5 : i32
    %c2_i32_92 = arith.constant 2 : i32
    %170 = arith.muli %c2_i32_92, %c5_i32 : i32
    %c7_i32_93 = arith.constant 7 : i32
    %171 = arith.subi %c7_i32_93, %170 : i32
    %172 = arith.muli %arg0, %171 : i32
    %173 = arith.addi %c5_i32, %172 : i32
    %c0_94 = arith.constant 0 : index
    %174 = arith.index_cast %173 : i32 to index
    %c0_95 = arith.constant 0 : index
    %c0_96 = arith.constant 0 : index
    %175 = vector.load %arg2[%c0_94, %174, %c0_95, %c0_96] : memref<1x8x8x128xf32, #tpu.memory_space<vmem>>, vector<1x1x8x128xf32>
    %176 = vector.shape_cast %175 : vector<1x1x8x128xf32> to vector<8x128xf32>
    %c0_97 = arith.constant 0 : index
    %c0_98 = arith.constant 0 : index
    %177 = vector.load %arg6[%c0_97, %c0_98] : memref<8x32xf32, #tpu.memory_space<vmem>>, vector<8x32xf32>
    %178 = arith.truncf %177 : vector<8x32xf32> to vector<8x32xbf16>
    %cst_99 = arith.constant dense<0.000000e+00> : vector<8x128xf32>
    %179 = tpu.matmul %178, %4, %cst_99 {dimension_numbers = #tpu.dot_dimension_numbers<[1], [0], [0], [1], [0, 0, 1, 1], [], []>} : vector<8x32xbf16>, vector<32x128xbf16>, vector<8x128xf32> -> vector<8x128xf32>
    %180 = arith.addf %176, %179 : vector<8x128xf32>
    %181 = arith.negf %180 : vector<8x128xf32>
    %182 = math.exp %181 : vector<8x128xf32>
    %cst_100 = arith.constant 1.000000e+00 : f32
    %183 = vector.broadcast %cst_100 : f32 to vector<8x128xf32>
    %184 = arith.addf %183, %182 : vector<8x128xf32>
    %185 = arith.divf %183, %184 : vector<8x128xf32>
    %186 = math.tanh %180 : vector<8x128xf32>
    %187 = vector.extract_strided_slice %185 {offsets = [0, 0], sizes = [8, 32], strides = [1, 1]} : vector<8x128xf32> to vector<8x32xf32>
    %188 = vector.extract_strided_slice %185 {offsets = [0, 32], sizes = [8, 32], strides = [1, 1]} : vector<8x128xf32> to vector<8x32xf32>
    %189 = vector.extract_strided_slice %186 {offsets = [0, 64], sizes = [8, 32], strides = [1, 1]} : vector<8x128xf32> to vector<8x32xf32>
    %190 = vector.extract_strided_slice %185 {offsets = [0, 96], sizes = [8, 32], strides = [1, 1]} : vector<8x128xf32> to vector<8x32xf32>
    %c0_101 = arith.constant 0 : index
    %c0_102 = arith.constant 0 : index
    %191 = vector.load %arg7[%c0_101, %c0_102] : memref<8x32xf32, #tpu.memory_space<vmem>>, vector<8x32xf32>
    %192 = arith.mulf %188, %191 : vector<8x32xf32>
    %193 = arith.mulf %187, %189 : vector<8x32xf32>
    %194 = arith.addf %192, %193 : vector<8x32xf32>
    %195 = math.tanh %194 : vector<8x32xf32>
    %196 = arith.mulf %190, %195 : vector<8x32xf32>
    %c0_103 = arith.constant 0 : index
    %c0_104 = arith.constant 0 : index
    %197 = vector.load %arg7[%c0_103, %c0_104] : memref<8x32xf32, #tpu.memory_space<vmem>>, vector<8x32xf32>
    tpu.vector_store %arg7[%c0_103, %c0_104], %194 {strides = array<i32>} : memref<8x32xf32, #tpu.memory_space<vmem>>, vector<8x32xf32>,
    %c0_105 = arith.constant 0 : index
    %c0_106 = arith.constant 0 : index
    %198 = vector.load %arg6[%c0_105, %c0_106] : memref<8x32xf32, #tpu.memory_space<vmem>>, vector<8x32xf32>
    tpu.vector_store %arg6[%c0_105, %c0_106], %196 {strides = array<i32>} : memref<8x32xf32, #tpu.memory_space<vmem>>, vector<8x32xf32>,
    %c0_107 = arith.constant 0 : index
    %199 = arith.index_cast %173 : i32 to index
    %c0_108 = arith.constant 0 : index
    %c0_109 = arith.constant 0 : index
    %200 = vector.load %arg4[%c0_107, %199, %c0_108, %c0_109] : memref<1x8x8x32xf32, #tpu.memory_space<vmem>>, vector<1x1x8x32xf32>
    %201 = vector.shape_cast %200 : vector<1x1x8x32xf32> to vector<8x32xf32>
    %202 = vector.shape_cast %196 : vector<8x32xf32> to vector<1x1x8x32xf32>
    tpu.vector_store %arg4[%c0_107, %199, %c0_108, %c0_109], %202 {strides = array<i32>} : memref<1x8x8x32xf32, #tpu.memory_space<vmem>>, vector<1x1x8x32xf32>,
    %c6_i32 = arith.constant 6 : i32
    %c2_i32_110 = arith.constant 2 : i32
    %203 = arith.muli %c2_i32_110, %c6_i32 : i32
    %c7_i32_111 = arith.constant 7 : i32
    %204 = arith.subi %c7_i32_111, %203 : i32
    %205 = arith.muli %arg0, %204 : i32
    %206 = arith.addi %c6_i32, %205 : i32
    %c0_112 = arith.constant 0 : index
    %207 = arith.index_cast %206 : i32 to index
    %c0_113 = arith.constant 0 : index
    %c0_114 = arith.constant 0 : index
    %208 = vector.load %arg2[%c0_112, %207, %c0_113, %c0_114] : memref<1x8x8x128xf32, #tpu.memory_space<vmem>>, vector<1x1x8x128xf32>
    %209 = vector.shape_cast %208 : vector<1x1x8x128xf32> to vector<8x128xf32>
    %c0_115 = arith.constant 0 : index
    %c0_116 = arith.constant 0 : index
    %210 = vector.load %arg6[%c0_115, %c0_116] : memref<8x32xf32, #tpu.memory_space<vmem>>, vector<8x32xf32>
    %211 = arith.truncf %210 : vector<8x32xf32> to vector<8x32xbf16>
    %cst_117 = arith.constant dense<0.000000e+00> : vector<8x128xf32>
    %212 = tpu.matmul %211, %4, %cst_117 {dimension_numbers = #tpu.dot_dimension_numbers<[1], [0], [0], [1], [0, 0, 1, 1], [], []>} : vector<8x32xbf16>, vector<32x128xbf16>, vector<8x128xf32> -> vector<8x128xf32>
    %213 = arith.addf %209, %212 : vector<8x128xf32>
    %214 = arith.negf %213 : vector<8x128xf32>
    %215 = math.exp %214 : vector<8x128xf32>
    %cst_118 = arith.constant 1.000000e+00 : f32
    %216 = vector.broadcast %cst_118 : f32 to vector<8x128xf32>
    %217 = arith.addf %216, %215 : vector<8x128xf32>
    %218 = arith.divf %216, %217 : vector<8x128xf32>
    %219 = math.tanh %213 : vector<8x128xf32>
    %220 = vector.extract_strided_slice %218 {offsets = [0, 0], sizes = [8, 32], strides = [1, 1]} : vector<8x128xf32> to vector<8x32xf32>
    %221 = vector.extract_strided_slice %218 {offsets = [0, 32], sizes = [8, 32], strides = [1, 1]} : vector<8x128xf32> to vector<8x32xf32>
    %222 = vector.extract_strided_slice %219 {offsets = [0, 64], sizes = [8, 32], strides = [1, 1]} : vector<8x128xf32> to vector<8x32xf32>
    %223 = vector.extract_strided_slice %218 {offsets = [0, 96], sizes = [8, 32], strides = [1, 1]} : vector<8x128xf32> to vector<8x32xf32>
    %c0_119 = arith.constant 0 : index
    %c0_120 = arith.constant 0 : index
    %224 = vector.load %arg7[%c0_119, %c0_120] : memref<8x32xf32, #tpu.memory_space<vmem>>, vector<8x32xf32>
    %225 = arith.mulf %221, %224 : vector<8x32xf32>
    %226 = arith.mulf %220, %222 : vector<8x32xf32>
    %227 = arith.addf %225, %226 : vector<8x32xf32>
    %228 = math.tanh %227 : vector<8x32xf32>
    %229 = arith.mulf %223, %228 : vector<8x32xf32>
    %c0_121 = arith.constant 0 : index
    %c0_122 = arith.constant 0 : index
    %230 = vector.load %arg7[%c0_121, %c0_122] : memref<8x32xf32, #tpu.memory_space<vmem>>, vector<8x32xf32>
    tpu.vector_store %arg7[%c0_121, %c0_122], %227 {strides = array<i32>} : memref<8x32xf32, #tpu.memory_space<vmem>>, vector<8x32xf32>,
    %c0_123 = arith.constant 0 : index
    %c0_124 = arith.constant 0 : index
    %231 = vector.load %arg6[%c0_123, %c0_124] : memref<8x32xf32, #tpu.memory_space<vmem>>, vector<8x32xf32>
    tpu.vector_store %arg6[%c0_123, %c0_124], %229 {strides = array<i32>} : memref<8x32xf32, #tpu.memory_space<vmem>>, vector<8x32xf32>,
    %c0_125 = arith.constant 0 : index
    %232 = arith.index_cast %206 : i32 to index
    %c0_126 = arith.constant 0 : index
    %c0_127 = arith.constant 0 : index
    %233 = vector.load %arg4[%c0_125, %232, %c0_126, %c0_127] : memref<1x8x8x32xf32, #tpu.memory_space<vmem>>, vector<1x1x8x32xf32>
    %234 = vector.shape_cast %233 : vector<1x1x8x32xf32> to vector<8x32xf32>
    %235 = vector.shape_cast %229 : vector<8x32xf32> to vector<1x1x8x32xf32>
    tpu.vector_store %arg4[%c0_125, %232, %c0_126, %c0_127], %235 {strides = array<i32>} : memref<1x8x8x32xf32, #tpu.memory_space<vmem>>, vector<1x1x8x32xf32>,
    %c7_i32_128 = arith.constant 7 : i32
    %c2_i32_129 = arith.constant 2 : i32
    %236 = arith.muli %c2_i32_129, %c7_i32_128 : i32
    %c7_i32_130 = arith.constant 7 : i32
    %237 = arith.subi %c7_i32_130, %236 : i32
    %238 = arith.muli %arg0, %237 : i32
    %239 = arith.addi %c7_i32_128, %238 : i32
    %c0_131 = arith.constant 0 : index
    %240 = arith.index_cast %239 : i32 to index
    %c0_132 = arith.constant 0 : index
    %c0_133 = arith.constant 0 : index
    %241 = vector.load %arg2[%c0_131, %240, %c0_132, %c0_133] : memref<1x8x8x128xf32, #tpu.memory_space<vmem>>, vector<1x1x8x128xf32>
    %242 = vector.shape_cast %241 : vector<1x1x8x128xf32> to vector<8x128xf32>
    %c0_134 = arith.constant 0 : index
    %c0_135 = arith.constant 0 : index
    %243 = vector.load %arg6[%c0_134, %c0_135] : memref<8x32xf32, #tpu.memory_space<vmem>>, vector<8x32xf32>
    %244 = arith.truncf %243 : vector<8x32xf32> to vector<8x32xbf16>
    %cst_136 = arith.constant dense<0.000000e+00> : vector<8x128xf32>
    %245 = tpu.matmul %244, %4, %cst_136 {dimension_numbers = #tpu.dot_dimension_numbers<[1], [0], [0], [1], [0, 0, 1, 1], [], []>} : vector<8x32xbf16>, vector<32x128xbf16>, vector<8x128xf32> -> vector<8x128xf32>
    %246 = arith.addf %242, %245 : vector<8x128xf32>
    %247 = arith.negf %246 : vector<8x128xf32>
    %248 = math.exp %247 : vector<8x128xf32>
    %cst_137 = arith.constant 1.000000e+00 : f32
    %249 = vector.broadcast %cst_137 : f32 to vector<8x128xf32>
    %250 = arith.addf %249, %248 : vector<8x128xf32>
    %251 = arith.divf %249, %250 : vector<8x128xf32>
    %252 = math.tanh %246 : vector<8x128xf32>
    %253 = vector.extract_strided_slice %251 {offsets = [0, 0], sizes = [8, 32], strides = [1, 1]} : vector<8x128xf32> to vector<8x32xf32>
    %254 = vector.extract_strided_slice %251 {offsets = [0, 32], sizes = [8, 32], strides = [1, 1]} : vector<8x128xf32> to vector<8x32xf32>
    %255 = vector.extract_strided_slice %252 {offsets = [0, 64], sizes = [8, 32], strides = [1, 1]} : vector<8x128xf32> to vector<8x32xf32>
    %256 = vector.extract_strided_slice %251 {offsets = [0, 96], sizes = [8, 32], strides = [1, 1]} : vector<8x128xf32> to vector<8x32xf32>
    %c0_138 = arith.constant 0 : index
    %c0_139 = arith.constant 0 : index
    %257 = vector.load %arg7[%c0_138, %c0_139] : memref<8x32xf32, #tpu.memory_space<vmem>>, vector<8x32xf32>
    %258 = arith.mulf %254, %257 : vector<8x32xf32>
    %259 = arith.mulf %253, %255 : vector<8x32xf32>
    %260 = arith.addf %258, %259 : vector<8x32xf32>
    %261 = math.tanh %260 : vector<8x32xf32>
    %262 = arith.mulf %256, %261 : vector<8x32xf32>
    %c0_140 = arith.constant 0 : index
    %c0_141 = arith.constant 0 : index
    %263 = vector.load %arg7[%c0_140, %c0_141] : memref<8x32xf32, #tpu.memory_space<vmem>>, vector<8x32xf32>
    tpu.vector_store %arg7[%c0_140, %c0_141], %260 {strides = array<i32>} : memref<8x32xf32, #tpu.memory_space<vmem>>, vector<8x32xf32>,
    %c0_142 = arith.constant 0 : index
    %c0_143 = arith.constant 0 : index
    %264 = vector.load %arg6[%c0_142, %c0_143] : memref<8x32xf32, #tpu.memory_space<vmem>>, vector<8x32xf32>
    tpu.vector_store %arg6[%c0_142, %c0_143], %262 {strides = array<i32>} : memref<8x32xf32, #tpu.memory_space<vmem>>, vector<8x32xf32>,
    %c0_144 = arith.constant 0 : index
    %265 = arith.index_cast %239 : i32 to index
    %c0_145 = arith.constant 0 : index
    %c0_146 = arith.constant 0 : index
    %266 = vector.load %arg4[%c0_144, %265, %c0_145, %c0_146] : memref<1x8x8x32xf32, #tpu.memory_space<vmem>>, vector<1x1x8x32xf32>
    %267 = vector.shape_cast %266 : vector<1x1x8x32xf32> to vector<8x32xf32>
    %268 = vector.shape_cast %262 : vector<8x32xf32> to vector<1x1x8x32xf32>
    tpu.vector_store %arg4[%c0_144, %265, %c0_145, %c0_146], %268 {strides = array<i32>} : memref<1x8x8x32xf32, #tpu.memory_space<vmem>>, vector<1x1x8x32xf32>,
    %c8_i32 = arith.constant 8 : i32
    %c0_i32_147 = arith.constant 0 : i32
    %269 = arith.cmpi eq, %arg1, %c0_i32_147 : i32
    %270 = arith.extui %269 : i1 to i32
    %c0_i32_148 = arith.constant 0 : i32
    %271 = arith.cmpi ne, %270, %c0_i32_148 : i32
    scf.if %271 {
      %c0_149 = arith.constant 0 : index
      %c0_150 = arith.constant 0 : index
      %272 = vector.load %arg6[%c0_149, %c0_150] : memref<8x32xf32, #tpu.memory_space<vmem>>, vector<8x32xf32>
      %c0_151 = arith.constant 0 : index
      %c0_152 = arith.constant 0 : index
      %c0_153 = arith.constant 0 : index
      %273 = vector.load %arg5[%c0_151, %c0_152, %c0_153] : memref<1x8x32xf32, #tpu.memory_space<vmem>>, vector<1x8x32xf32>
      %274 = vector.shape_cast %273 : vector<1x8x32xf32> to vector<8x32xf32>
      %275 = vector.shape_cast %272 : vector<8x32xf32> to vector<1x8x32xf32>
      tpu.vector_store %arg5[%c0_151, %c0_152, %c0_153], %275 {strides = array<i32>} : memref<1x8x32xf32, #tpu.memory_space<vmem>>, vector<1x8x32xf32>,
    } else {
    }
    return
  }
  func.func @transform_0(%arg0: i32, %arg1: i32) -> (i32, i32, i32, i32) {
    %c2_i32 = arith.constant 2 : i32
    %0 = arith.muli %c2_i32, %arg1 : i32
    %c0_i32 = arith.constant 0 : i32
    %1 = arith.subi %c0_i32, %0 : i32
    %2 = arith.muli %arg0, %1 : i32
    %3 = arith.addi %arg1, %2 : i32
    %c0_i32_0 = arith.constant 0 : i32
    %c0_i32_1 = arith.constant 0 : i32
    %c0_i32_2 = arith.constant 0 : i32
    return %arg0, %3, %c0_i32_0, %c0_i32_1 : i32, i32, i32, i32
  }
  func.func @transform_1(%arg0: i32, %arg1: i32) -> (i32, i32, i32) {
    %c0_i32 = arith.constant 0 : i32
    %c0_i32_0 = arith.constant 0 : i32
    %c0_i32_1 = arith.constant 0 : i32
    return %arg0, %c0_i32, %c0_i32_0 : i32, i32, i32
  }
  func.func @transform_2(%arg0: i32, %arg1: i32) -> (i32, i32, i32, i32) {
    %c2_i32 = arith.constant 2 : i32
    %0 = arith.muli %c2_i32, %arg1 : i32
    %c0_i32 = arith.constant 0 : i32
    %1 = arith.subi %c0_i32, %0 : i32
    %2 = arith.muli %arg0, %1 : i32
    %3 = arith.addi %arg1, %2 : i32
    %c0_i32_0 = arith.constant 0 : i32
    %c0_i32_1 = arith.constant 0 : i32
    %c0_i32_2 = arith.constant 0 : i32
    return %arg0, %3, %c0_i32_0, %c0_i32_1 : i32, i32, i32, i32
  }
  func.func @transform_3(%arg0: i32, %arg1: i32) -> (i32, i32, i32) {
    %c0_i32 = arith.constant 0 : i32
    %c0_i32_0 = arith.constant 0 : i32
    %c0_i32_1 = arith.constant 0 : i32
    return %arg0, %c0_i32, %c0_i32_0 : i32, i32, i32
  }
}

module attributes {stable_mosaic.version = 11 : i64} {
  func.func @_linear_kernel(%arg0: memref<2x64xbf16, #tpu.memory_space<vmem>>, %arg1: memref<64x16xbf16, #tpu.memory_space<vmem>>, %arg2: memref<1x16xf32, #tpu.memory_space<vmem>>, %arg3: memref<2x16xf32, #tpu.memory_space<vmem>>) attributes {dimension_semantics = [], scalar_prefetch = 0 : i64, scratch_operands = 0 : i64, tpu.core_type = #tpu.core_type<tc>} {
    %c0 = arith.constant 0 : index
    %c0_0 = arith.constant 0 : index
    %0 = vector.load %arg0[%c0, %c0_0] : memref<2x64xbf16, #tpu.memory_space<vmem>>, vector<2x64xbf16>
    %c0_1 = arith.constant 0 : index
    %c0_2 = arith.constant 0 : index
    %1 = vector.load %arg1[%c0_1, %c0_2] : memref<64x16xbf16, #tpu.memory_space<vmem>>, vector<64x16xbf16>
    %cst = arith.constant dense<0.000000e+00> : vector<2x16xf32>
    %2 = tpu.matmul %0, %1, %cst {dimension_numbers = #tpu.dot_dimension_numbers<[1], [0], [0], [1], [0, 0, 1, 1], [], []>} : vector<2x64xbf16>, vector<64x16xbf16>, vector<2x16xf32> -> vector<2x16xf32>
    %c0_3 = arith.constant 0 : index
    %c0_4 = arith.constant 0 : index
    %3 = vector.load %arg2[%c0_3, %c0_4] : memref<1x16xf32, #tpu.memory_space<vmem>>, vector<1x16xf32>
    %4 = vector.broadcast %3 : vector<1x16xf32> to vector<2x16xf32>
    %5 = arith.addf %2, %4 : vector<2x16xf32>
    %c0_5 = arith.constant 0 : index
    %c0_6 = arith.constant 0 : index
    %6 = vector.load %arg3[%c0_5, %c0_6] : memref<2x16xf32, #tpu.memory_space<vmem>>, vector<2x16xf32>
    tpu.vector_store %arg3[%c0_5, %c0_6], %5 {strides = array<i32>} : memref<2x16xf32, #tpu.memory_space<vmem>>, vector<2x16xf32>,
    return
  }
}

</mosaic_0001>

<bundles_post_ra>
// kernel: _lambda_.7
= control target key start
LH: loop header
LB: loop body
LE: loop exit
PB: predicated region body
PF: predicated region fallthrough
CT: control target
= control target key end

     0   :  { %s624_s12 = smov 0   ;;  %s626_s13 = smov 0   ;;  %s681_s0 = inlined_call_operand.vmem [shape: bf16[8,8,64], index: 0, kind: input, shape index: {}]   ;;  %s682_s1 = inlined_call_operand.vmem [shape: bf16[2,64,128], index: 1, kind: input, shape index: {}]   ;;  %s683_s2 = inlined_call_operand.vmem [shape: f32[2,1,128], index: 2, kind: input, shape index: {}]   ;;  %s684_s3 = inlined_call_operand.vmem [shape: f32[2,8,8,128], index: 3, kind: output, shape index: {}]  }
   0x1   :  { %s628_s14 = smov 0  }
   0x2 LB: > { %s25_s15 = sadd.s32 1, %s598_s13  ;;  %p494_p0 = scmp.ge.s32.totalorder %s602_s14, 1  ;;  %s602_s14 = sphi %s628_s14, %s13_s14   ;;  %s598_s13 = sphi %s626_s13, %s686_s13   ;;  %s594_s12 = sphi %s624_s12, %s685_s12  }
   0x3   : > { %p27_p1 = scmp.ge.s32.totalorder %s25_s15, 2  ;;  %p170_p2 = scmp.lt.s32.totalorder %s602_s14, 3 }
   0x5   : > { %s688_s15 = smov (%p27_p1, %s25_s15), 0  ;;  %p171_p3 = pnand %p494_p0, %p170_p2 }
   0x6   : > { %p212_p4 = scmp.lt.s32.totalorder (!%p171_p3), %s594_s12, 1  ;;  %v576_v0 = vld [vmem:[%s681_s0] sm:$0xff] (!%p171_p3)   ;;  %vm298_vm0 = vcmask (!%p171_p3), 523264   ;;  %v577_v1 = vld [vmem:[%s681_s0 + $0x10] sm:$0xff] (!%p171_p3)   ;;  %v578_v6 = vld [vmem:[%s681_s0 + $0x8] sm:$0xff] (!%p171_p3)  }
   0x7   : > { %174 = sbr.rel (%p171_p3) target bundleno = 252 (0xfc), region = 32  ;;  %532 = vmatprep.mubr.msk.bf16.mxu0 (!%p171_p3), %vm298_vm0, %v576_v0  ;;  %536 = vmatprep.mubr.msk.bf16.mxu1 (!%p171_p3), %vm298_vm0, %v577_v1  ;;  %v579_v7 = vld [vmem:[%s681_s0 + $0x18] sm:$0xff] (!%p171_p3)  }
   0xe   : > { %s690_s12 = smov (!%p212_p4, %s594_s12), 1 }
   0xf   : > { %s514_s20 = sshll.u32 %s690_s12, 5  ;;  %s219_s30 = scalar_lea.vmem %s683_s2, %s690_s12 }
  0x10   : > { %s216_s23 = scalar_lea.vmem %s682_s1, %s514_s20  ;;  %s515_s4 = sshll.u32 %s690_s12, 6  ;;  %v499_v8 = vld [vmem:[%s219_s30] ss:$0 sm:$0xff] }
  0x11   : > { %v572_v2 = vld [vmem:[%s216_s23] sm:$0xff]   ;;  %v573_v3 = vld [vmem:[%s216_s23 + $0x8] sm:$0xff]   ;;  %v574_v4 = vld [vmem:[%s216_s23 + $0x10] sm:$0xff]   ;;  %s228_s7 = scalar_lea.vmem %s684_s3, %s515_s4 }
  0x12   : > { %524 = vmatprep.subr.bf16.mxu0 %v572_v2  ;;  %540 = vmatprep.subr.bf16.mxu1 %v572_v2  ;;  %v575_v5 = vld [vmem:[%s216_s23 + $0x18] sm:$0xff]  }
  0x13   : > { %525 = vmatpush3.bf16.msra.mxu0 %v572_v2  ;;  %544 = vmatpush3.bf16.msra.mxu1 %v572_v2 }
  0x14   : > { %526 = vmatprep.subr.bf16.mxu0 %v573_v3  ;;  %541 = vmatprep.subr.bf16.mxu1 %v573_v3 }
  0x17   : > { %527 = vmatpush3.bf16.msra.mxu0 %v573_v3  ;;  %545 = vmatpush3.bf16.msra.mxu1 %v573_v3 }
  0x18   : > { %528 = vmatprep.subr.bf16.mxu0 %v574_v4  ;;  %542 = vmatprep.subr.bf16.mxu1 %v574_v4 }
  0x1b   : > { %529 = vmatpush3.bf16.msra.mxu0 %v574_v4  ;;  %546 = vmatpush3.bf16.msra.mxu1 %v574_v4 }
  0x1c   : > { %530 = vmatprep.subr.bf16.mxu0 %v575_v5  ;;  %543 = vmatprep.subr.bf16.mxu1 %v575_v5 }
  0x1f   : > { %531 = vmatpush3.bf16.msra.mxu0 %v575_v5  ;;  %547 = vmatpush3.bf16.msra.mxu1 %v575_v5 }
  0x22   : > { %533 = vmatmul.mubr.msk.bf16.vlgmr.msra.gmra.mrb[0].mxu0 %vm298_vm0, %v578_v6  ;;  %537 = vmatmul.mubr.msk.bf16.vlgmr.msra.gmra.mrb[0].mxu1 %vm298_vm0, %v579_v7 }
  0xf5   : > { %v534_v9 = vpop.f32.mrb[0].mxu0  ;;  %v538_v10 = vpop.f32.mrb[0].mxu1 }
  0xf6   : > { %v354_v11 = vadd.f32 %v534_v9, %v499_v8  ;;  %v370_v12 = vadd.f32 %v538_v10, %v499_v8  ;;  %v345_v13 = vpop.f32.mrb[1].mxu0  ;;  %v361_v14 = vpop.f32.mrb[1].mxu1 }
  0xf7   : > { %v346_v15 = vadd.f32 %v499_v8, %v345_v13  ;;  %v362_v16 = vadd.f32 %v499_v8, %v361_v14  ;;  %v535_v17 = vpop.f32.mrb[2].mxu0  ;;  %v539_v18 = vpop.f32.mrb[2].mxu1 }
  0xf8   : > { %378 = vst [vmem:[%s228_s7 + $0x10] sm:$0xff] %v354_v11  ;;  %382 = vst [vmem:[%s228_s7 + $0x30] sm:$0xff] %v370_v12  ;;  %v357_v19 = vadd.f32 %v535_v17, %v499_v8  ;;  %v373_v20 = vadd.f32 %v539_v18, %v499_v8  ;;  %v348_v21 = vpop.f32.mrb[3].mxu0  ;;  %v364_v22 = vpop.f32.mrb[3].mxu1 }
  0xf9   : > { %376 = vst [vmem:[%s228_s7] sm:$0xff] %v346_v15  ;;  %380 = vst [vmem:[%s228_s7 + $0x20] sm:$0xff] %v362_v16  ;;  %v349_v23 = vadd.f32 %v499_v8, %v348_v21  ;;  %v365_v24 = vadd.f32 %v499_v8, %v364_v22 }
  0xfa   : > { %379 = vst [vmem:[%s228_s7 + $0x18] sm:$0xff] %v357_v19  ;;  %383 = vst [vmem:[%s228_s7 + $0x38] sm:$0xff] %v373_v20 }
  0xfb   : > { %377 = vst [vmem:[%s228_s7 + $0x8] sm:$0xff] %v349_v23  ;;  %381 = vst [vmem:[%s228_s7 + $0x28] sm:$0xff] %v365_v24 }
  0xfc PF: > { %s13_s14 = sadd.s32 1, %s602_s14   ;;  %s685_s12 = smov %s598_s13 }
  0xfd   : > { %p10_p5 = scmp.ge.s32.totalorder %s13_s14, 4   ;;  %s686_s13 = smov %s688_s15 }
  0xff   :  { %12 = sbr.rel (!%p10_p5) target bundleno = 2 (0x2), region = 68 }

// kernel: _lambda_.5
= control target key start
LH: loop header
LB: loop body
LE: loop exit
PB: predicated region body
PF: predicated region fallthrough
CT: control target
= control target key end

     0   :  { %s1451_s12 = smov 0   ;;  %s1453_s13 = smov 0   ;;  %s1633_s0 = inlined_call_operand.vmem [shape: bf16[8,8,768], index: 0, kind: input, shape index: {}]   ;;  %s1634_s1 = inlined_call_operand.vmem [shape: bf16[2,768,128], index: 1, kind: input, shape index: {}]   ;;  %s1635_s2 = inlined_call_operand.vmem [shape: f32[2,1,128], index: 2, kind: input, shape index: {}]   ;;  %s1636_s3 = inlined_call_operand.vmem [shape: f32[2,8,8,128], index: 3, kind: output, shape index: {}]  }
   0x1   :  { %s1455_s14 = smov 0  }
   0x2 LB: > { %s25_s15 = sadd.s32 1, %s1425_s13  ;;  %p1082_p0 = scmp.ge.s32.totalorder %s1429_s14, 1  ;;  %s1429_s14 = sphi %s1455_s14, %s13_s14   ;;  %s1425_s13 = sphi %s1453_s13, %s1638_s13   ;;  %s1421_s12 = sphi %s1451_s12, %s1637_s12  }
   0x3   : > { %p27_p1 = scmp.ge.s32.totalorder %s25_s15, 2  ;;  %p171_p2 = scmp.lt.s32.totalorder %s1429_s14, 3 }
   0x5   : > { %s1640_s15 = smov (%p27_p1, %s25_s15), 0  ;;  %p172_p3 = pnand %p1082_p0, %p171_p2 }
   0x6   : > { %p215_p4 = scmp.lt.s32.totalorder (!%p172_p3), %s1421_s12, 1  ;;  %v1357_v0 = vld [vmem:[%s1633_s0 + $0x4] ss:$24 sps:$4 sm:$0xff] (!%p172_p3)   ;;  %v1355_v32 = vld [vmem:[%s1633_s0] ss:$24 sps:$4 sm:$0xff] (!%p172_p3)  }
   0x7   : > { %175 = sbr.rel (%p172_p3) target bundleno = 313 (0x139), region = 32  ;;  %v1360_v1 = vld [vmem:[%s1633_s0 + $0xc] ss:$24 sps:$4 sm:$0xff] (!%p172_p3)   ;;  %801 = vmatprep.mubr.bf16.mxu0 (!%p172_p3), %v1357_v0  ;;  %v1358_v34 = vld [vmem:[%s1633_s0 + $0x8] ss:$24 sps:$4 sm:$0xff] (!%p172_p3)  }
   0x8   : > { %866 = vmatprep.mubr.bf16.mxu1 (!%p172_p3), %v1360_v1  ;;  %v1365_v37 = vld [vmem:[%s1633_s0 + $0x34] ss:$24 sps:$4 sm:$0xff] (!%p172_p3)   ;;  %v1369_v43 = vld [vmem:[%s1633_s0 + $0x30] ss:$24 sps:$4 sm:$0xff] (!%p172_p3)   ;;  %v1375_v47 = vld [vmem:[%s1633_s0 + $0x64] ss:$24 sps:$4 sm:$0xff] (!%p172_p3)  }
   0x9   : > { %v1367_v40 = vld [vmem:[%s1633_s0 + $0x3c] ss:$24 sps:$4 sm:$0xff] (!%p172_p3)   ;;  %v1370_v44 = vld [vmem:[%s1633_s0 + $0x38] ss:$24 sps:$4 sm:$0xff] (!%p172_p3)   ;;  %v1377_v48 = vld [vmem:[%s1633_s0 + $0x6c] ss:$24 sps:$4 sm:$0xff] (!%p172_p3)  }
   0xa   : > { %v1379_v51 = vld [vmem:[%s1633_s0 + $0x60] ss:$24 sps:$4 sm:$0xff] (!%p172_p3)   ;;  %v1385_v55 = vld [vmem:[%s1633_s0 + $0x94] ss:$24 sps:$4 sm:$0xff] (!%p172_p3)   ;;  %v1389_v59 = vld [vmem:[%s1633_s0 + $0x90] ss:$24 sps:$4 sm:$0xff] (!%p172_p3)  }
   0xb   : > { %v1380_v52 = vld [vmem:[%s1633_s0 + $0x68] ss:$24 sps:$4 sm:$0xff] (!%p172_p3)   ;;  %v1387_v56 = vld [vmem:[%s1633_s0 + $0x9c] ss:$24 sps:$4 sm:$0xff] (!%p172_p3)   ;;  %v1390_v60 = vld [vmem:[%s1633_s0 + $0x98] ss:$24 sps:$4 sm:$0xff] (!%p172_p3)  }
   0xc   : > { %v1397_v63 = vld [vmem:[%s1633_s0 + $0x14] ss:$24 sps:$4 sm:$0xff] (!%p172_p3)  }
   0xd   : > { %v1400_v0 = vld [vmem:[%s1633_s0 + $0x74] ss:$24 sps:$4 sm:$0xff] (!%p172_p3)  }
   0xe   : > { %s1642_s12 = smov (!%p215_p4, %s1421_s12), 1 }
   0xf   : > { %s1298_s20 = smul.u32 384, %s1642_s12  ;;  %s222_s25 = scalar_lea.vmem %s1635_s2, %s1642_s12 }
  0x10   : > { %s1161_s26 = sshll.u32 %s1642_s12, 6 }
  0x11   : > { %s1481_s23 = scalar_lea.vmem %s1634_s1, %s1298_s20  ;;  %s1611_s29 = scalar_lea.vmem %s1636_s3, %s1161_s26 }
  0x12   : > { %v1323_v2 = vld [vmem:[%s1481_s23 + $0x40] sm:$0xff]   ;;  %v1327_v6 = vld [vmem:[%s1481_s23 + $0x48] sm:$0xff]   ;;  %v1331_v10 = vld [vmem:[%s1481_s23 + $0x50] sm:$0xff]  }
  0x13   : > { %v1324_v3 = vld [vmem:[%s1481_s23 + $0xc0] sm:$0xff]   ;;  %1162 = vmatprep.subr.bf16.mxu0 %v1323_v2  ;;  %v1328_v7 = vld [vmem:[%s1481_s23 + $0xc8] sm:$0xff]   ;;  %v1332_v11 = vld [vmem:[%s1481_s23 + $0xd0] sm:$0xff]  }
  0x14   : > { %v1325_v4 = vld [vmem:[%s1481_s23] sm:$0xff]   ;;  %1202 = vmatprep.subr.bf16.mxu1 %v1324_v3  ;;  %v1329_v8 = vld [vmem:[%s1481_s23 + $0x8] sm:$0xff]   ;;  %v1333_v12 = vld [vmem:[%s1481_s23 + $0x10] sm:$0xff]  }
  0x15   : > { %v1326_v5 = vld [vmem:[%s1481_s23 + $0x80] sm:$0xff]   ;;  %1163 = vmatpush3.bf16.msra.mxu0 %v1325_v4  ;;  %v1330_v9 = vld [vmem:[%s1481_s23 + $0x88] sm:$0xff]   ;;  %v1334_v13 = vld [vmem:[%s1481_s23 + $0x90] sm:$0xff]  }
  0x16   : > { %1203 = vmatpush3.bf16.msra.mxu1 %v1326_v5  ;;  %1164 = vmatprep.subr.bf16.mxu0 %v1327_v6  ;;  %v1335_v14 = vld [vmem:[%s1481_s23 + $0x58] sm:$0xff]   ;;  %v1339_v18 = vld [vmem:[%s1481_s23 + $0x60] sm:$0xff]   ;;  %v1343_v22 = vld [vmem:[%s1481_s23 + $0x68] sm:$0xff]  }
  0x17   : > { %1204 = vmatprep.subr.bf16.mxu1 %v1328_v7  ;;  %v1336_v15 = vld [vmem:[%s1481_s23 + $0xd8] sm:$0xff]   ;;  %v1340_v19 = vld [vmem:[%s1481_s23 + $0xe0] sm:$0xff]   ;;  %v1344_v23 = vld [vmem:[%s1481_s23 + $0xe8] sm:$0xff]  }
  0x18   : > { %v1337_v16 = vld [vmem:[%s1481_s23 + $0x18] sm:$0xff]   ;;  %v1341_v20 = vld [vmem:[%s1481_s23 + $0x20] sm:$0xff]   ;;  %v1345_v24 = vld [vmem:[%s1481_s23 + $0x28] sm:$0xff]  }
  0x19   : > { %1165 = vmatpush3.bf16.msra.mxu0 %v1329_v8  ;;  %v1338_v17 = vld [vmem:[%s1481_s23 + $0x98] sm:$0xff]   ;;  %v1342_v21 = vld [vmem:[%s1481_s23 + $0xa0] sm:$0xff]   ;;  %v1346_v25 = vld [vmem:[%s1481_s23 + $0xa8] sm:$0xff]  }
  0x1a   : > { %1205 = vmatpush3.bf16.msra.mxu1 %v1330_v9  ;;  %1166 = vmatprep.subr.bf16.mxu0 %v1331_v10  ;;  %v1347_v26 = vld [vmem:[%s1481_s23 + $0x70] sm:$0xff]   ;;  %v1351_v30 = vld [vmem:[%s1481_s23 + $0x78] sm:$0xff]   ;;  %v1361_v36 = vld [vmem:[%s1481_s23 + $0x140] sm:$0xff]  }
  0x1b   : > { %1206 = vmatprep.subr.bf16.mxu1 %v1332_v11  ;;  %v1348_v27 = vld [vmem:[%s1481_s23 + $0xf0] sm:$0xff]   ;;  %v1352_v31 = vld [vmem:[%s1481_s23 + $0xf8] sm:$0xff]   ;;  %v1362_v38 = vld [vmem:[%s1481_s23 + $0x100] sm:$0xff]  }
  0x1c   : > { %v1349_v28 = vld [vmem:[%s1481_s23 + $0x30] sm:$0xff]   ;;  %v1353_v33 = vld [vmem:[%s1481_s23 + $0x38] sm:$0xff]   ;;  %v1363_v39 = vld [vmem:[%s1481_s23 + $0x148] sm:$0xff]  }
  0x1d   : > { %1167 = vmatpush3.bf16.msra.mxu0 %v1333_v12  ;;  %v1350_v29 = vld [vmem:[%s1481_s23 + $0xb0] sm:$0xff]   ;;  %v1354_v35 = vld [vmem:[%s1481_s23 + $0xb8] sm:$0xff]   ;;  %v1364_v41 = vld [vmem:[%s1481_s23 + $0x108] sm:$0xff]  }
  0x1e   : > { %1207 = vmatpush3.bf16.msra.mxu1 %v1334_v13  ;;  %1168 = vmatprep.subr.bf16.mxu0 %v1335_v14  ;;  %v1371_v42 = vld [vmem:[%s1481_s23 + $0x150] sm:$0xff]   ;;  %v1373_v46 = vld [vmem:[%s1481_s23 + $0x158] sm:$0xff]   ;;  %v1381_v50 = vld [vmem:[%s1481_s23 + $0x160] sm:$0xff]  }
  0x1f   : > { %1208 = vmatprep.subr.bf16.mxu1 %v1336_v15  ;;  %v1372_v45 = vld [vmem:[%s1481_s23 + $0x110] sm:$0xff]   ;;  %v1374_v49 = vld [vmem:[%s1481_s23 + $0x118] sm:$0xff]   ;;  %v1382_v53 = vld [vmem:[%s1481_s23 + $0x120] sm:$0xff]  }
  0x20   : > { %v1383_v54 = vld [vmem:[%s1481_s23 + $0x168] sm:$0xff]   ;;  %v1391_v58 = vld [vmem:[%s1481_s23 + $0x170] sm:$0xff]   ;;  %v1393_v62 = vld [vmem:[%s1481_s23 + $0x178] sm:$0xff]  }
  0x21   : > { %1169 = vmatpush3.bf16.msra.mxu0 %v1337_v16  ;;  %v1384_v57 = vld [vmem:[%s1481_s23 + $0x128] sm:$0xff]   ;;  %v1392_v61 = vld [vmem:[%s1481_s23 + $0x130] sm:$0xff]   ;;  %v1394_v1 = vld [vmem:[%s1481_s23 + $0x138] sm:$0xff]  }
  0x22   : > { %1209 = vmatpush3.bf16.msra.mxu1 %v1338_v17  ;;  %1170 = vmatprep.subr.bf16.mxu0 %v1339_v18  ;;  %v1395_v2 = vld [vmem:[%s1633_s0 + $0x10] ss:$24 sps:$4 sm:$0xff]   ;;  %v1401_v4 = vld [vmem:[%s1633_s0 + $0x44] ss:$24 sps:$4 sm:$0xff]   ;;  %v1405_v6 = vld [vmem:[%s1633_s0 + $0x40] ss:$24 sps:$4 sm:$0xff]  }
  0x23   : > { %1210 = vmatprep.subr.bf16.mxu1 %v1340_v19  ;;  %v1398_v3 = vld [vmem:[%s1633_s0 + $0x70] ss:$24 sps:$4 sm:$0xff]   ;;  %v1403_v5 = vld [vmem:[%s1633_s0 + $0xa4] ss:$24 sps:$4 sm:$0xff]   ;;  %v1406_v7 = vld [vmem:[%s1633_s0 + $0xa0] ss:$24 sps:$4 sm:$0xff]  }
  0x24   : > { %v1086_v10 = vld [vmem:[%s222_s25] ss:$0 sm:$0xff] }
  0x25   : > { %1171 = vmatpush3.bf16.msra.mxu0 %v1341_v20 }
  0x26   : > { %1211 = vmatpush3.bf16.msra.mxu1 %v1342_v21  ;;  %1172 = vmatprep.subr.bf16.mxu0 %v1343_v22 }
  0x27   : > { %1212 = vmatprep.subr.bf16.mxu1 %v1344_v23 }
  0x29   : > { %1173 = vmatpush3.bf16.msra.mxu0 %v1345_v24 }
  0x2a   : > { %1213 = vmatpush3.bf16.msra.mxu1 %v1346_v25  ;;  %1174 = vmatprep.subr.bf16.mxu0 %v1347_v26 }
  0x2b   : > { %1214 = vmatprep.subr.bf16.mxu1 %v1348_v27 }
  0x2d   : > { %1175 = vmatpush3.bf16.msra.mxu0 %v1349_v28 }
  0x2e   : > { %1215 = vmatpush3.bf16.msra.mxu1 %v1350_v29  ;;  %1176 = vmatprep.subr.bf16.mxu0 %v1351_v30 }
  0x2f   : > { %1216 = vmatprep.subr.bf16.mxu1 %v1352_v31 }
  0x31   : > { %1177 = vmatpush3.bf16.msra.mxu0 %v1353_v33 }
  0x32   : > { %1217 = vmatpush3.bf16.msra.mxu1 %v1354_v35  ;;  %1242 = vmatprep.subr.bf16.mxu0 %v1361_v36 }
  0x33   : > { %1282 = vmatprep.subr.bf16.mxu1 %v1361_v36 }
  0x34   : > { %802 = vmatmul.mubr.bf16.vlgmr.msra.gmra.mrb[0].mxu0 %v1355_v32 }
  0x35   : > { %867 = vmatmul.mubr.bf16.vlgmr.msra.gmra.mrb[0].mxu1 %v1358_v34  ;;  %1243 = vmatpush3.bf16.msra.mxu0 %v1362_v38 }
  0x36   : > { %1290 = vmatpush3.bf16.msra.mxu1 %v1362_v38  ;;  %1244 = vmatprep.subr.bf16.mxu0 %v1363_v39 }
  0x37   : > { %1283 = vmatprep.subr.bf16.mxu1 %v1363_v39  ;;  %809 = vmatprep.mubr.bf16.mxu0 %v1365_v37 }
  0x38   : > { %874 = vmatprep.mubr.bf16.mxu1 %v1367_v40 }
  0x39   : > { %1245 = vmatpush3.bf16.msra.mxu0 %v1364_v41 }
  0x3a   : > { %1291 = vmatpush3.bf16.msra.mxu1 %v1364_v41  ;;  %1246 = vmatprep.subr.bf16.mxu0 %v1371_v42 }
  0x3b   : > { %1284 = vmatprep.subr.bf16.mxu1 %v1371_v42 }
  0x3c   : > { %810 = vmatmul.mubr.bf16.gmra.mrb[4].mxu0 %v1369_v43 }
  0x3d   : > { %875 = vmatmul.mubr.bf16.gmra.mrb[4].mxu1 %v1370_v44  ;;  %1247 = vmatpush3.bf16.msra.mxu0 %v1372_v45 }
  0x3e   : > { %1292 = vmatpush3.bf16.msra.mxu1 %v1372_v45  ;;  %1248 = vmatprep.subr.bf16.mxu0 %v1373_v46 }
  0x3f   : > { %1285 = vmatprep.subr.bf16.mxu1 %v1373_v46  ;;  %817 = vmatprep.mubr.bf16.mxu0 %v1375_v47 }
  0x40   : > { %882 = vmatprep.mubr.bf16.mxu1 %v1377_v48 }
  0x41   : > { %1249 = vmatpush3.bf16.msra.mxu0 %v1374_v49 }
  0x42   : > { %1293 = vmatpush3.bf16.msra.mxu1 %v1374_v49  ;;  %1250 = vmatprep.subr.bf16.mxu0 %v1381_v50 }
  0x43   : > { %1286 = vmatprep.subr.bf16.mxu1 %v1381_v50 }
  0x44   : > { %818 = vmatmul.mubr.bf16.gmra.mrb[8].mxu0 %v1379_v51 }
  0x45   : > { %883 = vmatmul.mubr.bf16.gmra.mrb[8].mxu1 %v1380_v52  ;;  %1251 = vmatpush3.bf16.msra.mxu0 %v1382_v53 }
  0x46   : > { %1294 = vmatpush3.bf16.msra.mxu1 %v1382_v53  ;;  %1252 = vmatprep.subr.bf16.mxu0 %v1383_v54 }
  0x47   : > { %1287 = vmatprep.subr.bf16.mxu1 %v1383_v54  ;;  %825 = vmatprep.mubr.bf16.mxu0 %v1385_v55 }
  0x48   : > { %890 = vmatprep.mubr.bf16.mxu1 %v1387_v56 }
  0x49   : > { %1253 = vmatpush3.bf16.msra.mxu0 %v1384_v57 }
  0x4a   : > { %1295 = vmatpush3.bf16.msra.mxu1 %v1384_v57  ;;  %1254 = vmatprep.subr.bf16.mxu0 %v1391_v58 }
  0x4b   : > { %1288 = vmatprep.subr.bf16.mxu1 %v1391_v58 }
  0x4c   : > { %826 = vmatmul.mubr.bf16.gmra.mrb[12].mxu0 %v1389_v59 }
  0x4d   : > { %891 = vmatmul.mubr.bf16.gmra.mrb[12].mxu1 %v1390_v60  ;;  %1255 = vmatpush3.bf16.msra.mxu0 %v1392_v61 }
  0x4e   : > { %1296 = vmatpush3.bf16.msra.mxu1 %v1392_v61  ;;  %1256 = vmatprep.subr.bf16.mxu0 %v1393_v62 }
  0x4f   : > { %1289 = vmatprep.subr.bf16.mxu1 %v1393_v62  ;;  %931 = vmatprep.mubr.bf16.mxu0 %v1397_v63 }
  0x50   : > { %947 = vmatprep.mubr.bf16.mxu1 %v1400_v0 }
  0x51   : > { %1257 = vmatpush3.bf16.msra.mxu0 %v1394_v1 }
  0x52   : > { %1297 = vmatpush3.bf16.msra.mxu1 %v1394_v1 }
  0x54   : > { %932 = vmatmul.mubr.bf16.vlgmr.msra.gmra.mrb[16].mxu0 %v1395_v2 }
  0x55   : > { %948 = vmatmul.mubr.bf16.vlgmr.msra.gmra.mrb[16].mxu1 %v1398_v3  ;;  %939 = vmatprep.mubr.bf16.mxu0 %v1401_v4 }
  0x56   : > { %955 = vmatprep.mubr.bf16.mxu1 %v1403_v5 }
  0x5c   : > { %940 = vmatmul.mubr.bf16.gmra.mrb[20].mxu0 %v1405_v6 }
  0x5d   : > { %956 = vmatmul.mubr.bf16.gmra.mrb[20].mxu1 %v1406_v7 }
 0x107   : > { %v1178_v8 = vpop.f32.mrb[0].mxu0 }
 0x108   : > { %v1218_v9 = vpop.f32.mrb[0].mxu1  ;;  %v1179_v11 = vpop.f32.mrb[1].mxu0 }
 0x109   : > { %v1180_v12 = vadd.f32 %v1179_v11, %v1178_v8  ;;  %v1219_v13 = vpop.f32.mrb[1].mxu1  ;;  %v1181_v14 = vpop.f32.mrb[2].mxu0 }
 0x10a   : > { %v1220_v15 = vadd.f32 %v1219_v13, %v1218_v9  ;;  %v1221_v16 = vpop.f32.mrb[2].mxu1  ;;  %v1182_v17 = vpop.f32.mrb[3].mxu0 }
 0x10b   : > { %v804_v18 = vadd.f32 %v1180_v12, %v1086_v10  ;;  %v1183_v19 = vadd.f32 %v1182_v17, %v1181_v14  ;;  %v1222_v20 = vpop.f32.mrb[3].mxu1 }
 0x10c   : > { %v1223_v21 = vadd.f32 %v1222_v20, %v1221_v16 }
 0x10d   : > { %v869_v22 = vadd.f32 %v1220_v15, %v804_v18  ;;  %v807_v23 = vadd.f32 %v1183_v19, %v1086_v10 }
 0x10f   : > { %v1601_v24 = vadd.f32 %v1223_v21, %v807_v23  ;;  %v1184_v25 = vpop.f32.mrb[4].mxu0 }
 0x110   : > { %v1224_v26 = vpop.f32.mrb[4].mxu1  ;;  %v1185_v27 = vpop.f32.mrb[5].mxu0 }
 0x111   : > { %v1186_v28 = vadd.f32 %v1185_v27, %v1184_v25  ;;  %v1225_v29 = vpop.f32.mrb[5].mxu1  ;;  %v1187_v30 = vpop.f32.mrb[6].mxu0 }
 0x112   : > { %v1226_v31 = vadd.f32 %v1225_v29, %v1224_v26  ;;  %v1227_v32 = vpop.f32.mrb[6].mxu1  ;;  %v1188_v33 = vpop.f32.mrb[7].mxu0 }
 0x113   : > { %v812_v34 = vadd.f32 %v1186_v28, %v1086_v10  ;;  %v1189_v35 = vadd.f32 %v1188_v33, %v1187_v30  ;;  %v1228_v36 = vpop.f32.mrb[7].mxu1 }
 0x114   : > { %v1229_v37 = vadd.f32 %v1228_v36, %v1227_v32 }
 0x115   : > { %v1603_v38 = vadd.f32 %v1226_v31, %v812_v34  ;;  %v815_v39 = vadd.f32 %v1189_v35, %v1086_v10 }
 0x117   : > { %v1605_v40 = vadd.f32 %v1229_v37, %v815_v39  ;;  %v1190_v41 = vpop.f32.mrb[8].mxu0 }
 0x118   : > { %v1230_v42 = vpop.f32.mrb[8].mxu1  ;;  %v1191_v43 = vpop.f32.mrb[9].mxu0 }
 0x119   : > { %v1192_v44 = vadd.f32 %v1191_v43, %v1190_v41  ;;  %v1231_v45 = vpop.f32.mrb[9].mxu1  ;;  %v1193_v46 = vpop.f32.mrb[10].mxu0 }
 0x11a   : > { %v1232_v47 = vadd.f32 %v1231_v45, %v1230_v42  ;;  %v1233_v48 = vpop.f32.mrb[10].mxu1  ;;  %v1194_v49 = vpop.f32.mrb[11].mxu0 }
 0x11b   : > { %v820_v50 = vadd.f32 %v1192_v44, %v1086_v10  ;;  %v1195_v51 = vadd.f32 %v1194_v49, %v1193_v46  ;;  %v1234_v52 = vpop.f32.mrb[11].mxu1 }
 0x11c   : > { %v1235_v53 = vadd.f32 %v1234_v52, %v1233_v48 }
 0x11d   : > { %v885_v54 = vadd.f32 %v1232_v47, %v820_v50  ;;  %v823_v55 = vadd.f32 %v1195_v51, %v1086_v10 }
 0x11f   : > { %v888_v56 = vadd.f32 %v1235_v53, %v823_v55  ;;  %v1196_v57 = vpop.f32.mrb[12].mxu0 }
 0x120   : > { %v1236_v58 = vpop.f32.mrb[12].mxu1  ;;  %v1197_v59 = vpop.f32.mrb[13].mxu0 }
 0x121   : > { %v1198_v60 = vadd.f32 %v1197_v59, %v1196_v57  ;;  %v1237_v61 = vpop.f32.mrb[13].mxu1  ;;  %v1199_v62 = vpop.f32.mrb[14].mxu0 }
 0x122   : > { %v1238_v63 = vadd.f32 %v1237_v61, %v1236_v58  ;;  %v1239_v0 = vpop.f32.mrb[14].mxu1  ;;  %v1200_v1 = vpop.f32.mrb[15].mxu0 }
 0x123   : > { %v828_v2 = vadd.f32 %v1198_v60, %v1086_v10  ;;  %v1201_v3 = vadd.f32 %v1200_v1, %v1199_v62  ;;  %v1240_v4 = vpop.f32.mrb[15].mxu1 }
 0x124   : > { %v1241_v5 = vadd.f32 %v1240_v4, %v1239_v0 }
 0x125   : > { %v893_v6 = vadd.f32 %v1238_v63, %v828_v2  ;;  %v831_v7 = vadd.f32 %v1201_v3, %v1086_v10 }
 0x127   : > { %v896_v8 = vadd.f32 %v1241_v5, %v831_v7  ;;  %v1258_v9 = vpop.f32.mrb[16].mxu0 }
 0x128   : > { %v1270_v11 = vpop.f32.mrb[16].mxu1  ;;  %v1259_v12 = vpop.f32.mrb[17].mxu0 }
 0x129   : > { %v1260_v13 = vadd.f32 %v1259_v12, %v1258_v9  ;;  %v1271_v14 = vpop.f32.mrb[17].mxu1  ;;  %v1261_v15 = vpop.f32.mrb[18].mxu0 }
 0x12a   : > { %v1272_v16 = vadd.f32 %v1271_v14, %v1270_v11  ;;  %v1273_v17 = vpop.f32.mrb[18].mxu1  ;;  %v1262_v10 = vpop.f32.mrb[19].mxu0 }
 0x12b   : > { %v934_v18 = vadd.f32 %v1260_v13, %v869_v22  ;;  %v1263_v19 = vadd.f32 %v1262_v10, %v1261_v15  ;;  %v1274_v20 = vpop.f32.mrb[19].mxu1 }
 0x12c   : > { %v950_v21 = vadd.f32 %v1272_v16, %v885_v54  ;;  %v1275_v23 = vadd.f32 %v1274_v20, %v1273_v17 }
 0x12d   : > { %964 = vst [vmem:[%s1611_s29] sm:$0xff] %v934_v18  ;;  %v937_v25 = vadd.f32 %v1263_v19, %v1601_v24 }
 0x12e   : > { %968 = vst [vmem:[%s1611_s29 + $0x20] sm:$0xff] %v950_v21  ;;  %v953_v26 = vadd.f32 %v1275_v23, %v888_v56 }
 0x12f   : > { %965 = vst [vmem:[%s1611_s29 + $0x8] sm:$0xff] %v937_v25  ;;  %v1264_v27 = vpop.f32.mrb[20].mxu0 }
 0x130   : > { %969 = vst [vmem:[%s1611_s29 + $0x28] sm:$0xff] %v953_v26  ;;  %v1276_v28 = vpop.f32.mrb[20].mxu1  ;;  %v1265_v29 = vpop.f32.mrb[21].mxu0 }
 0x131   : > { %v1266_v30 = vadd.f32 %v1265_v29, %v1264_v27  ;;  %v1277_v22 = vpop.f32.mrb[21].mxu1  ;;  %v1267_v31 = vpop.f32.mrb[22].mxu0 }
 0x132   : > { %v1278_v32 = vadd.f32 %v1277_v22, %v1276_v28  ;;  %v1279_v33 = vpop.f32.mrb[22].mxu1  ;;  %v1268_v34 = vpop.f32.mrb[23].mxu0 }
 0x133   : > { %v942_v35 = vadd.f32 %v1266_v30, %v1603_v38  ;;  %v1269_v24 = vadd.f32 %v1268_v34, %v1267_v31  ;;  %v1280_v36 = vpop.f32.mrb[23].mxu1 }
 0x134   : > { %v958_v37 = vadd.f32 %v1278_v32, %v893_v6  ;;  %v1281_v39 = vadd.f32 %v1280_v36, %v1279_v33 }
 0x135   : > { %966 = vst [vmem:[%s1611_s29 + $0x10] sm:$0xff] %v942_v35  ;;  %v945_v41 = vadd.f32 %v1269_v24, %v1605_v40 }
 0x136   : > { %970 = vst [vmem:[%s1611_s29 + $0x30] sm:$0xff] %v958_v37  ;;  %v961_v42 = vadd.f32 %v1281_v39, %v896_v8 }
 0x137   : > { %967 = vst [vmem:[%s1611_s29 + $0x18] sm:$0xff] %v945_v41 }
 0x138   : > { %971 = vst [vmem:[%s1611_s29 + $0x38] sm:$0xff] %v961_v42 }
 0x139 PF: > { %s13_s14 = sadd.s32 1, %s1429_s14   ;;  %s1637_s12 = smov %s1425_s13 }
 0x13a   : > { %p10_p5 = scmp.ge.s32.totalorder %s13_s14, 4   ;;  %s1638_s13 = smov %s1640_s15 }
 0x13c   :  { %12 = sbr.rel (!%p10_p5) target bundleno = 2 (0x2), region = 68 }

// kernel: _lambda_.6
= control target key start
LH: loop header
LB: loop body
LE: loop exit
PB: predicated region body
PF: predicated region fallthrough
CT: control target
= control target key end

     0   :  { %9 = vsyncpa [#allocation5], 0  ;;  %s1973_s0 = inlined_call_operand.vmem [shape: f32[2,8,8,128], index: 0, kind: input, shape index: {}]   ;;  %s1974_s1 = inlined_call_operand.vmem [shape: bf16[2,32,128], index: 1, kind: input, shape index: {}]   ;;  %s1975_s2 = inlined_call_operand.vmem [shape: f32[2,8,8,32], index: 2, kind: output, shape index: {0}]   ;;  %s1976_s3 = inlined_call_operand.hbm [shape: f32[2,8,32], index: 3, kind: output, shape index: {1}]  }
   0x1   :  { %11 = vsyncpa [#allocation5 + $0x1], 0  ;;  %s1650_s12 = smov 0   ;;  %s1652_s13 = smov 0  }
   0x2   :  { %s1654_s14 = smov 0   ;;  %s1656_s15 = smov 0  }
   0x3   :  { %s1658_s16 = smov 0   ;;  %s1660_s17 = smov 0  }
   0x4 LB: > { %s1267_s18 = sadd.s32 4294967295, %s1622_s17   ;;  %s1268_s19 = sadd.s32 4294967294, %s1622_s17   ;;  %s1622_s17 = sphi %s1660_s17, %s17_s17   ;;  %s1618_s16 = sphi %s1658_s16, %s1983_s16   ;;  %s1614_s15 = sphi %s1656_s15, %s1982_s15   ;;  %s1610_s14 = sphi %s1654_s14, %s1981_s14   ;;  %s1606_s13 = sphi %s1652_s13, %s1980_s13   ;;  %s1602_s12 = sphi %s1650_s12, %s1979_s12  }
   0x5   : > { %s29_s20 = sadd.s32 1, %s1618_s16  ;;  %s134_s21 = sadd.s32 1, %s1610_s14 }
   0x6   : > { %p31_p0 = scmp.ge.s32.totalorder %s29_s20, 2  ;;  %p144_p1 = scmp.ne.s32.totalorder %s1610_s14, %s1606_s13 }
   0x7   : > { %p145_p2 = scmp.eq.s32.totalorder %s1267_s18, 1  ;;  %p150_p3 = scmp.ne.s32.totalorder %s1606_s13, %s1602_s12 }
   0x8   : > { %s1985_s20 = smov (%p31_p0, %s29_s20), 0  ;;  %p151_p5 = scmp.eq.s32.totalorder %s1268_s19, 1 }
   0x9   : > { %p1690_p4 = por %p145_p2, %p144_p1  ;;  %s131_s23 = ssub.s32 %s1618_s16, %s1985_s20 }
   0xa   : > { %p1271_p6 = scmp.ge.s32.totalorder %s1622_s17, 1  ;;  %p132_p7 = scmp.eq.s32.totalorder %s131_s23, 0 }
   0xb   : > { %p1697_p8 = por %p151_p5, %p150_p3  ;;  %p198_p9 = scmp.lt.s32.totalorder %s1622_s17, 3 }
   0xc   : > { %s1703_s25 = scalar_select %p132_p7, %s1610_s14, %s134_s21  }
   0xd   : > { %p199_p10 = pnand %p1271_p6, %p198_p9 }
   0xe   : > { %p253_p11 = scmp.lt.s32.totalorder (!%p199_p10), %s1614_s15, 1  ;;  %vm294_vm0 = vcmask (!%p199_p10), 261120   ;;  %v1624_v0 = vmov (!%p199_p10), 0.0   ;;  %vm1625_vm1 = vmmov (!%p199_p10), 0   ;;  %s1279_s5 = smul.u32 (!%p199_p10), 56, %s1614_s15 }
   0xf   : > { %202 = sbr.rel (%p199_p10) target bundleno = 5742 (0x166e), region = 28  ;;  %1354 = vmatprep.subr.bf16.mxu0 (!%p199_p10), %v1624_v0  ;;  %1358 = vmatprep.mubr.msk.bf16.mxu0 (!%p199_p10), %vm1625_vm1, %v1624_v0  ;;  %295 = vst.msk [vmem:[#allocation2] sm:$0xff] (!%p199_p10), %vm294_vm0, %v1624_v0  ;;  %296 = vst.msk [vmem:[#allocation3] sm:$0xff] (!%p199_p10), %vm294_vm0, %v1624_v0  ;;  %s1626_s10 = smov (!%p199_p10), 64  }
  0x10   : > { %1362 = vmatprep.subr.bf16.mxu1 (!%p199_p10), %v1624_v0  ;;  %1366 = vmatprep.mubr.msk.bf16.mxu1 (!%p199_p10), %vm1625_vm1, %v1624_v0  ;;  %s1627_s11 = smov (!%p199_p10), 32   ;;  %s1628_s18 = smov (!%p199_p10), 96  }
  0x11   : > { %s1296_s6 = sshll.u32 (!%p199_p10), %s1614_s15, 3  ;;  %s680_s19 = ssub.s32 (!%p199_p10), 4, %s1614_s15 }
  0x12   : > { %s1850_s21 = sshll.u32 (!%p199_p10), %s680_s19, 3 }
  0x16   : > { %s1714_s26 = scalar_select %p253_p11, %s1614_s15, 1  ;;  %v305_v3 = vld [vmem:[#allocation2] sm:$0xff]  ;;  %v371_v12 = vld [vmem:[#allocation3] sm:$0xff] }
  0x17   : > { %v306_v4 = vpack.c.bf16 %v305_v3, %v305_v3 }
  0x18   : > { %s1328_s27 = sshll.u32 %s1714_s26, 4  ;;  %s1327_s4 = sshll.u32 %s1714_s26, 6 }
  0x19   : > { %s270_s30 = scalar_lea.vmem %s1974_s1, %s1328_s27  ;;  %s1749_s8 = scalar_lea.vmem %s1973_s0, %s1327_s4 }
  0x1a   : > { %v1723_v1 = vld [vmem:[%s270_s30] sm:$0xff]   ;;  %v1726_v2 = vld [vmem:[%s270_s30 + $0x8] sm:$0xff]   ;;  %s303_s9 = scalar_lea.vmem %s1749_s8, %s1279_s5  ;;  %s1767_s23 = scalar_lea.vmem %s1975_s2, %s1327_s4 }
  0x1b   : > { %1355 = vmatpush3.bf16.msra.mxu0 %v1723_v1  ;;  %1363 = vmatpush3.bf16.msra.mxu1 %v1723_v1  ;;  %v304_v5 = vld [vmem:[%s303_s9] sm:$0xff]  ;;  %s403_s27 = scalar_lea.vmem %s1767_s23, %s1279_s5  ;;  %s1284_s26 = smul.u32 40, %s1614_s15 }
  0x1c   : > { %1356 = vmatprep.subr.bf16.mxu0 %v1624_v0  ;;  %1364 = vmatprep.subr.bf16.mxu1 %v1624_v0  ;;  %s1290_s30 = smul.u32 24, %s1614_s15  ;;  %s1174_s7 = scalar_lea.vmem %s1749_s8, %s1296_s6 }
  0x1d   : > { %s1159_s28 = scalar_lea.vmem %s1749_s8, %s1284_s26  ;;  %s1163_s29 = scalar_lea.vmem %s1767_s23, %s1284_s26 }
  0x1e   : > { %v1285_v31 = vld [vmem:[%s1159_s28 + $0x8] sm:$0xff]  ;;  %s1167_s4 = scalar_lea.vmem %s1749_s8, %s1290_s30  ;;  %s1171_s5 = scalar_lea.vmem %s1767_s23, %s1290_s30 }
  0x1f   : > { %1357 = vmatpush3.bf16.msra.mxu0 %v1726_v2  ;;  %1365 = vmatpush3.bf16.msra.mxu1 %v1726_v2  ;;  %v1291_v56 = vld [vmem:[%s1167_s4 + $0x10] sm:$0xff]  ;;  %s1177_s9 = scalar_lea.vmem %s1767_s23, %s1296_s6  ;;  %s769_s26 = scalar_lea.vmem %s1767_s23, %s1850_s21 }
  0x20   : > { %1370 = vmatprep.subr.bf16.mxu0 %v1624_v0  ;;  %1378 = vmatprep.subr.bf16.mxu1 %v1624_v0  ;;  %s1305_s28 = smul.u32 4294967272, %s1614_s15 }
  0x21   : > { %s1311_s4 = smul.u32 4294967256, %s1614_s15 }
  0x22   : > { %1359 = vmatmul.mubr.msk.bf16.vlgmr.msra.gmra.mrb[0].mxu0 %vm294_vm0, %v306_v4  ;;  %s1189_s30 = scalar_lea.vmem %s1767_s23, %s1305_s28 }
  0x23   : > { %1371 = vmatpush3.bf16.msra.mxu0 %v1723_v1  ;;  %1374 = vmatprep.mubr.msk.bf16.mxu0 %vm1625_vm1, %v1624_v0  ;;  %s1197_s6 = scalar_lea.vmem %s1767_s23, %s1311_s4 }
  0x24   : > { %1372 = vmatprep.subr.bf16.mxu0 %v1624_v0 }
  0x27   : > { %1373 = vmatpush3.bf16.msra.mxu0 %v1726_v2 }
  0x28   : > { %1386 = vmatprep.subr.bf16.mxu0 %v1624_v0 }
  0xf5   : > { %v357_v6 = vpop.f32.mrb[0].mxu0 }
  0xf6   : > { %v363_v7 = vadd.f32 %v357_v6, %v304_v5  ;;  %v1360_v8 = vpop.f32.mrb[1].mxu0 }
  0xf7   : > { %v360_v9 = vpop.f32.mrb[2].mxu0 }
  0xf8   : > { %1480 = vtanh.f32 %v363_v7  ;;  %v1361_v10 = vpop.f32.mrb[3].mxu0  ;;  %v1283_v13 = vmul.f32 -1.442695, %v363_v7 }
  0xfa   : > { %1482 = vpow2.f32 %v1283_v13 }
 0x102   : > { %v1481_v11 = vpop.eup %1480 }
 0x103   : > { %378 = vrot.lane.b32.xlu0 %v1481_v11, %s1626_s10 }
 0x104   : > { %v1483_v14 = vpop.eup %1482 }
 0x105   : > { %v367_v15 = vadd.f32 1.0, %v1483_v14 }
 0x107   : > { %373 = vrot.lane.b32.xlu0 %v371_v12, %s1627_s11  ;;  %1484 = vrcp.f32 %v367_v15 }
 0x111   : > { %v1485_v16 = vpop.eup %1484 }
 0x175   : > { %v379_v17 = vpop.permute.xlu0 %378 }
 0x176   : > { %v381_v18 = vmul.f32 %v1485_v16, %v379_v17 }
 0x178   : > { %383 = vrot.lane.b32.xlu1 %v381_v18, %s1627_s11 }
 0x179   : > { %v374_v19 = vpop.permute.xlu0 %373 }
 0x17a   : > { %v376_v20 = vmul.f32 %v1485_v16, %v374_v19 }
 0x1ea   : > { %v384_v21 = vpop.permute.xlu1 %383 }
 0x1eb   : > { %v386_v22 = vadd.f32 %v384_v21, %v376_v20  ;;  %v1297_v20 = vld [vmem:[%s1174_s7 + $0x18] sm:$0xff]  ;;  %s1317_s7 = smul.u32 4294967240, %s1614_s15 }
 0x1ed   : > { %1486 = vtanh.f32 %v386_v22  ;;  %s1205_s19 = scalar_lea.vmem %s1767_s23, %s1317_s7 }
 0x1f7   : > { %v1487_v23 = vpop.eup %1486 }
 0x1f8   : > { %389 = vrot.lane.b32.xlu1 %v1487_v23, %s1626_s10 }
 0x1fc   : > { %394 = vrot.lane.b32.xlu1 %v386_v22, %s1628_s18 }
 0x26a   : > { %v390_v24 = vpop.permute.xlu1 %389 }
 0x26b   : > { %v392_v25 = vmul.f32 %v1485_v16, %v390_v24 }
 0x26d   : > { %399 = vrot.lane.b32.xlu0 %v392_v25, %s1627_s11 }
 0x26e   : > { %v395_v26 = vpop.permute.xlu1 %394 }
 0x26f   : > { %397 = vst.msk [vmem:[#allocation3] sm:$0xff] %vm294_vm0, %v395_v26 }
 0x276   : > { %v463_v27 = vld [vmem:[#allocation3] sm:$0xff] }
 0x277   : > { %465 = vrot.lane.b32.xlu1 %v463_v27, %s1627_s11 }
 0x2df   : > { %v400_v28 = vpop.permute.xlu0 %399 }
 0x2e0   : > { %402 = vst.msk [vmem:[#allocation2] sm:$0xff] %vm294_vm0, %v400_v28  ;;  %404 = vst.msk [vmem:[%s403_s27] sm:$0xff] %vm294_vm0, %v400_v28  ;;  %s682_s27 = scalar_lea.vmem %s1749_s8, %s1850_s21 }
 0x2e7   : > { %v410_v29 = vld [vmem:[#allocation2] sm:$0xff] }
 0x2e8   : > { %v411_v30 = vpack.c.bf16 %v410_v29, %v410_v29 }
 0x2e9   : > { %v466_v44 = vpop.permute.xlu1 %465 }
 0x2ea   : > { %1367 = vmatmul.mubr.msk.bf16.vlgmr.msra.gmra.mrb[0].mxu1 %vm294_vm0, %v411_v30 }
 0x2eb   : > { %1379 = vmatpush3.bf16.msra.mxu1 %v1723_v1  ;;  %1382 = vmatprep.mubr.msk.bf16.mxu1 %vm1625_vm1, %v1624_v0 }
 0x2ec   : > { %1380 = vmatprep.subr.bf16.mxu1 %v1624_v0 }
 0x2ef   : > { %1381 = vmatpush3.bf16.msra.mxu1 %v1726_v2 }
 0x2f0   : > { %1394 = vmatprep.subr.bf16.mxu1 %v1624_v0 }
 0x3bd   : > { %v449_v32 = vpop.f32.mrb[0].mxu1 }
 0x3be   : > { %v455_v33 = vadd.f32 %v1285_v31, %v449_v32  ;;  %v1368_v34 = vpop.f32.mrb[1].mxu1 }
 0x3bf   : > { %v452_v35 = vpop.f32.mrb[2].mxu1 }
 0x3c0   : > { %1488 = vtanh.f32 %v455_v33  ;;  %v1369_v36 = vpop.f32.mrb[3].mxu1  ;;  %v1287_v38 = vmul.f32 -1.442695, %v455_v33 }
 0x3c2   : > { %1490 = vpow2.f32 %v1287_v38 }
 0x3ca   : > { %v1489_v37 = vpop.eup %1488 }
 0x3cb   : > { %470 = vrot.lane.b32.xlu0 %v1489_v37, %s1626_s10 }
 0x3cc   : > { %v1491_v39 = vpop.eup %1490 }
 0x3cd   : > { %v459_v40 = vadd.f32 1.0, %v1491_v39 }
 0x3cf   : > { %1492 = vrcp.f32 %v459_v40 }
 0x3d9   : > { %v1493_v41 = vpop.eup %1492 }
 0x3da   : > { %v468_v45 = vmul.f32 %v1493_v41, %v466_v44 }
 0x43d   : > { %v471_v42 = vpop.permute.xlu0 %470 }
 0x43e   : > { %v473_v43 = vmul.f32 %v1493_v41, %v471_v42 }
 0x440   : > { %475 = vrot.lane.b32.xlu0 %v473_v43, %s1627_s11 }
 0x4b2   : > { %v476_v46 = vpop.permute.xlu0 %475 }
 0x4b3   : > { %v478_v47 = vadd.f32 %v476_v46, %v468_v45  ;;  %v683_v45 = vld [vmem:[%s682_s27] sm:$0xff] }
 0x4b5   : > { %1494 = vtanh.f32 %v478_v47 }
 0x4bf   : > { %v1495_v48 = vpop.eup %1494 }
 0x4c0   : > { %481 = vrot.lane.b32.xlu1 %v1495_v48, %s1626_s10 }
 0x4c4   : > { %486 = vrot.lane.b32.xlu1 %v478_v47, %s1628_s18 }
 0x532   : > { %v482_v49 = vpop.permute.xlu1 %481 }
 0x533   : > { %v484_v50 = vmul.f32 %v1493_v41, %v482_v49 }
 0x535   : > { %491 = vrot.lane.b32.xlu0 %v484_v50, %s1627_s11 }
 0x536   : > { %v487_v51 = vpop.permute.xlu1 %486 }
 0x537   : > { %489 = vst.msk [vmem:[#allocation3] sm:$0xff] %vm294_vm0, %v487_v51 }
 0x53e   : > { %v555_v52 = vld [vmem:[#allocation3] sm:$0xff] }
 0x53f   : > { %557 = vrot.lane.b32.xlu1 %v555_v52, %s1627_s11 }
 0x5a7   : > { %v492_v53 = vpop.permute.xlu0 %491 }
 0x5a8   : > { %494 = vst.msk [vmem:[#allocation2] sm:$0xff] %vm294_vm0, %v492_v53  ;;  %1289 = vst.msk [vmem:[%s1163_s29 + $0x8] sm:$0xff] %vm294_vm0, %v492_v53  ;;  %s1185_s29 = scalar_lea.vmem %s1749_s8, %s1305_s28 }
 0x5af   : > { %v502_v54 = vld [vmem:[#allocation2] sm:$0xff] }
 0x5b0   : > { %v503_v55 = vpack.c.bf16 %v502_v54, %v502_v54 }
 0x5b1   : > { %v558_v8 = vpop.permute.xlu1 %557 }
 0x5b2   : > { %1375 = vmatmul.mubr.msk.bf16.vlgmr.msra.gmra.mrb[4].mxu0 %vm294_vm0, %v503_v55 }
 0x5b3   : > { %1387 = vmatpush3.bf16.msra.mxu0 %v1723_v1  ;;  %1390 = vmatprep.mubr.msk.bf16.mxu0 %vm1625_vm1, %v1624_v0 }
 0x5b4   : > { %1388 = vmatprep.subr.bf16.mxu0 %v1624_v0 }
 0x5b7   : > { %1389 = vmatpush3.bf16.msra.mxu0 %v1726_v2 }
 0x5b8   : > { %1402 = vmatprep.subr.bf16.mxu0 %v1624_v0 }
 0x685   : > { %v541_v57 = vpop.f32.mrb[4].mxu0 }
 0x686   : > { %v547_v58 = vadd.f32 %v1291_v56, %v541_v57  ;;  %v1376_v59 = vpop.f32.mrb[5].mxu0 }
 0x687   : > { %v544_v60 = vpop.f32.mrb[6].mxu0 }
 0x688   : > { %1496 = vtanh.f32 %v547_v58  ;;  %v1377_v61 = vpop.f32.mrb[7].mxu0  ;;  %v1293_v63 = vmul.f32 -1.442695, %v547_v58 }
 0x68a   : > { %1498 = vpow2.f32 %v1293_v63 }
 0x692   : > { %v1497_v62 = vpop.eup %1496 }
 0x693   : > { %562 = vrot.lane.b32.xlu0 %v1497_v62, %s1626_s10 }
 0x694   : > { %v1499_v3 = vpop.eup %1498 }
 0x695   : > { %v551_v4 = vadd.f32 1.0, %v1499_v3 }
 0x697   : > { %1500 = vrcp.f32 %v551_v4 }
 0x6a1   : > { %v1501_v5 = vpop.eup %1500 }
 0x6a2   : > { %v560_v9 = vmul.f32 %v1501_v5, %v558_v8 }
 0x705   : > { %v563_v6 = vpop.permute.xlu0 %562 }
 0x706   : > { %v565_v7 = vmul.f32 %v1501_v5, %v563_v6 }
 0x708   : > { %567 = vrot.lane.b32.xlu0 %v565_v7, %s1627_s11 }
 0x77a   : > { %v568_v10 = vpop.permute.xlu0 %567 }
 0x77b   : > { %v570_v11 = vadd.f32 %v568_v10, %v560_v9  ;;  %v1306_v9 = vld [vmem:[%s1185_s29 + $0x28] sm:$0xff] }
 0x77d   : > { %1502 = vtanh.f32 %v570_v11 }
 0x787   : > { %v1503_v12 = vpop.eup %1502 }
 0x788   : > { %573 = vrot.lane.b32.xlu1 %v1503_v12, %s1626_s10 }
 0x78c   : > { %578 = vrot.lane.b32.xlu1 %v570_v11, %s1628_s18 }
 0x7fa   : > { %v574_v13 = vpop.permute.xlu1 %573 }
 0x7fb   : > { %v576_v14 = vmul.f32 %v1501_v5, %v574_v13 }
 0x7fd   : > { %583 = vrot.lane.b32.xlu0 %v576_v14, %s1627_s11 }
 0x7fe   : > { %v579_v15 = vpop.permute.xlu1 %578 }
 0x7ff   : > { %581 = vst.msk [vmem:[#allocation3] sm:$0xff] %vm294_vm0, %v579_v15 }
 0x806   : > { %v646_v16 = vld [vmem:[#allocation3] sm:$0xff] }
 0x807   : > { %648 = vrot.lane.b32.xlu1 %v646_v16, %s1627_s11 }
 0x86f   : > { %v584_v17 = vpop.permute.xlu0 %583 }
 0x870   : > { %586 = vst.msk [vmem:[#allocation2] sm:$0xff] %vm294_vm0, %v584_v17  ;;  %1295 = vst.msk [vmem:[%s1171_s5 + $0x10] sm:$0xff] %vm294_vm0, %v584_v17  ;;  %s1193_s5 = scalar_lea.vmem %s1749_s8, %s1311_s4 }
 0x877   : > { %v593_v18 = vld [vmem:[#allocation2] sm:$0xff] }
 0x878   : > { %v594_v19 = vpack.c.bf16 %v593_v18, %v593_v18 }
 0x879   : > { %v649_v33 = vpop.permute.xlu1 %648 }
 0x87a   : > { %1383 = vmatmul.mubr.msk.bf16.vlgmr.msra.gmra.mrb[4].mxu1 %vm294_vm0, %v594_v19 }
 0x87b   : > { %1395 = vmatpush3.bf16.msra.mxu1 %v1723_v1  ;;  %1398 = vmatprep.mubr.msk.bf16.mxu1 %vm1625_vm1, %v1624_v0 }
 0x87c   : > { %1396 = vmatprep.subr.bf16.mxu1 %v1624_v0 }
 0x87f   : > { %1397 = vmatpush3.bf16.msra.mxu1 %v1726_v2 }
 0x880   : > { %1410 = vmatprep.subr.bf16.mxu1 %v1624_v0 }
 0x94d   : > { %v632_v21 = vpop.f32.mrb[4].mxu1 }
 0x94e   : > { %v638_v22 = vadd.f32 %v1297_v20, %v632_v21  ;;  %v1384_v23 = vpop.f32.mrb[5].mxu1 }
 0x94f   : > { %v635_v24 = vpop.f32.mrb[6].mxu1 }
 0x950   : > { %1504 = vtanh.f32 %v638_v22  ;;  %v1385_v25 = vpop.f32.mrb[7].mxu1  ;;  %v1299_v27 = vmul.f32 -1.442695, %v638_v22 }
 0x952   : > { %1506 = vpow2.f32 %v1299_v27 }
 0x95a   : > { %v1505_v26 = vpop.eup %1504 }
 0x95b   : > { %653 = vrot.lane.b32.xlu0 %v1505_v26, %s1626_s10 }
 0x95c   : > { %v1507_v28 = vpop.eup %1506 }
 0x95d   : > { %v642_v29 = vadd.f32 1.0, %v1507_v28 }
 0x95f   : > { %1508 = vrcp.f32 %v642_v29 }
 0x969   : > { %v1509_v30 = vpop.eup %1508 }
 0x96a   : > { %v651_v34 = vmul.f32 %v1509_v30, %v649_v33 }
 0x9cd   : > { %v654_v31 = vpop.permute.xlu0 %653 }
 0x9ce   : > { %v656_v32 = vmul.f32 %v1509_v30, %v654_v31  ;;  %v1312_v31 = vld [vmem:[%s1193_s5 + $0x30] sm:$0xff] }
 0x9d0   : > { %658 = vrot.lane.b32.xlu0 %v656_v32, %s1627_s11 }
 0xa42   : > { %v659_v35 = vpop.permute.xlu0 %658 }
 0xa43   : > { %v661_v36 = vadd.f32 %v659_v35, %v651_v34 }
 0xa45   : > { %1510 = vtanh.f32 %v661_v36 }
 0xa4f   : > { %v1511_v37 = vpop.eup %1510 }
 0xa50   : > { %664 = vrot.lane.b32.xlu1 %v1511_v37, %s1626_s10 }
 0xa54   : > { %669 = vrot.lane.b32.xlu1 %v661_v36, %s1628_s18 }
 0xac2   : > { %v665_v38 = vpop.permute.xlu1 %664 }
 0xac3   : > { %v667_v39 = vmul.f32 %v1509_v30, %v665_v38 }
 0xac5   : > { %674 = vrot.lane.b32.xlu0 %v667_v39, %s1627_s11 }
 0xac6   : > { %v670_v40 = vpop.permute.xlu1 %669 }
 0xac7   : > { %672 = vst.msk [vmem:[#allocation3] sm:$0xff] %vm294_vm0, %v670_v40 }
 0xace   : > { %v737_v41 = vld [vmem:[#allocation3] sm:$0xff] }
 0xacf   : > { %739 = vrot.lane.b32.xlu1 %v737_v41, %s1627_s11 }
 0xb37   : > { %v675_v42 = vpop.permute.xlu0 %674 }
 0xb38   : > { %677 = vst.msk [vmem:[#allocation2] sm:$0xff] %vm294_vm0, %v675_v42  ;;  %1301 = vst.msk [vmem:[%s1177_s9 + $0x18] sm:$0xff] %vm294_vm0, %v675_v42  ;;  %s1201_s9 = scalar_lea.vmem %s1749_s8, %s1317_s7  ;;  %s245_s8 = sand.u32 1, %s1606_s13  }
 0xb39   : > { %s1272_s21 = sshll.u32 %s245_s8, 3  ;;  %s1066_s23 = scalar_lea.sflag [#allocation5], %s245_s8 }
 0xb3a   : > { %s247_s27 = scalar_lea.vmem [#allocation4], %s1272_s21 }
 0xb3f   : > { %v684_v43 = vld [vmem:[#allocation2] sm:$0xff] }
 0xb40   : > { %v685_v44 = vpack.c.bf16 %v684_v43, %v684_v43 }
 0xb41   : > { %v740_v58 = vpop.permute.xlu1 %739 }
 0xb42   : > { %1391 = vmatmul.mubr.msk.bf16.vlgmr.msra.gmra.mrb[8].mxu0 %vm294_vm0, %v685_v44 }
 0xb43   : > { %1403 = vmatpush3.bf16.msra.mxu0 %v1723_v1  ;;  %1406 = vmatprep.mubr.msk.bf16.mxu0 %vm1625_vm1, %v1624_v0 }
 0xb44   : > { %1404 = vmatprep.subr.bf16.mxu0 %v1624_v0 }
 0xb47   : > { %1405 = vmatpush3.bf16.msra.mxu0 %v1726_v2 }
 0xc15   : > { %v723_v46 = vpop.f32.mrb[8].mxu0 }
 0xc16   : > { %v729_v47 = vadd.f32 %v723_v46, %v683_v45  ;;  %v1392_v48 = vpop.f32.mrb[9].mxu0 }
 0xc17   : > { %v726_v49 = vpop.f32.mrb[10].mxu0 }
 0xc18   : > { %1512 = vtanh.f32 %v729_v47  ;;  %v1393_v50 = vpop.f32.mrb[11].mxu0  ;;  %v1304_v52 = vmul.f32 -1.442695, %v729_v47 }
 0xc1a   : > { %1514 = vpow2.f32 %v1304_v52 }
 0xc22   : > { %v1513_v51 = vpop.eup %1512 }
 0xc23   : > { %744 = vrot.lane.b32.xlu0 %v1513_v51, %s1626_s10 }
 0xc24   : > { %v1515_v53 = vpop.eup %1514 }
 0xc25   : > { %v733_v54 = vadd.f32 1.0, %v1515_v53 }
 0xc27   : > { %1516 = vrcp.f32 %v733_v54 }
 0xc31   : > { %v1517_v55 = vpop.eup %1516 }
 0xc32   : > { %v742_v59 = vmul.f32 %v1517_v55, %v740_v58 }
 0xc95   : > { %v745_v56 = vpop.permute.xlu0 %744 }
 0xc96   : > { %v747_v57 = vmul.f32 %v1517_v55, %v745_v56  ;;  %v1318_v56 = vld [vmem:[%s1201_s9 + $0x38] sm:$0xff] }
 0xc98   : > { %749 = vrot.lane.b32.xlu0 %v747_v57, %s1627_s11 }
 0xd0a   : > { %v750_v60 = vpop.permute.xlu0 %749 }
 0xd0b   : > { %v752_v61 = vadd.f32 %v750_v60, %v742_v59 }
 0xd0d   : > { %1518 = vtanh.f32 %v752_v61 }
 0xd17   : > { %v1519_v62 = vpop.eup %1518 }
 0xd18   : > { %755 = vrot.lane.b32.xlu1 %v1519_v62, %s1626_s10 }
 0xd1c   : > { %760 = vrot.lane.b32.xlu1 %v752_v61, %s1628_s18 }
 0xd8a   : > { %v756_v63 = vpop.permute.xlu1 %755 }
 0xd8b   : > { %v758_v3 = vmul.f32 %v1517_v55, %v756_v63 }
 0xd8d   : > { %765 = vrot.lane.b32.xlu0 %v758_v3, %s1627_s11 }
 0xd8e   : > { %v761_v4 = vpop.permute.xlu1 %760 }
 0xd8f   : > { %763 = vst.msk [vmem:[#allocation3] sm:$0xff] %vm294_vm0, %v761_v4 }
 0xd96   : > { %v829_v5 = vld [vmem:[#allocation3] sm:$0xff] }
 0xd97   : > { %831 = vrot.lane.b32.xlu1 %v829_v5, %s1627_s11 }
 0xdff   : > { %v766_v6 = vpop.permute.xlu0 %765 }
 0xe00   : > { %768 = vst.msk [vmem:[#allocation2] sm:$0xff] %vm294_vm0, %v766_v6  ;;  %770 = vst.msk [vmem:[%s769_s26] sm:$0xff] %vm294_vm0, %v766_v6 }
 0xe07   : > { %v776_v7 = vld [vmem:[#allocation2] sm:$0xff] }
 0xe08   : > { %v777_v8 = vpack.c.bf16 %v776_v7, %v776_v7 }
 0xe09   : > { %v832_v19 = vpop.permute.xlu1 %831 }
 0xe0a   : > { %1399 = vmatmul.mubr.msk.bf16.vlgmr.msra.gmra.mrb[8].mxu1 %vm294_vm0, %v777_v8 }
 0xe0b   : > { %1411 = vmatpush3.bf16.msra.mxu1 %v1723_v1  ;;  %1414 = vmatprep.mubr.msk.bf16.mxu1 %vm1625_vm1, %v1624_v0 }
 0xe0c   : > { %1412 = vmatprep.subr.bf16.mxu1 %v1624_v0 }
 0xe0f   : > { %1413 = vmatpush3.bf16.msra.mxu1 %v1726_v2 }
 0xedd   : > { %v815_v10 = vpop.f32.mrb[8].mxu1 }
 0xede   : > { %v821_v11 = vadd.f32 %v1306_v9, %v815_v10  ;;  %v1400_v12 = vpop.f32.mrb[9].mxu1 }
 0xedf   : > { %v818_v13 = vpop.f32.mrb[10].mxu1 }
 0xee0   : > { %1520 = vtanh.f32 %v821_v11  ;;  %v1401_v14 = vpop.f32.mrb[11].mxu1  ;;  %v1308_v1 = vmul.f32 -1.442695, %v821_v11 }
 0xee2   : > { %1522 = vpow2.f32 %v1308_v1 }
 0xeea   : > { %v1521_v15 = vpop.eup %1520 }
 0xeeb   : > { %836 = vrot.lane.b32.xlu0 %v1521_v15, %s1626_s10 }
 0xeec   : > { %v1523_v16 = vpop.eup %1522 }
 0xeed   : > { %v825_v17 = vadd.f32 1.0, %v1523_v16 }
 0xeef   : > { %1524 = vrcp.f32 %v825_v17 }
 0xef9   : > { %v1525_v0 = vpop.eup %1524 }
 0xefa   : > { %v834_v20 = vmul.f32 %v1525_v0, %v832_v19 }
 0xf5d   : > { %v837_v2 = vpop.permute.xlu0 %836 }
 0xf5e   : > { %v839_v18 = vmul.f32 %v1525_v0, %v837_v2 }
 0xf60   : > { %841 = vrot.lane.b32.xlu0 %v839_v18, %s1627_s11 }
 0xfd2   : > { %v842_v21 = vpop.permute.xlu0 %841 }
 0xfd3   : > { %v844_v22 = vadd.f32 %v842_v21, %v834_v20 }
 0xfd5   : > { %1526 = vtanh.f32 %v844_v22 }
 0xfdf   : > { %v1527_v23 = vpop.eup %1526 }
 0xfe0   : > { %847 = vrot.lane.b32.xlu1 %v1527_v23, %s1626_s10 }
 0xfe4   : > { %852 = vrot.lane.b32.xlu1 %v844_v22, %s1628_s18 }
0x1052   : > { %v848_v24 = vpop.permute.xlu1 %847 }
0x1053   : > { %v850_v25 = vmul.f32 %v1525_v0, %v848_v24 }
0x1055   : > { %857 = vrot.lane.b32.xlu0 %v850_v25, %s1627_s11 }
0x1056   : > { %v853_v26 = vpop.permute.xlu1 %852 }
0x1057   : > { %855 = vst.msk [vmem:[#allocation3] sm:$0xff] %vm294_vm0, %v853_v26 }
0x105e   : > { %v921_v27 = vld [vmem:[#allocation3] sm:$0xff] }
0x105f   : > { %923 = vrot.lane.b32.xlu1 %v921_v27, %s1627_s11 }
0x10c7   : > { %v858_v28 = vpop.permute.xlu0 %857 }
0x10c8   : > { %860 = vst.msk [vmem:[#allocation2] sm:$0xff] %vm294_vm0, %v858_v28  ;;  %1310 = vst.msk [vmem:[%s1189_s30 + $0x28] sm:$0xff] %vm294_vm0, %v858_v28 }
0x10cf   : > { %v868_v29 = vld [vmem:[#allocation2] sm:$0xff] }
0x10d0   : > { %v869_v30 = vpack.c.bf16 %v868_v29, %v868_v29 }
0x10d1   : > { %v924_v44 = vpop.permute.xlu1 %923 }
0x10d2   : > { %1407 = vmatmul.mubr.msk.bf16.vlgmr.msra.gmra.mrb[12].mxu0 %vm294_vm0, %v869_v30 }
0x11a5   : > { %v907_v32 = vpop.f32.mrb[12].mxu0 }
0x11a6   : > { %v913_v33 = vadd.f32 %v1312_v31, %v907_v32  ;;  %v1408_v34 = vpop.f32.mrb[13].mxu0 }
0x11a7   : > { %v910_v35 = vpop.f32.mrb[14].mxu0 }
0x11a8   : > { %1528 = vtanh.f32 %v913_v33  ;;  %v1409_v36 = vpop.f32.mrb[15].mxu0  ;;  %v1314_v38 = vmul.f32 -1.442695, %v913_v33 }
0x11aa   : > { %1530 = vpow2.f32 %v1314_v38 }
0x11b2   : > { %v1529_v37 = vpop.eup %1528 }
0x11b3   : > { %928 = vrot.lane.b32.xlu0 %v1529_v37, %s1626_s10 }
0x11b4   : > { %v1531_v39 = vpop.eup %1530 }
0x11b5   : > { %v917_v40 = vadd.f32 1.0, %v1531_v39 }
0x11b7   : > { %1532 = vrcp.f32 %v917_v40 }
0x11c1   : > { %v1533_v41 = vpop.eup %1532 }
0x11c2   : > { %v926_v45 = vmul.f32 %v1533_v41, %v924_v44 }
0x1225   : > { %v929_v42 = vpop.permute.xlu0 %928 }
0x1226   : > { %v931_v43 = vmul.f32 %v1533_v41, %v929_v42 }
0x1228   : > { %933 = vrot.lane.b32.xlu0 %v931_v43, %s1627_s11 }
0x129a   : > { %v934_v46 = vpop.permute.xlu0 %933 }
0x129b   : > { %v936_v47 = vadd.f32 %v934_v46, %v926_v45 }
0x129d   : > { %1534 = vtanh.f32 %v936_v47 }
0x12a7   : > { %v1535_v48 = vpop.eup %1534 }
0x12a8   : > { %939 = vrot.lane.b32.xlu1 %v1535_v48, %s1626_s10 }
0x12ac   : > { %944 = vrot.lane.b32.xlu1 %v936_v47, %s1628_s18 }
0x131a   : > { %v940_v49 = vpop.permute.xlu1 %939 }
0x131b   : > { %v942_v50 = vmul.f32 %v1533_v41, %v940_v49 }
0x131d   : > { %949 = vrot.lane.b32.xlu0 %v942_v50, %s1627_s11 }
0x131e   : > { %v945_v51 = vpop.permute.xlu1 %944 }
0x131f   : > { %947 = vst.msk [vmem:[#allocation3] sm:$0xff] %vm294_vm0, %v945_v51 }
0x1326   : > { %v1013_v52 = vld [vmem:[#allocation3] sm:$0xff] }
0x1327   : > { %1015 = vrot.lane.b32.xlu1 %v1013_v52, %s1627_s11 }
0x138f   : > { %v950_v53 = vpop.permute.xlu0 %949 }
0x1390   : > { %952 = vst.msk [vmem:[#allocation2] sm:$0xff] %vm294_vm0, %v950_v53  ;;  %1316 = vst.msk [vmem:[%s1197_s6 + $0x30] sm:$0xff] %vm294_vm0, %v950_v53 }
0x1397   : > { %v960_v54 = vld [vmem:[#allocation2] sm:$0xff] }
0x1398   : > { %v961_v55 = vpack.c.bf16 %v960_v54, %v960_v54 }
0x1399   : > { %v1016_v8 = vpop.permute.xlu1 %1015 }
0x139a   : > { %1415 = vmatmul.mubr.msk.bf16.vlgmr.msra.gmra.mrb[12].mxu1 %vm294_vm0, %v961_v55 }
0x146d   : > { %v999_v57 = vpop.f32.mrb[12].mxu1 }
0x146e   : > { %v1005_v58 = vadd.f32 %v1318_v56, %v999_v57  ;;  %v1416_v59 = vpop.f32.mrb[13].mxu1 }
0x146f   : > { %v1002_v60 = vpop.f32.mrb[14].mxu1 }
0x1470   : > { %1536 = vtanh.f32 %v1005_v58  ;;  %v1417_v61 = vpop.f32.mrb[15].mxu1  ;;  %v1320_v63 = vmul.f32 -1.442695, %v1005_v58 }
0x1472   : > { %1538 = vpow2.f32 %v1320_v63 }
0x147a   : > { %v1537_v62 = vpop.eup %1536 }
0x147b   : > { %1020 = vrot.lane.b32.xlu0 %v1537_v62, %s1626_s10 }
0x147c   : > { %v1539_v3 = vpop.eup %1538 }
0x147d   : > { %v1009_v4 = vadd.f32 1.0, %v1539_v3 }
0x147f   : > { %1540 = vrcp.f32 %v1009_v4 }
0x1489   : > { %v1541_v5 = vpop.eup %1540 }
0x148a   : > { %v1018_v9 = vmul.f32 %v1541_v5, %v1016_v8 }
0x14ed   : > { %v1021_v6 = vpop.permute.xlu0 %1020 }
0x14ee   : > { %v1023_v7 = vmul.f32 %v1541_v5, %v1021_v6 }
0x14f0   : > { %1025 = vrot.lane.b32.xlu0 %v1023_v7, %s1627_s11 }
0x1562   : > { %v1026_v10 = vpop.permute.xlu0 %1025 }
0x1563   : > { %v1028_v11 = vadd.f32 %v1026_v10, %v1018_v9 }
0x1565   : > { %1542 = vtanh.f32 %v1028_v11 }
0x156f   : > { %v1543_v12 = vpop.eup %1542 }
0x1570   : > { %1031 = vrot.lane.b32.xlu1 %v1543_v12, %s1626_s10  ;;  %s1324_s10 = sshll.u32 %s1614_s15, 7  ;;  %s1629_s15 = smov [#allocation4]  }
0x1571   : > { %s1548_s30 = sshll.u32 %s1629_s15, 4  ;;  %s1549_s30 = int_to_ptr.vmem [resolvable:$false] %s1548_s30 }
0x1572   : > { %s1550_s4 = scalar_lea.vmem %s1549_s30, 256 }
0x1574   : > { %1036 = vrot.lane.b32.xlu1 %v1028_v11, %s1628_s18  ;;  %s1087_s18 = sshll.u32 %s247_s27, 4  ;;  %s1927_s18 = int_to_ptr.vmem [resolvable:$true] %s1087_s18 }
0x1575   : > { %s1544_s29 = scalar_lea.vmem %s1927_s18, 128  ;;  %p1551_p1 = scmp.lt.s32.totalorder %s1927_s18, %s1549_s30 }
0x1576   : > { %p1545_p12 = scmp.ne.s32.totalorder %s1927_s18, %s1544_s29  ;;  %p1552_p2 = scmp.lt.s32.totalorder %s1550_s4, %s1544_s29 }
0x1578   : > { %p1546_p13 = pnand %p1545_p12, %p1690_p4  ;;  %p1553_p3 = por %p1552_p2, %p1551_p1 }
0x157a   : > { %p1547_p0 = pneg %p1546_p13 }
0x157c   : > { %p1554_p5 = pnand %p1553_p3, %p1547_p0 }
0x15e2   : > { %v1032_v13 = vpop.permute.xlu1 %1031 }
0x15e3   : > { %v1034_v14 = vmul.f32 %v1541_v5, %v1032_v13 }
0x15e5   : > { %1041 = vrot.lane.b32.xlu0 %v1034_v14, %s1627_s11  ;;  %s1925_s11 = scalar_lea.hbm %s1976_s3, %s1324_s10 }
0x15e6   : > { %v1037_v15 = vpop.permute.xlu1 %1036 }
0x15e7   : > { %1039 = vst.msk [vmem:[#allocation3] sm:$0xff] %vm294_vm0, %v1037_v15 }
0x1657   : > { %v1042_v1 = vpop.permute.xlu0 %1041 }
0x1658   : > { %1044 = vst.msk [vmem:[#allocation2] sm:$0xff] %vm294_vm0, %v1042_v1  ;;  %1322 = vst.msk [vmem:[%s1205_s19 + $0x38] sm:$0xff] %vm294_vm0, %v1042_v1 }
0x165f   : > { %v1050_v16 = vld [vmem:[#allocation2] sm:$0xff] }
0x1660   : > { %1051 = vst.msk [vmem:[%s247_s27] sm:$0xff] %vm294_vm0, %v1050_v16 }
0x1661   : > { %1557 = shalt.err (!%p1554_p5)
}
0x1662   : > { %s1558_s5 = scalar_lea.hbm %s1925_s11, 128  ;;  %s1562_s9 = scalar_lea.hbm %s1976_s3, 256 }
0x1663   : > { %p1559_p6 = scmp.ne.s32.totalorder %s1925_s11, %s1558_s5  ;;  %p1563_p10 = scmp.lt.u32.totalorder %s1925_s11, %s1976_s3 }
0x1664   : > { %p1564_p11 = scmp.lt.u32.totalorder %s1562_s9, %s1558_s5  ;;  %p1566_p13 = scmp.lt.u32.totalorder %s1558_s5, %s1925_s11 }
0x1665   : > { %p1560_p7 = pnand %p1559_p6, %p1690_p4 }
0x1666   : > { %p1565_p12 = por %p1564_p11, %p1563_p10 }
0x1667   : > { %p1561_p9 = pneg %p1560_p7 }
0x1668   : > { %p1567_p0 = por %p1566_p13, %p1565_p12 }
0x166a   : > { %p1568_p1 = pnand %p1567_p0, %p1561_p9 }
0x166c   : > { %1571 = shalt.err (!%p1568_p1)
}
0x166d   : > { %1418 = dma.vmem_to_hbm [thread:$0]  (%p1690_p4), %s1927_s18, 128, %s1925_s11, %s1066_s23  }
0x166e PF: > { %p1424_p2 = scmp.ge.s32.totalorder %s1622_s17, 2  ;;  %s1115_s21 = sand.u32 1, %s1602_s12  }
0x166f   : > { %s1116_s10 = scalar_lea.sflag [#allocation5], %s1115_s21 }
0x1670   : > { %p1421_p3 = pnand %p1424_p2, %p1697_p8 }
0x1672   : > { %1597 = dma.done.wait (!%p1421_p3), %s1116_s10, 128  }
0x1673   : > { %1599 = vsyncadd (!%p1421_p3), %s1116_s10, 4294967168  ;;  %s17_s17 = sadd.s32 1, %s1622_s17   ;;  %s1979_s12 = smov %s1606_s13 }
0x1674   : > { %p14_p5 = scmp.ge.s32.totalorder %s17_s17, 4   ;;  %s1980_s13 = smov %s1610_s14 }
0x1675   : > { %s1981_s14 = smov %s1703_s25  ;;  %s1982_s15 = smov %s1618_s16 }
0x1676   : > { %s1983_s16 = smov %s1985_s20  ;;  %16 = sbr.rel (!%p14_p5) target bundleno = 4 (0x4), region = 102 }
0x167d   :  { %1121 = vsyncpa [#allocation5], 1 }
0x167e   :  { %1123 = vsyncpa [#allocation5 + $0x1], 1 }

// kernel: _lambda_.8
= control target key start
LH: loop header
LB: loop body
LE: loop exit
PB: predicated region body
PF: predicated region fallthrough
CT: control target
= control target key end

     0   :  { %9 = vsyncpa [#allocation5], 0  ;;  %s1946_s0 = inlined_call_operand.vmem [shape: f32[2,8,8,128], index: 0, kind: input, shape index: {}]   ;;  %s1947_s1 = inlined_call_operand.vmem [shape: bf16[2,32,128], index: 1, kind: input, shape index: {}]   ;;  %s1948_s2 = inlined_call_operand.hbm [shape: f32[2,8,8,32], index: 2, kind: output, shape index: {0}]   ;;  %s1949_s3 = inlined_call_operand.vmem [shape: f32[2,8,32], index: 3, kind: output, shape index: {1}]  }
   0x1   :  { %11 = vsyncpa [#allocation5 + $0x1], 0  ;;  %s1618_s12 = smov 0   ;;  %s1620_s13 = smov 0  }
   0x2   :  { %s1622_s14 = smov 0   ;;  %s1624_s15 = smov 0  }
   0x3   :  { %s1626_s16 = smov 0   ;;  %s1628_s17 = smov 0  }
   0x4 LB: > { %s1231_s18 = sadd.s32 4294967295, %s1588_s17   ;;  %s1232_s19 = sadd.s32 4294967294, %s1588_s17   ;;  %s1588_s17 = sphi %s1628_s17, %s17_s17   ;;  %s1584_s16 = sphi %s1626_s16, %s1956_s16   ;;  %s1580_s15 = sphi %s1624_s15, %s1955_s15   ;;  %s1576_s14 = sphi %s1622_s14, %s1954_s14   ;;  %s1572_s13 = sphi %s1620_s13, %s1953_s13   ;;  %s1568_s12 = sphi %s1618_s12, %s1952_s12  }
   0x5   : > { %s29_s20 = sadd.s32 1, %s1584_s16  ;;  %s108_s21 = sadd.s32 1, %s1576_s14 }
   0x6   : > { %p31_p0 = scmp.ge.s32.totalorder %s29_s20, 2  ;;  %p118_p1 = scmp.ne.s32.totalorder %s1576_s14, %s1572_s13 }
   0x7   : > { %p119_p2 = scmp.eq.s32.totalorder %s1231_s18, 1  ;;  %p124_p3 = scmp.ne.s32.totalorder %s1572_s13, %s1568_s12 }
   0x8   : > { %s1958_s20 = smov (%p31_p0, %s29_s20), 0  ;;  %p125_p5 = scmp.eq.s32.totalorder %s1232_s19, 1 }
   0x9   : > { %p1658_p4 = por %p119_p2, %p118_p1  ;;  %s103_s23 = ssub.s32 %s1584_s16, %s1958_s20 }
   0xa   : > { %p1235_p6 = scmp.ge.s32.totalorder %s1588_s17, 1  ;;  %p106_p7 = scmp.eq.s32.totalorder %s103_s23, 0 }
   0xb   : > { %p1665_p8 = por %p125_p5, %p124_p3  ;;  %p198_p9 = scmp.lt.s32.totalorder %s1588_s17, 3 }
   0xc   : > { %s1671_s25 = scalar_select %p106_p7, %s1576_s14, %s108_s21  }
   0xd   : > { %p199_p10 = pnand %p1235_p6, %p198_p9 }
   0xe   : > { %p244_p11 = scmp.lt.s32.totalorder (!%p199_p10), %s1580_s15, 1  ;;  %vm276_vm0 = vcmask (!%p199_p10), 261120   ;;  %v1590_v0 = vmov (!%p199_p10), 0.0   ;;  %vm1591_vm1 = vmmov (!%p199_p10), 0   ;;  %s1242_s5 = smul.u32 (!%p199_p10), 56, %s1580_s15 }
   0xf   : > { %202 = sbr.rel (%p199_p10) target bundleno = 5738 (0x166a), region = 28  ;;  %1318 = vmatprep.subr.bf16.mxu0 (!%p199_p10), %v1590_v0  ;;  %1322 = vmatprep.mubr.msk.bf16.mxu0 (!%p199_p10), %vm1591_vm1, %v1590_v0  ;;  %277 = vst.msk [vmem:[#allocation2] sm:$0xff] (!%p199_p10), %vm276_vm0, %v1590_v0  ;;  %278 = vst.msk [vmem:[#allocation3] sm:$0xff] (!%p199_p10), %vm276_vm0, %v1590_v0  ;;  %s1592_s10 = smov (!%p199_p10), 64  }
  0x10   : > { %1326 = vmatprep.subr.bf16.mxu1 (!%p199_p10), %v1590_v0  ;;  %1330 = vmatprep.mubr.msk.bf16.mxu1 (!%p199_p10), %vm1591_vm1, %v1590_v0  ;;  %s1593_s11 = smov (!%p199_p10), 32   ;;  %s1594_s18 = smov (!%p199_p10), 96  }
  0x11   : > { %s230_s19 = sand.u32 (!%p199_p10), 1, %s1572_s13   ;;  %s1247_s28 = smul.u32 (!%p199_p10), 40, %s1580_s15 }
  0x12   : > { %s1236_s21 = sshll.u32 (!%p199_p10), %s230_s19, 6  ;;  %s1259_s7 = sshll.u32 (!%p199_p10), %s1580_s15, 3 }
  0x13   : > { %s1731_s23 = scalar_lea.vmem (!%p199_p10), [#allocation4], %s1236_s21 }
  0x14   : > { %s1141_s21 = scalar_lea.vmem (!%p199_p10), %s1731_s23, %s1259_s7 [#allocation4] }
  0x16   : > { %s1682_s26 = scalar_select %p244_p11, %s1580_s15, 1  ;;  %v287_v3 = vld [vmem:[#allocation2] sm:$0xff]  ;;  %v353_v12 = vld [vmem:[#allocation3] sm:$0xff] }
  0x17   : > { %v288_v4 = vpack.c.bf16 %v287_v3, %v287_v3 }
  0x18   : > { %s1292_s27 = sshll.u32 %s1682_s26, 4  ;;  %s1291_s4 = sshll.u32 %s1682_s26, 6 }
  0x19   : > { %s261_s30 = scalar_lea.vmem %s1947_s1, %s1292_s27  ;;  %s1715_s8 = scalar_lea.vmem %s1946_s0, %s1291_s4 }
  0x1a   : > { %v1691_v1 = vld [vmem:[%s261_s30] sm:$0xff]   ;;  %v1694_v2 = vld [vmem:[%s261_s30 + $0x8] sm:$0xff]   ;;  %s285_s9 = scalar_lea.vmem %s1715_s8, %s1242_s5  ;;  %s385_s27 = scalar_lea.vmem %s1731_s23, %s1242_s5 [#allocation4] }
  0x1b   : > { %1319 = vmatpush3.bf16.msra.mxu0 %v1691_v1  ;;  %1327 = vmatpush3.bf16.msra.mxu1 %v1691_v1  ;;  %v286_v5 = vld [vmem:[%s285_s9] sm:$0xff]  ;;  %s1123_s29 = scalar_lea.vmem %s1715_s8, %s1247_s28  ;;  %s1127_s30 = scalar_lea.vmem %s1731_s23, %s1247_s28 [#allocation4] }
  0x1c   : > { %1320 = vmatprep.subr.bf16.mxu0 %v1590_v0  ;;  %1328 = vmatprep.subr.bf16.mxu1 %v1590_v0  ;;  %v1248_v31 = vld [vmem:[%s1123_s29 + $0x8] sm:$0xff]  ;;  %s1253_s4 = smul.u32 24, %s1580_s15  ;;  %s1138_s9 = scalar_lea.vmem %s1715_s8, %s1259_s7 }
  0x1d   : > { %s1274_s7 = smul.u32 4294967256, %s1580_s15 }
  0x1e   : > { %s1131_s5 = scalar_lea.vmem %s1715_s8, %s1253_s4  ;;  %s1135_s6 = scalar_lea.vmem %s1731_s23, %s1253_s4 [#allocation4] }
  0x1f   : > { %1321 = vmatpush3.bf16.msra.mxu0 %v1694_v2  ;;  %1329 = vmatpush3.bf16.msra.mxu1 %v1694_v2  ;;  %v1254_v56 = vld [vmem:[%s1131_s5 + $0x10] sm:$0xff]  ;;  %s1268_s4 = smul.u32 4294967272, %s1580_s15 }
  0x20   : > { %1334 = vmatprep.subr.bf16.mxu0 %v1590_v0  ;;  %1342 = vmatprep.subr.bf16.mxu1 %v1590_v0 }
  0x21   : > { %s1149_s5 = scalar_lea.vmem %s1715_s8, %s1268_s4 }
  0x22   : > { %1323 = vmatmul.mubr.msk.bf16.vlgmr.msra.gmra.mrb[0].mxu0 %vm276_vm0, %v288_v4 }
  0x23   : > { %1335 = vmatpush3.bf16.msra.mxu0 %v1691_v1  ;;  %1338 = vmatprep.mubr.msk.bf16.mxu0 %vm1591_vm1, %v1590_v0 }
  0x24   : > { %1336 = vmatprep.subr.bf16.mxu0 %v1590_v0 }
  0x27   : > { %1337 = vmatpush3.bf16.msra.mxu0 %v1694_v2 }
  0x28   : > { %1350 = vmatprep.subr.bf16.mxu0 %v1590_v0 }
  0xf5   : > { %v339_v6 = vpop.f32.mrb[0].mxu0 }
  0xf6   : > { %v345_v7 = vadd.f32 %v339_v6, %v286_v5  ;;  %v1324_v8 = vpop.f32.mrb[1].mxu0 }
  0xf7   : > { %v342_v9 = vpop.f32.mrb[2].mxu0 }
  0xf8   : > { %1446 = vtanh.f32 %v345_v7  ;;  %v1325_v10 = vpop.f32.mrb[3].mxu0  ;;  %v1246_v13 = vmul.f32 -1.442695, %v345_v7 }
  0xfa   : > { %1448 = vpow2.f32 %v1246_v13 }
 0x102   : > { %v1447_v11 = vpop.eup %1446 }
 0x103   : > { %360 = vrot.lane.b32.xlu0 %v1447_v11, %s1592_s10 }
 0x104   : > { %v1449_v14 = vpop.eup %1448 }
 0x105   : > { %v349_v15 = vadd.f32 1.0, %v1449_v14 }
 0x107   : > { %355 = vrot.lane.b32.xlu0 %v353_v12, %s1593_s11  ;;  %1450 = vrcp.f32 %v349_v15 }
 0x111   : > { %v1451_v16 = vpop.eup %1450 }
 0x175   : > { %v361_v17 = vpop.permute.xlu0 %360 }
 0x176   : > { %v363_v18 = vmul.f32 %v1451_v16, %v361_v17 }
 0x178   : > { %365 = vrot.lane.b32.xlu1 %v363_v18, %s1593_s11 }
 0x179   : > { %v356_v19 = vpop.permute.xlu0 %355 }
 0x17a   : > { %v358_v20 = vmul.f32 %v1451_v16, %v356_v19 }
 0x1ea   : > { %v366_v21 = vpop.permute.xlu1 %365 }
 0x1eb   : > { %v368_v22 = vadd.f32 %v366_v21, %v358_v20  ;;  %v1260_v20 = vld [vmem:[%s1138_s9 + $0x18] sm:$0xff]  ;;  %s1157_s9 = scalar_lea.vmem %s1715_s8, %s1274_s7 }
 0x1ed   : > { %1452 = vtanh.f32 %v368_v22 }
 0x1f7   : > { %v1453_v23 = vpop.eup %1452 }
 0x1f8   : > { %371 = vrot.lane.b32.xlu1 %v1453_v23, %s1592_s10 }
 0x1fc   : > { %376 = vrot.lane.b32.xlu1 %v368_v22, %s1594_s18 }
 0x26a   : > { %v372_v24 = vpop.permute.xlu1 %371 }
 0x26b   : > { %v374_v25 = vmul.f32 %v1451_v16, %v372_v24 }
 0x26d   : > { %381 = vrot.lane.b32.xlu0 %v374_v25, %s1593_s11 }
 0x26e   : > { %v377_v26 = vpop.permute.xlu1 %376 }
 0x26f   : > { %379 = vst.msk [vmem:[#allocation3] sm:$0xff] %vm276_vm0, %v377_v26 }
 0x276   : > { %v445_v27 = vld [vmem:[#allocation3] sm:$0xff] }
 0x277   : > { %447 = vrot.lane.b32.xlu1 %v445_v27, %s1593_s11 }
 0x2df   : > { %v382_v28 = vpop.permute.xlu0 %381 }
 0x2e0   : > { %384 = vst.msk [vmem:[#allocation2] sm:$0xff] %vm276_vm0, %v382_v28  ;;  %386 = vst.msk [vmem:[%s385_s27] sm:$0xff] %vm276_vm0, %v382_v28  ;;  %s662_s27 = ssub.s32 4, %s1580_s15 }
 0x2e1   : > { %s1814_s28 = sshll.u32 %s662_s27, 3  ;;  %s1280_s27 = smul.u32 4294967240, %s1580_s15 }
 0x2e2   : > { %s664_s29 = scalar_lea.vmem %s1715_s8, %s1814_s28 }
 0x2e7   : > { %v392_v29 = vld [vmem:[#allocation2] sm:$0xff] }
 0x2e8   : > { %v393_v30 = vpack.c.bf16 %v392_v29, %v392_v29 }
 0x2e9   : > { %v448_v44 = vpop.permute.xlu1 %447 }
 0x2ea   : > { %1331 = vmatmul.mubr.msk.bf16.vlgmr.msra.gmra.mrb[0].mxu1 %vm276_vm0, %v393_v30 }
 0x2eb   : > { %1343 = vmatpush3.bf16.msra.mxu1 %v1691_v1  ;;  %1346 = vmatprep.mubr.msk.bf16.mxu1 %vm1591_vm1, %v1590_v0 }
 0x2ec   : > { %1344 = vmatprep.subr.bf16.mxu1 %v1590_v0 }
 0x2ef   : > { %1345 = vmatpush3.bf16.msra.mxu1 %v1694_v2 }
 0x2f0   : > { %1358 = vmatprep.subr.bf16.mxu1 %v1590_v0 }
 0x3bd   : > { %v431_v32 = vpop.f32.mrb[0].mxu1 }
 0x3be   : > { %v437_v33 = vadd.f32 %v1248_v31, %v431_v32  ;;  %v1332_v34 = vpop.f32.mrb[1].mxu1 }
 0x3bf   : > { %v434_v35 = vpop.f32.mrb[2].mxu1 }
 0x3c0   : > { %1454 = vtanh.f32 %v437_v33  ;;  %v1333_v36 = vpop.f32.mrb[3].mxu1  ;;  %v1250_v38 = vmul.f32 -1.442695, %v437_v33 }
 0x3c2   : > { %1456 = vpow2.f32 %v1250_v38 }
 0x3ca   : > { %v1455_v37 = vpop.eup %1454 }
 0x3cb   : > { %452 = vrot.lane.b32.xlu0 %v1455_v37, %s1592_s10 }
 0x3cc   : > { %v1457_v39 = vpop.eup %1456 }
 0x3cd   : > { %v441_v40 = vadd.f32 1.0, %v1457_v39 }
 0x3cf   : > { %1458 = vrcp.f32 %v441_v40 }
 0x3d9   : > { %v1459_v41 = vpop.eup %1458 }
 0x3da   : > { %v450_v45 = vmul.f32 %v1459_v41, %v448_v44 }
 0x43d   : > { %v453_v42 = vpop.permute.xlu0 %452 }
 0x43e   : > { %v455_v43 = vmul.f32 %v1459_v41, %v453_v42 }
 0x440   : > { %457 = vrot.lane.b32.xlu0 %v455_v43, %s1593_s11 }
 0x4b2   : > { %v458_v46 = vpop.permute.xlu0 %457 }
 0x4b3   : > { %v460_v47 = vadd.f32 %v458_v46, %v450_v45  ;;  %v665_v45 = vld [vmem:[%s664_s29] sm:$0xff]  ;;  %s1058_s29 = sshll.u32 %s1731_s23, 4  ;;  %s1889_s29 = int_to_ptr.vmem [resolvable:$true] %s1058_s29 }
 0x4b5   : > { %1460 = vtanh.f32 %v460_v47 }
 0x4bf   : > { %v1461_v48 = vpop.eup %1460 }
 0x4c0   : > { %463 = vrot.lane.b32.xlu1 %v1461_v48, %s1592_s10 }
 0x4c4   : > { %468 = vrot.lane.b32.xlu1 %v460_v47, %s1594_s18 }
 0x532   : > { %v464_v49 = vpop.permute.xlu1 %463 }
 0x533   : > { %v466_v50 = vmul.f32 %v1459_v41, %v464_v49 }
 0x535   : > { %473 = vrot.lane.b32.xlu0 %v466_v50, %s1593_s11 }
 0x536   : > { %v469_v51 = vpop.permute.xlu1 %468 }
 0x537   : > { %471 = vst.msk [vmem:[#allocation3] sm:$0xff] %vm276_vm0, %v469_v51 }
 0x53e   : > { %v537_v52 = vld [vmem:[#allocation3] sm:$0xff] }
 0x53f   : > { %539 = vrot.lane.b32.xlu1 %v537_v52, %s1593_s11 }
 0x5a7   : > { %v474_v53 = vpop.permute.xlu0 %473 }
 0x5a8   : > { %476 = vst.msk [vmem:[#allocation2] sm:$0xff] %vm276_vm0, %v474_v53  ;;  %1252 = vst.msk [vmem:[%s1127_s30 + $0x8] sm:$0xff] %vm276_vm0, %v474_v53  ;;  %s751_s30 = scalar_lea.vmem %s1731_s23, %s1814_s28 [#allocation4]  ;;  %s1165_s28 = scalar_lea.vmem %s1715_s8, %s1280_s27 }
 0x5a9   : > { %s1293_s8 = sshll.u32 %s1580_s15, 10  ;;  %s1510_s15 = scalar_lea.vmem %s1889_s29, 1024 }
 0x5aa   : > { %p1511_p12 = scmp.ne.s32.totalorder %s1889_s29, %s1510_s15 }
 0x5ac   : > { %p1512_p13 = pnand %p1511_p12, %p1658_p4 }
 0x5ae   : > { %p1513_p0 = pneg %p1512_p13 }
 0x5af   : > { %v484_v54 = vld [vmem:[#allocation2] sm:$0xff] }
 0x5b0   : > { %v485_v55 = vpack.c.bf16 %v484_v54, %v484_v54 }
 0x5b1   : > { %v540_v8 = vpop.permute.xlu1 %539 }
 0x5b2   : > { %1339 = vmatmul.mubr.msk.bf16.vlgmr.msra.gmra.mrb[4].mxu0 %vm276_vm0, %v485_v55 }
 0x5b3   : > { %1351 = vmatpush3.bf16.msra.mxu0 %v1691_v1  ;;  %1354 = vmatprep.mubr.msk.bf16.mxu0 %vm1591_vm1, %v1590_v0 }
 0x5b4   : > { %1352 = vmatprep.subr.bf16.mxu0 %v1590_v0 }
 0x5b7   : > { %1353 = vmatpush3.bf16.msra.mxu0 %v1694_v2 }
 0x5b8   : > { %1366 = vmatprep.subr.bf16.mxu0 %v1590_v0 }
 0x685   : > { %v523_v57 = vpop.f32.mrb[4].mxu0 }
 0x686   : > { %v529_v58 = vadd.f32 %v1254_v56, %v523_v57  ;;  %v1340_v59 = vpop.f32.mrb[5].mxu0 }
 0x687   : > { %v526_v60 = vpop.f32.mrb[6].mxu0 }
 0x688   : > { %1462 = vtanh.f32 %v529_v58  ;;  %v1341_v61 = vpop.f32.mrb[7].mxu0  ;;  %v1256_v63 = vmul.f32 -1.442695, %v529_v58 }
 0x68a   : > { %1464 = vpow2.f32 %v1256_v63 }
 0x692   : > { %v1463_v62 = vpop.eup %1462 }
 0x693   : > { %544 = vrot.lane.b32.xlu0 %v1463_v62, %s1592_s10 }
 0x694   : > { %v1465_v3 = vpop.eup %1464 }
 0x695   : > { %v533_v4 = vadd.f32 1.0, %v1465_v3 }
 0x697   : > { %1466 = vrcp.f32 %v533_v4 }
 0x6a1   : > { %v1467_v5 = vpop.eup %1466 }
 0x6a2   : > { %v542_v9 = vmul.f32 %v1467_v5, %v540_v8 }
 0x705   : > { %v545_v6 = vpop.permute.xlu0 %544 }
 0x706   : > { %v547_v7 = vmul.f32 %v1467_v5, %v545_v6 }
 0x708   : > { %549 = vrot.lane.b32.xlu0 %v547_v7, %s1593_s11 }
 0x77a   : > { %v550_v10 = vpop.permute.xlu0 %549 }
 0x77b   : > { %v552_v11 = vadd.f32 %v550_v10, %v542_v9  ;;  %v1269_v9 = vld [vmem:[%s1149_s5 + $0x28] sm:$0xff] }
 0x77d   : > { %1468 = vtanh.f32 %v552_v11 }
 0x787   : > { %v1469_v12 = vpop.eup %1468 }
 0x788   : > { %555 = vrot.lane.b32.xlu1 %v1469_v12, %s1592_s10 }
 0x78c   : > { %560 = vrot.lane.b32.xlu1 %v552_v11, %s1594_s18 }
 0x7fa   : > { %v556_v13 = vpop.permute.xlu1 %555 }
 0x7fb   : > { %v558_v14 = vmul.f32 %v1467_v5, %v556_v13 }
 0x7fd   : > { %565 = vrot.lane.b32.xlu0 %v558_v14, %s1593_s11 }
 0x7fe   : > { %v561_v15 = vpop.permute.xlu1 %560 }
 0x7ff   : > { %563 = vst.msk [vmem:[#allocation3] sm:$0xff] %vm276_vm0, %v561_v15 }
 0x806   : > { %v628_v16 = vld [vmem:[#allocation3] sm:$0xff] }
 0x807   : > { %630 = vrot.lane.b32.xlu1 %v628_v16, %s1593_s11 }
 0x86f   : > { %v566_v17 = vpop.permute.xlu0 %565 }
 0x870   : > { %568 = vst.msk [vmem:[#allocation2] sm:$0xff] %vm276_vm0, %v566_v17  ;;  %1258 = vst.msk [vmem:[%s1135_s6 + $0x10] sm:$0xff] %vm276_vm0, %v566_v17  ;;  %s1153_s6 = scalar_lea.vmem %s1731_s23, %s1268_s4 [#allocation4] }
 0x877   : > { %v575_v18 = vld [vmem:[#allocation2] sm:$0xff] }
 0x878   : > { %v576_v19 = vpack.c.bf16 %v575_v18, %v575_v18 }
 0x879   : > { %v631_v33 = vpop.permute.xlu1 %630 }
 0x87a   : > { %1347 = vmatmul.mubr.msk.bf16.vlgmr.msra.gmra.mrb[4].mxu1 %vm276_vm0, %v576_v19 }
 0x87b   : > { %1359 = vmatpush3.bf16.msra.mxu1 %v1691_v1  ;;  %1362 = vmatprep.mubr.msk.bf16.mxu1 %vm1591_vm1, %v1590_v0 }
 0x87c   : > { %1360 = vmatprep.subr.bf16.mxu1 %v1590_v0 }
 0x87f   : > { %1361 = vmatpush3.bf16.msra.mxu1 %v1694_v2 }
 0x880   : > { %1374 = vmatprep.subr.bf16.mxu1 %v1590_v0 }
 0x94d   : > { %v614_v21 = vpop.f32.mrb[4].mxu1 }
 0x94e   : > { %v620_v22 = vadd.f32 %v1260_v20, %v614_v21  ;;  %v1348_v23 = vpop.f32.mrb[5].mxu1 }
 0x94f   : > { %v617_v24 = vpop.f32.mrb[6].mxu1 }
 0x950   : > { %1470 = vtanh.f32 %v620_v22  ;;  %v1349_v25 = vpop.f32.mrb[7].mxu1  ;;  %v1262_v27 = vmul.f32 -1.442695, %v620_v22 }
 0x952   : > { %1472 = vpow2.f32 %v1262_v27 }
 0x95a   : > { %v1471_v26 = vpop.eup %1470 }
 0x95b   : > { %635 = vrot.lane.b32.xlu0 %v1471_v26, %s1592_s10 }
 0x95c   : > { %v1473_v28 = vpop.eup %1472 }
 0x95d   : > { %v624_v29 = vadd.f32 1.0, %v1473_v28 }
 0x95f   : > { %1474 = vrcp.f32 %v624_v29 }
 0x969   : > { %v1475_v30 = vpop.eup %1474 }
 0x96a   : > { %v633_v34 = vmul.f32 %v1475_v30, %v631_v33 }
 0x9cd   : > { %v636_v31 = vpop.permute.xlu0 %635 }
 0x9ce   : > { %v638_v32 = vmul.f32 %v1475_v30, %v636_v31  ;;  %v1275_v31 = vld [vmem:[%s1157_s9 + $0x30] sm:$0xff] }
 0x9d0   : > { %640 = vrot.lane.b32.xlu0 %v638_v32, %s1593_s11 }
 0xa42   : > { %v641_v35 = vpop.permute.xlu0 %640 }
 0xa43   : > { %v643_v36 = vadd.f32 %v641_v35, %v633_v34 }
 0xa45   : > { %1476 = vtanh.f32 %v643_v36 }
 0xa4f   : > { %v1477_v37 = vpop.eup %1476 }
 0xa50   : > { %646 = vrot.lane.b32.xlu1 %v1477_v37, %s1592_s10 }
 0xa54   : > { %651 = vrot.lane.b32.xlu1 %v643_v36, %s1594_s18 }
 0xac2   : > { %v647_v38 = vpop.permute.xlu1 %646 }
 0xac3   : > { %v649_v39 = vmul.f32 %v1475_v30, %v647_v38 }
 0xac5   : > { %656 = vrot.lane.b32.xlu0 %v649_v39, %s1593_s11 }
 0xac6   : > { %v652_v40 = vpop.permute.xlu1 %651 }
 0xac7   : > { %654 = vst.msk [vmem:[#allocation3] sm:$0xff] %vm276_vm0, %v652_v40 }
 0xace   : > { %v719_v41 = vld [vmem:[#allocation3] sm:$0xff] }
 0xacf   : > { %721 = vrot.lane.b32.xlu1 %v719_v41, %s1593_s11 }
 0xb37   : > { %v657_v42 = vpop.permute.xlu0 %656 }
 0xb38   : > { %659 = vst.msk [vmem:[#allocation2] sm:$0xff] %vm276_vm0, %v657_v42  ;;  %1264 = vst.msk [vmem:[%s1141_s21 + $0x18] sm:$0xff] %vm276_vm0, %v657_v42  ;;  %s1161_s21 = scalar_lea.vmem %s1731_s23, %s1274_s7 [#allocation4] }
 0xb3f   : > { %v666_v43 = vld [vmem:[#allocation2] sm:$0xff] }
 0xb40   : > { %v667_v44 = vpack.c.bf16 %v666_v43, %v666_v43 }
 0xb41   : > { %v722_v58 = vpop.permute.xlu1 %721 }
 0xb42   : > { %1355 = vmatmul.mubr.msk.bf16.vlgmr.msra.gmra.mrb[8].mxu0 %vm276_vm0, %v667_v44 }
 0xb43   : > { %1367 = vmatpush3.bf16.msra.mxu0 %v1691_v1  ;;  %1370 = vmatprep.mubr.msk.bf16.mxu0 %vm1591_vm1, %v1590_v0 }
 0xb44   : > { %1368 = vmatprep.subr.bf16.mxu0 %v1590_v0 }
 0xb47   : > { %1369 = vmatpush3.bf16.msra.mxu0 %v1694_v2 }
 0xc15   : > { %v705_v46 = vpop.f32.mrb[8].mxu0 }
 0xc16   : > { %v711_v47 = vadd.f32 %v705_v46, %v665_v45  ;;  %v1356_v48 = vpop.f32.mrb[9].mxu0 }
 0xc17   : > { %v708_v49 = vpop.f32.mrb[10].mxu0 }
 0xc18   : > { %1478 = vtanh.f32 %v711_v47  ;;  %v1357_v50 = vpop.f32.mrb[11].mxu0  ;;  %v1267_v52 = vmul.f32 -1.442695, %v711_v47 }
 0xc1a   : > { %1480 = vpow2.f32 %v1267_v52 }
 0xc22   : > { %v1479_v51 = vpop.eup %1478 }
 0xc23   : > { %726 = vrot.lane.b32.xlu0 %v1479_v51, %s1592_s10 }
 0xc24   : > { %v1481_v53 = vpop.eup %1480 }
 0xc25   : > { %v715_v54 = vadd.f32 1.0, %v1481_v53 }
 0xc27   : > { %1482 = vrcp.f32 %v715_v54 }
 0xc31   : > { %v1483_v55 = vpop.eup %1482 }
 0xc32   : > { %v724_v59 = vmul.f32 %v1483_v55, %v722_v58 }
 0xc95   : > { %v727_v56 = vpop.permute.xlu0 %726 }
 0xc96   : > { %v729_v57 = vmul.f32 %v1483_v55, %v727_v56  ;;  %v1281_v56 = vld [vmem:[%s1165_s28 + $0x38] sm:$0xff] }
 0xc98   : > { %731 = vrot.lane.b32.xlu0 %v729_v57, %s1593_s11 }
 0xd0a   : > { %v732_v60 = vpop.permute.xlu0 %731 }
 0xd0b   : > { %v734_v61 = vadd.f32 %v732_v60, %v724_v59 }
 0xd0d   : > { %1484 = vtanh.f32 %v734_v61 }
 0xd17   : > { %v1485_v62 = vpop.eup %1484 }
 0xd18   : > { %737 = vrot.lane.b32.xlu1 %v1485_v62, %s1592_s10 }
 0xd1c   : > { %742 = vrot.lane.b32.xlu1 %v734_v61, %s1594_s18 }
 0xd8a   : > { %v738_v63 = vpop.permute.xlu1 %737 }
 0xd8b   : > { %v740_v3 = vmul.f32 %v1483_v55, %v738_v63 }
 0xd8d   : > { %747 = vrot.lane.b32.xlu0 %v740_v3, %s1593_s11 }
 0xd8e   : > { %v743_v4 = vpop.permute.xlu1 %742 }
 0xd8f   : > { %745 = vst.msk [vmem:[#allocation3] sm:$0xff] %vm276_vm0, %v743_v4 }
 0xd96   : > { %v811_v5 = vld [vmem:[#allocation3] sm:$0xff] }
 0xd97   : > { %813 = vrot.lane.b32.xlu1 %v811_v5, %s1593_s11 }
 0xdff   : > { %v748_v6 = vpop.permute.xlu0 %747 }
 0xe00   : > { %750 = vst.msk [vmem:[#allocation2] sm:$0xff] %vm276_vm0, %v748_v6  ;;  %752 = vst.msk [vmem:[%s751_s30] sm:$0xff] %vm276_vm0, %v748_v6  ;;  %s1169_s30 = scalar_lea.vmem %s1731_s23, %s1280_s27 [#allocation4] }
 0xe07   : > { %v758_v7 = vld [vmem:[#allocation2] sm:$0xff] }
 0xe08   : > { %v759_v8 = vpack.c.bf16 %v758_v7, %v758_v7 }
 0xe09   : > { %v814_v19 = vpop.permute.xlu1 %813 }
 0xe0a   : > { %1363 = vmatmul.mubr.msk.bf16.vlgmr.msra.gmra.mrb[8].mxu1 %vm276_vm0, %v759_v8 }
 0xe0b   : > { %1375 = vmatpush3.bf16.msra.mxu1 %v1691_v1  ;;  %1378 = vmatprep.mubr.msk.bf16.mxu1 %vm1591_vm1, %v1590_v0 }
 0xe0c   : > { %1376 = vmatprep.subr.bf16.mxu1 %v1590_v0 }
 0xe0f   : > { %1377 = vmatpush3.bf16.msra.mxu1 %v1694_v2 }
 0xedd   : > { %v797_v10 = vpop.f32.mrb[8].mxu1 }
 0xede   : > { %v803_v11 = vadd.f32 %v1269_v9, %v797_v10  ;;  %v1364_v12 = vpop.f32.mrb[9].mxu1 }
 0xedf   : > { %v800_v13 = vpop.f32.mrb[10].mxu1 }
 0xee0   : > { %1486 = vtanh.f32 %v803_v11  ;;  %v1365_v14 = vpop.f32.mrb[11].mxu1  ;;  %v1271_v1 = vmul.f32 -1.442695, %v803_v11 }
 0xee2   : > { %1488 = vpow2.f32 %v1271_v1 }
 0xeea   : > { %v1487_v15 = vpop.eup %1486 }
 0xeeb   : > { %818 = vrot.lane.b32.xlu0 %v1487_v15, %s1592_s10 }
 0xeec   : > { %v1489_v16 = vpop.eup %1488 }
 0xeed   : > { %v807_v17 = vadd.f32 1.0, %v1489_v16 }
 0xeef   : > { %1490 = vrcp.f32 %v807_v17 }
 0xef9   : > { %v1491_v0 = vpop.eup %1490 }
 0xefa   : > { %v816_v20 = vmul.f32 %v1491_v0, %v814_v19 }
 0xf5d   : > { %v819_v2 = vpop.permute.xlu0 %818 }
 0xf5e   : > { %v821_v18 = vmul.f32 %v1491_v0, %v819_v2 }
 0xf60   : > { %823 = vrot.lane.b32.xlu0 %v821_v18, %s1593_s11 }
 0xfd2   : > { %v824_v21 = vpop.permute.xlu0 %823 }
 0xfd3   : > { %v826_v22 = vadd.f32 %v824_v21, %v816_v20 }
 0xfd5   : > { %1492 = vtanh.f32 %v826_v22 }
 0xfdf   : > { %v1493_v23 = vpop.eup %1492 }
 0xfe0   : > { %829 = vrot.lane.b32.xlu1 %v1493_v23, %s1592_s10 }
 0xfe4   : > { %834 = vrot.lane.b32.xlu1 %v826_v22, %s1594_s18 }
0x1052   : > { %v830_v24 = vpop.permute.xlu1 %829 }
0x1053   : > { %v832_v25 = vmul.f32 %v1491_v0, %v830_v24 }
0x1055   : > { %839 = vrot.lane.b32.xlu0 %v832_v25, %s1593_s11 }
0x1056   : > { %v835_v26 = vpop.permute.xlu1 %834 }
0x1057   : > { %837 = vst.msk [vmem:[#allocation3] sm:$0xff] %vm276_vm0, %v835_v26 }
0x105e   : > { %v903_v27 = vld [vmem:[#allocation3] sm:$0xff] }
0x105f   : > { %905 = vrot.lane.b32.xlu1 %v903_v27, %s1593_s11 }
0x10c7   : > { %v840_v28 = vpop.permute.xlu0 %839 }
0x10c8   : > { %842 = vst.msk [vmem:[#allocation2] sm:$0xff] %vm276_vm0, %v840_v28  ;;  %1273 = vst.msk [vmem:[%s1153_s6 + $0x28] sm:$0xff] %vm276_vm0, %v840_v28  ;;  %s1887_s6 = scalar_lea.hbm %s1948_s2, %s1293_s8 }
0x10cf   : > { %v850_v29 = vld [vmem:[#allocation2] sm:$0xff] }
0x10d0   : > { %v851_v30 = vpack.c.bf16 %v850_v29, %v850_v29 }
0x10d1   : > { %v906_v44 = vpop.permute.xlu1 %905 }
0x10d2   : > { %1371 = vmatmul.mubr.msk.bf16.vlgmr.msra.gmra.mrb[12].mxu0 %vm276_vm0, %v851_v30 }
0x11a5   : > { %v889_v32 = vpop.f32.mrb[12].mxu0 }
0x11a6   : > { %v895_v33 = vadd.f32 %v1275_v31, %v889_v32  ;;  %v1372_v34 = vpop.f32.mrb[13].mxu0 }
0x11a7   : > { %v892_v35 = vpop.f32.mrb[14].mxu0 }
0x11a8   : > { %1494 = vtanh.f32 %v895_v33  ;;  %v1373_v36 = vpop.f32.mrb[15].mxu0  ;;  %v1277_v38 = vmul.f32 -1.442695, %v895_v33 }
0x11aa   : > { %1496 = vpow2.f32 %v1277_v38 }
0x11b2   : > { %v1495_v37 = vpop.eup %1494 }
0x11b3   : > { %910 = vrot.lane.b32.xlu0 %v1495_v37, %s1592_s10 }
0x11b4   : > { %v1497_v39 = vpop.eup %1496 }
0x11b5   : > { %v899_v40 = vadd.f32 1.0, %v1497_v39 }
0x11b7   : > { %1498 = vrcp.f32 %v899_v40 }
0x11c1   : > { %v1499_v41 = vpop.eup %1498 }
0x11c2   : > { %v908_v45 = vmul.f32 %v1499_v41, %v906_v44 }
0x1225   : > { %v911_v42 = vpop.permute.xlu0 %910 }
0x1226   : > { %v913_v43 = vmul.f32 %v1499_v41, %v911_v42 }
0x1228   : > { %915 = vrot.lane.b32.xlu0 %v913_v43, %s1593_s11 }
0x129a   : > { %v916_v46 = vpop.permute.xlu0 %915 }
0x129b   : > { %v918_v47 = vadd.f32 %v916_v46, %v908_v45 }
0x129d   : > { %1500 = vtanh.f32 %v918_v47 }
0x12a7   : > { %v1501_v48 = vpop.eup %1500 }
0x12a8   : > { %921 = vrot.lane.b32.xlu1 %v1501_v48, %s1592_s10 }
0x12ac   : > { %926 = vrot.lane.b32.xlu1 %v918_v47, %s1594_s18 }
0x131a   : > { %v922_v49 = vpop.permute.xlu1 %921 }
0x131b   : > { %v924_v50 = vmul.f32 %v1499_v41, %v922_v49 }
0x131d   : > { %931 = vrot.lane.b32.xlu0 %v924_v50, %s1593_s11 }
0x131e   : > { %v927_v51 = vpop.permute.xlu1 %926 }
0x131f   : > { %929 = vst.msk [vmem:[#allocation3] sm:$0xff] %vm276_vm0, %v927_v51 }
0x1326   : > { %v995_v52 = vld [vmem:[#allocation3] sm:$0xff] }
0x1327   : > { %997 = vrot.lane.b32.xlu1 %v995_v52, %s1593_s11 }
0x138f   : > { %v932_v53 = vpop.permute.xlu0 %931 }
0x1390   : > { %934 = vst.msk [vmem:[#allocation2] sm:$0xff] %vm276_vm0, %v932_v53  ;;  %1279 = vst.msk [vmem:[%s1161_s21 + $0x30] sm:$0xff] %vm276_vm0, %v932_v53 }
0x1397   : > { %v942_v54 = vld [vmem:[#allocation2] sm:$0xff] }
0x1398   : > { %v943_v55 = vpack.c.bf16 %v942_v54, %v942_v54 }
0x1399   : > { %v998_v8 = vpop.permute.xlu1 %997 }
0x139a   : > { %1379 = vmatmul.mubr.msk.bf16.vlgmr.msra.gmra.mrb[12].mxu1 %vm276_vm0, %v943_v55 }
0x146d   : > { %v981_v57 = vpop.f32.mrb[12].mxu1 }
0x146e   : > { %v987_v58 = vadd.f32 %v1281_v56, %v981_v57  ;;  %v1380_v59 = vpop.f32.mrb[13].mxu1 }
0x146f   : > { %v984_v60 = vpop.f32.mrb[14].mxu1 }
0x1470   : > { %1502 = vtanh.f32 %v987_v58  ;;  %v1381_v61 = vpop.f32.mrb[15].mxu1  ;;  %v1283_v63 = vmul.f32 -1.442695, %v987_v58 }
0x1472   : > { %1504 = vpow2.f32 %v1283_v63 }
0x147a   : > { %v1503_v62 = vpop.eup %1502 }
0x147b   : > { %1002 = vrot.lane.b32.xlu0 %v1503_v62, %s1592_s10 }
0x147c   : > { %v1505_v3 = vpop.eup %1504 }
0x147d   : > { %v991_v4 = vadd.f32 1.0, %v1505_v3 }
0x147f   : > { %1506 = vrcp.f32 %v991_v4 }
0x1489   : > { %v1507_v5 = vpop.eup %1506 }
0x148a   : > { %v1000_v9 = vmul.f32 %v1507_v5, %v998_v8 }
0x14ed   : > { %v1003_v6 = vpop.permute.xlu0 %1002 }
0x14ee   : > { %v1005_v7 = vmul.f32 %v1507_v5, %v1003_v6 }
0x14f0   : > { %1007 = vrot.lane.b32.xlu0 %v1005_v7, %s1593_s11 }
0x1562   : > { %v1008_v10 = vpop.permute.xlu0 %1007 }
0x1563   : > { %v1010_v11 = vadd.f32 %v1008_v10, %v1000_v9 }
0x1565   : > { %1508 = vtanh.f32 %v1010_v11 }
0x156f   : > { %v1509_v12 = vpop.eup %1508 }
0x1570   : > { %1013 = vrot.lane.b32.xlu1 %v1509_v12, %s1592_s10  ;;  %s1895_s10 = scalar_lea.sflag [#allocation5], %s230_s19 }
0x1574   : > { %1018 = vrot.lane.b32.xlu1 %v1010_v11, %s1594_s18 }
0x15e2   : > { %v1014_v13 = vpop.permute.xlu1 %1013 }
0x15e3   : > { %v1016_v14 = vmul.f32 %v1507_v5, %v1014_v13 }
0x15e5   : > { %1023 = vrot.lane.b32.xlu0 %v1016_v14, %s1593_s11  ;;  %s1595_s11 = smov [#allocation4]  }
0x15e6   : > { %v1019_v15 = vpop.permute.xlu1 %1018  ;;  %s1514_s18 = sshll.u32 %s1595_s11, 4  ;;  %s1515_s18 = int_to_ptr.vmem [resolvable:$false] %s1514_s18 }
0x15e7   : > { %1021 = vst.msk [vmem:[#allocation3] sm:$0xff] %vm276_vm0, %v1019_v15  ;;  %s1516_s23 = scalar_lea.vmem %s1515_s18, 2048  ;;  %p1517_p1 = scmp.lt.s32.totalorder %s1889_s29, %s1515_s18 }
0x15e8   : > { %p1518_p2 = scmp.lt.s32.totalorder %s1516_s23, %s1510_s15 }
0x15ea   : > { %p1519_p3 = por %p1518_p2, %p1517_p1 }
0x15ec   : > { %p1520_p5 = pnand %p1519_p3, %p1513_p0 }
0x1657   : > { %v1024_v1 = vpop.permute.xlu0 %1023 }
0x1658   : > { %1026 = vst.msk [vmem:[#allocation2] sm:$0xff] %vm276_vm0, %v1024_v1  ;;  %1285 = vst.msk [vmem:[%s1169_s30 + $0x38] sm:$0xff] %vm276_vm0, %v1024_v1 }
0x1659   : > { %1523 = shalt.err (!%p1520_p5)
}
0x165a   : > { %s1524_s19 = scalar_lea.hbm %s1887_s6, 1024  ;;  %s1528_s21 = scalar_lea.hbm %s1948_s2, 2048 }
0x165b   : > { %p1525_p6 = scmp.ne.s32.totalorder %s1887_s6, %s1524_s19  ;;  %p1529_p10 = scmp.lt.u32.totalorder %s1887_s6, %s1948_s2 }
0x165c   : > { %p1530_p11 = scmp.lt.u32.totalorder %s1528_s21, %s1524_s19  ;;  %p1532_p13 = scmp.lt.u32.totalorder %s1524_s19, %s1887_s6 }
0x165d   : > { %p1526_p7 = pnand %p1525_p6, %p1658_p4 }
0x165e   : > { %p1531_p12 = por %p1530_p11, %p1529_p10 }
0x165f   : > { %p1527_p9 = pneg %p1526_p7 }
0x1660   : > { %p1533_p0 = por %p1532_p13, %p1531_p12 }
0x1662   : > { %p1534_p1 = pnand %p1533_p0, %p1527_p9 }
0x1664   : > { %1537 = shalt.err (!%p1534_p1)
}
0x1665   : > { %s1596_s8 = smov 128   ;;  %s1597_s30 = smov 8   ;;  %v1032_v16 = vld [vmem:[#allocation2] sm:$0xff] }
0x1666   : > { %1382 = dma.vmem_to_hbm [thread:$0]  (%p1658_p4), %s1889_s29, 1024, %s1887_s6, %s1895_s10, %s1596_s8, %s1596_s8, %s1597_s30  }
0x1667   : > { %s1241_s4 = sshll.u32 %s1682_s26, 3 }
0x1668   : > { %s270_s11 = scalar_lea.vmem %s1949_s3, %s1241_s4 }
0x1669   : > { %1033 = vst.msk [vmem:[%s270_s11] sm:$0xff] %vm276_vm0, %v1032_v16 }
0x166a PF: > { %p1388_p2 = scmp.ge.s32.totalorder %s1588_s17, 2  ;;  %s1076_s18 = sand.u32 1, %s1568_s12  }
0x166b   : > { %s1077_s23 = scalar_lea.sflag [#allocation5], %s1076_s18 }
0x166c   : > { %p1385_p3 = pnand %p1388_p2, %p1665_p8 }
0x166e   : > { %1563 = dma.done.wait (!%p1385_p3), %s1077_s23, 1024  }
0x166f   : > { %1565 = vsyncadd (!%p1385_p3), %s1077_s23, 4294966272  ;;  %s17_s17 = sadd.s32 1, %s1588_s17   ;;  %s1952_s12 = smov %s1572_s13 }
0x1670   : > { %p14_p4 = scmp.ge.s32.totalorder %s17_s17, 4   ;;  %s1953_s13 = smov %s1576_s14 }
0x1671   : > { %s1954_s14 = smov %s1671_s25  ;;  %s1955_s15 = smov %s1584_s16 }
0x1672   : > { %s1956_s16 = smov %s1958_s20  ;;  %16 = sbr.rel (!%p14_p4) target bundleno = 4 (0x4), region = 102 }
0x1679   :  { %1089 = vsyncpa [#allocation5], 1 }
0x167a   :  { %1091 = vsyncpa [#allocation5 + $0x1], 1 }

// kernel: _lambda_.9
= control target key start
LH: loop header
LB: loop body
LE: loop exit
PB: predicated region body
PF: predicated region fallthrough
CT: control target
= control target key end

     0   :  { %v170_v1 = vmov 0.0   ;;  %vm171_vm0 = vmmov 0   ;;  %s223_s0 = inlined_call_operand.vmem [shape: bf16[2,64], index: 0, kind: input, shape index: {}]   ;;  %s224_s1 = inlined_call_operand.vmem [shape: bf16[64,16], index: 1, kind: input, shape index: {}]   ;;  %s225_s2 = inlined_call_operand.vmem [shape: f32[1,16], index: 2, kind: input, shape index: {}]   ;;  %s226_s3 = inlined_call_operand.hbm [shape: f32[2,16], index: 3, kind: output, shape index: {}]  }
   0x1   :  { %v142_v0 = vld [vmem:[%s224_s1] sm:$0xff]   ;;  %127 = vmatprep.subr.bf16.mxu0 %v170_v1  ;;  %v143_v2 = vld [vmem:[%s224_s1 + $0x8] sm:$0xff]   ;;  %135 = vmatprep.mubr.msk.bf16.mxu0 %vm171_vm0, %v170_v1 }
   0x2   :  { %128 = vmatpush3.bf16.msra.mxu0 %v142_v0 }
   0x3   :  { %129 = vmatprep.subr.bf16.mxu0 %v170_v1 }
   0x4   :  { %8 = vsyncpa [#allocation3], 0  ;;  %v144_v3 = vld [vmem:[%s224_s1 + $0x10] sm:$0xff]   ;;  %v145_v4 = vld [vmem:[%s224_s1 + $0x18] sm:$0xff]   ;;  %vm56_vm1 = vcmask 523264   ;;  %s172_s24 = smov [#allocation2]  }
   0x5   :  { %v16_v5 = vld [vmem:[%s223_s0] sm:$0x1]  ;;  %s108_s25 = sshll.u32 %s172_s24, 4  ;;  %vm100_vm2 = vcmask 123904   ;;  %s109_s25 = int_to_ptr.vmem [resolvable:$true] %s108_s25 }
   0x6   :  { %130 = vmatpush3.bf16.msra.mxu0 %v143_v2  ;;  %v116_v6 = vld [vmem:[%s225_s2] ss:$0 sm:$0xff]  ;;  %s146_s1 = scalar_lea.vmem %s109_s25, 32  ;;  %p151_p1 = scmp.lt.s32.totalorder %s109_s25, %s109_s25 }
   0x7   :  { %131 = vmatprep.subr.bf16.mxu0 %v170_v1  ;;  %p147_p0 = scmp.ne.s32.totalorder %s109_s25, %s146_s1  ;;  %p152_p2 = scmp.lt.s32.totalorder %s146_s1, %s146_s1 }
   0x9   :  { %p153_p3 = por %p152_p2, %p151_p1 }
   0xa   :  { %132 = vmatpush3.bf16.msra.mxu0 %v144_v3 }
   0xb   :  { %133 = vmatprep.subr.bf16.mxu0 %v170_v1  ;;  %p154_p4 = pnand %p153_p3, %p147_p0 }
   0xe   :  { %134 = vmatpush3.bf16.msra.mxu0 %v145_v4 }
  0x11   :  { %136 = vmatmul.mubr.msk.bf16.vlgmr.msra.gmra.mrb[0].mxu0 %vm56_vm1, %v16_v5 }
  0xe4   :  { %v94_v7 = vpop.f32.mrb[0].mxu0 }
  0xe5   :  { %v95_v8 = vadd.f32 %v116_v6, %v94_v7  ;;  %v137_v9 = vpop.f32.mrb[1].mxu0 }
  0xe6   :  { %v97_v10 = vpop.f32.mrb[2].mxu0 }
  0xe7   :  { %v138_v11 = vpop.f32.mrb[3].mxu0  ;;  %101 = vst.msk [vmem:[#allocation2] sm:$0x3] %vm100_vm2, %v95_v8 }
  0xe8   :  { %157 = shalt.err (!%p154_p4)
}
  0xe9   :  { %s158_s2 = scalar_lea.hbm %s226_s3, 32 }
  0xea   :  { %p159_p5 = scmp.ne.s32.totalorder %s226_s3, %s158_s2  ;;  %p162_p6 = scmp.lt.u32.totalorder %s158_s2, %s226_s3 }
  0xec   :  { %p164_p7 = pnand %p162_p6, %p159_p5 }
  0xee   :  { %167 = shalt.err (!%p164_p7)
}
  0xef   :  { %111 = dma.vmem_to_hbm [thread:$0]  %s109_s25, 32, %s226_s3, [#allocation3]  }
  0xf0   :  { %168 = dma.done.wait [#allocation3], 32  }
  0xf1   :  { %169 = vsyncadd [#allocation3], 4294967264 }
  0xf2   :  { %115 = vsyncpa [#allocation3], 1 }

</bundles_post_ra>
